<compile_context>
chip_gen: v7x
topology: tpu7x:2x2x1
jax: 0.10.0
libtpu: 0.0.40
codegen_flags: <defaults>
</compile_context>

<pallas_src>
import functools

import jax
import jax.numpy as jnp
from jax.experimental import pallas as pl
from jax.experimental.pallas import tpu as pltpu

LANE = 128
MATMUL_DTYPE = jnp.bfloat16   # MXU-native operands; accumulation stays f32


def _round_up(x, m):
    return (x + m - 1) // m * m


def _swish_f32(x):
    # Swish in f32; sigmoid via EUP exp + approximate reciprocal so the
    # epilogue rides the EUP slot instead of the VALU slots.
    return x * pl.reciprocal(1.0 + jnp.exp(-x), approx=True)


# ----------------------------------------------------------------------------
# Kernel 1: matmul + Swish, no bias (conv1 / conv2 after host im2col).
# ----------------------------------------------------------------------------
def _mm_swish_kernel(x_ref, w_ref, o_ref):
    acc = jnp.dot(x_ref[...], w_ref[...], preferred_element_type=jnp.float32)
    o_ref[...] = _swish_f32(acc).astype(o_ref.dtype)


def matmul_swish(x, w, *, tile_m=256):
    """x: (M, K), w: (K, N) with N % 128 == 0 -> swish(x @ w), f32 accumulate."""
    M, K = x.shape
    K2, N = w.shape
    assert K == K2 and N % LANE == 0
    tm = tile_m if (M >= tile_m and M % tile_m == 0) else M
    flops = 2 * M * K * N
    bytes_acc = (M * K + K * N + M * N) * 2
    return pl.pallas_call(
        _mm_swish_kernel,
        out_shape=jax.ShapeDtypeStruct((M, N), MATMUL_DTYPE),
        grid=(M // tm,),
        in_specs=[
            pl.BlockSpec((tm, K), lambda i: (i, 0)),
            pl.BlockSpec((K, N), lambda i: (0, 0)),
        ],
        out_specs=pl.BlockSpec((tm, N), lambda i: (i, 0)),
        compiler_params=pltpu.CompilerParams(
            dimension_semantics=("parallel",)),  # rows independent -> both TCs on v7x
        cost_estimate=pl.CostEstimate(flops=flops, transcendentals=M * N,
                                      bytes_accessed=bytes_acc),
    )(x, w)


# ----------------------------------------------------------------------------
# Kernel 2: fused conv3 (matmul+Swish) + fc1 (+bias, Swish) + fc2 (+bias).
# All intermediates stay in VMEM; fc1 over the flattened conv3 output is done
# as a sum of per-spatial-position (B,128)@(128,512) matmuls.
# ----------------------------------------------------------------------------
def _tail_kernel(p3_ref, w3_ref, w1_ref, b1_ref, w2_ref, b2_ref, o_ref, *,
                 batch, n_spatial):
    # conv3 (no bias) + Swish  -> (n_spatial*batch, 128), rows ordered (s, b)
    y3 = jnp.dot(p3_ref[...], w3_ref[...], preferred_element_type=jnp.float32)
    y3 = _swish_f32(y3).astype(w1_ref.dtype)
    # fc1: sum over spatial positions (avoids in-kernel lane-merging reshape)
    h = jnp.zeros((batch, b1_ref.shape[-1]), jnp.float32)
    for s in range(n_spatial):
        h = h + jnp.dot(y3[s * batch:(s + 1) * batch, :], w1_ref[s],
                        preferred_element_type=jnp.float32)
    h = _swish_f32(h + b1_ref[...])
    # fc2 (bias, no activation); output padded to 128 lanes (lane-dense store)
    stats = jnp.dot(h.astype(w2_ref.dtype), w2_ref[...],
                    preferred_element_type=jnp.float32)
    o_ref[...] = stats + b2_ref[...]


def conv3_fc_fused(patches3, w3, w1, b1, w2, b2, *, batch, n_spatial):
    M3, K3 = patches3.shape
    assert M3 == batch * n_spatial
    N1 = b1.shape[-1]
    Nout = w2.shape[-1]
    kernel = functools.partial(_tail_kernel, batch=batch, n_spatial=n_spatial)
    flops = 2 * (M3 * K3 * LANE + batch * n_spatial * LANE * N1 + batch * N1 * Nout)
    bytes_acc = 2 * (M3 * K3 + K3 * LANE + n_spatial * LANE * N1 + N1 * Nout) \
        + 4 * (N1 + Nout + batch * Nout)
    return pl.pallas_call(
        kernel,
        out_shape=jax.ShapeDtypeStruct((batch, Nout), jnp.float32),
        grid=(1,),
        in_specs=[
            pl.BlockSpec((M3, K3), lambda i: (0, 0)),
            pl.BlockSpec((K3, LANE), lambda i: (0, 0)),
            pl.BlockSpec((n_spatial, LANE, N1), lambda i: (0, 0, 0)),
            pl.BlockSpec((1, N1), lambda i: (0, 0)),
            pl.BlockSpec((N1, Nout), lambda i: (0, 0)),
            pl.BlockSpec((1, Nout), lambda i: (0, 0)),
        ],
        out_specs=pl.BlockSpec((batch, Nout), lambda i: (0, 0)),
        compiler_params=pltpu.CompilerParams(
            dimension_semantics=("arbitrary",)),
        cost_estimate=pl.CostEstimate(flops=flops,
                                      transcendentals=M3 * LANE + batch * N1,
                                      bytes_accessed=bytes_acc),
    )(patches3, w3, w1, b1, w2, b2)


# ----------------------------------------------------------------------------
# Host-side glue: NHWC im2col (pad / strided slice / concat only — no
# transposes), and one-time weight packing at init.
# ----------------------------------------------------------------------------
def _im2col_nhwc(x, k, s, p):
    """x: (B, H, W, C) -> (B, Ho, Wo, k*k*C); column index = (ki*k+kj)*C + c."""
    B, H, W, C = x.shape
    xp = jnp.pad(x, ((0, 0), (p, p), (p, p), (0, 0)))
    Ho = (H + 2 * p - k) // s + 1
    Wo = (W + 2 * p - k) // s + 1
    cols = []
    for ki in range(k):
        for kj in range(k):
            cols.append(xp[:, ki:ki + s * Ho:s, kj:kj + s * Wo:s, :])
    return jnp.concatenate(cols, axis=-1), Ho, Wo


def _pack_conv_weight(w_oihw, n_pad=LANE):
    """PyTorch (Cout, Cin, k, k) -> (k*k*Cin, Cout padded to 128), bf16."""
    Cout, Cin, k, _ = w_oihw.shape
    w = jnp.transpose(w_oihw, (2, 3, 1, 0)).reshape(k * k * Cin, Cout)
    if Cout < n_pad:
        w = jnp.pad(w, ((0, 0), (0, n_pad - Cout)))
    return w.astype(MATMUL_DTYPE)


def init_params(key, zP_dim=3, zS_dim=5):
    ks = jax.random.split(key, 7)
    conv1 = 0.05 * jax.random.normal(ks[0], (32, 3, 4, 4), jnp.float32)
    conv2 = 0.05 * jax.random.normal(ks[1], (64, 32, 4, 4), jnp.float32)
    conv3 = 0.05 * jax.random.normal(ks[2], (128, 64, 4, 4), jnp.float32)
    fc1_w = 0.02 * jax.random.normal(ks[3], (512, 128 * 4 * 4), jnp.float32)
    fc1_b = 0.01 * jax.random.normal(ks[4], (512,), jnp.float32)
    out_dim = 2 * zP_dim + 2 * zS_dim
    fc2_w = 0.02 * jax.random.normal(ks[5], (out_dim, 512), jnp.float32)
    fc2_b = 0.01 * jax.random.normal(ks[6], (out_dim,), jnp.float32)

    p = {}
    p["conv1_w"] = _pack_conv_weight(conv1)      # (48,   128), 32 real cols
    p["conv2_w"] = _pack_conv_weight(conv2)      # (512,  128), 64 real cols
    p["conv3_w"] = _pack_conv_weight(conv3)      # (1024, 128)
    # fc1: permute columns once so the fused kernel's spatial-major layout
    # matches PyTorch's NCHW flatten: W1p[s, c, n] = fc1_w[n, c*16 + s].
    w1 = fc1_w.T.reshape(128, 16, 512).transpose(1, 0, 2)   # (16, 128, 512)
    p["fc1_w"] = w1.astype(MATMUL_DTYPE)
    p["fc1_b"] = fc1_b.reshape(1, 512)                       # f32 epilogue
    n_out_pad = _round_up(out_dim, LANE)                     # 128
    w2 = jnp.zeros((512, n_out_pad), jnp.float32).at[:, :out_dim].set(fc2_w.T)
    p["fc2_w"] = w2.astype(MATMUL_DTYPE)
    p["fc2_b"] = jnp.zeros((1, n_out_pad), jnp.float32).at[0, :out_dim].set(fc2_b)
    return p


def encoder_b_forward(params, x, zP_dim=3, zS_dim=5):
    """x: (B, 3, 32, 32) float32 NCHW (PyTorch layout)."""
    B = x.shape[0]
    # Single layout change at the boundary; everything downstream is NHWC.
    h = jnp.transpose(x, (0, 2, 3, 1)).astype(MATMUL_DTYPE)        # (B,32,32,3)

    # conv1: 3 -> 32 (output padded to 128 lanes), stride 2, pad 1, Swish fused
    pat, Ho, Wo = _im2col_nhwc(h, 4, 2, 1)                         # (B,16,16,48)
    y = matmul_swish(pat.reshape(B * Ho * Wo, -1), params["conv1_w"])
    h = y.reshape(B, Ho, Wo, LANE)[..., :32]

    # conv2: 32 -> 64 (padded to 128 lanes)
    pat, Ho, Wo = _im2col_nhwc(h, 4, 2, 1)                         # (B,8,8,512)
    y = matmul_swish(pat.reshape(B * Ho * Wo, -1), params["conv2_w"])
    h = y.reshape(B, Ho, Wo, LANE)[..., :64]

    # conv3 + fc1 + Swish + fc2: one fused kernel, activations VMEM-resident.
    pat, Ho, Wo = _im2col_nhwc(h, 4, 2, 1)                         # (B,4,4,1024)
    n_spatial = Ho * Wo                                            # 16
    pat = jnp.transpose(pat, (1, 2, 0, 3)).reshape(n_spatial * B, -1)  # (s,b) rows
    stats = conv3_fc_fused(pat, params["conv3_w"], params["fc1_w"],
                           params["fc1_b"], params["fc2_w"], params["fc2_b"],
                           batch=B, n_spatial=n_spatial)           # (B, 128) f32

    out_dim = 2 * zP_dim + 2 * zS_dim
    stats = stats[:, :out_dim]
    muPrivate = stats[:, :zP_dim]
    logvarPrivate = stats[:, zP_dim:2 * zP_dim]
    stdPrivate = jnp.exp(0.5 * logvarPrivate)
    muShared = stats[:, 2 * zP_dim:2 * zP_dim + zS_dim]
    logvarShared = stats[:, 2 * zP_dim + zS_dim:]
    stdShared = jnp.exp(0.5 * logvarShared)
    return (muPrivate, stdPrivate, logvarPrivate, muShared, stdShared, logvarShared)


if __name__ == "__main__":
    key = jax.random.PRNGKey(0)
    pkey, xkey = jax.random.split(key)
    params = init_params(pkey)
    # Architecture fixes spatial size to 32x32 (128*4*4 flatten); batch = 2.
    x = jax.random.normal(xkey, (2, 3, 32, 32), jnp.float32)

    fwd = jax.jit(encoder_b_forward)
    outs = fwd(params, x)
    outs = jax.block_until_ready(outs)

    expected_shapes = [(2, 3), (2, 3), (2, 3), (2, 5), (2, 5), (2, 5)]
    assert [tuple(o.shape) for o in outs] == expected_shapes
    assert all(bool(jnp.all(jnp.isfinite(o))) for o in outs)
    print("KERNEL_OK")
</pallas_src>

<mosaic_0001>
module attributes {stable_mosaic.version = 11 : i64} {
  func.func @_mm_swish_kernel(%arg0: i32, %arg1: memref<256x48xbf16, #tpu.memory_space<vmem>>, %arg2: memref<48x128xbf16, #tpu.memory_space<vmem>>, %arg3: memref<256x128xbf16, #tpu.memory_space<vmem>>) attributes {dimension_semantics = [#tpu.dimension_semantics<parallel>], iteration_bounds = array<i64: 2>, scalar_prefetch = 0 : i64, scratch_operands = 0 : i64, tpu.core_type = #tpu.core_type<tc>, window_params = [{transform_indices = @transform_0, window_bounds = array<i64: 256, 48>}, {pipeline_mode = #tpu.pipeline_mode<synchronous>, transform_indices = @transform_1, window_bounds = array<i64: 48, 128>}, {transform_indices = @transform_2, window_bounds = array<i64: 256, 128>}]} {
    %c0 = arith.constant 0 : index
    %c0_0 = arith.constant 0 : index
    %0 = vector.load %arg1[%c0, %c0_0] : memref<256x48xbf16, #tpu.memory_space<vmem>>, vector<256x48xbf16>
    %c0_1 = arith.constant 0 : index
    %c0_2 = arith.constant 0 : index
    %1 = vector.load %arg2[%c0_1, %c0_2] : memref<48x128xbf16, #tpu.memory_space<vmem>>, vector<48x128xbf16>
    %cst = arith.constant dense<0.000000e+00> : vector<256x128xf32>
    %2 = tpu.matmul %0, %1, %cst {dimension_numbers = #tpu.dot_dimension_numbers<[1], [0], [0], [1], [0, 0, 1, 1], [], []>} : vector<256x48xbf16>, vector<48x128xbf16>, vector<256x128xf32> -> vector<256x128xf32>
    %cst_3 = arith.constant 0.000000e+00 : f32
    %3 = vector.broadcast %cst_3 : f32 to vector<256x128xf32>
    %4 = arith.subf %3, %2 : vector<256x128xf32>
    %5 = math.exp %4 : vector<256x128xf32>
    %cst_4 = arith.constant 1.000000e+00 : f32
    %6 = vector.broadcast %cst_4 : f32 to vector<256x128xf32>
    %7 = arith.addf %6, %5 : vector<256x128xf32>
    %8 = tpu.reciprocal %7 {approx = true} : vector<256x128xf32> -> vector<256x128xf32>
    %9 = arith.mulf %2, %8 : vector<256x128xf32>
    %10 = arith.truncf %9 : vector<256x128xf32> to vector<256x128xbf16>
    %c0_5 = arith.constant 0 : index
    %c0_6 = arith.constant 0 : index
    %11 = vector.load %arg3[%c0_5, %c0_6] : memref<256x128xbf16, #tpu.memory_space<vmem>>, vector<256x128xbf16>
    tpu.vector_store %arg3[%c0_5, %c0_6], %10 {strides = array<i32>} : memref<256x128xbf16, #tpu.memory_space<vmem>>, vector<256x128xbf16>,
    return
  }
  func.func @transform_0(%arg0: i32) -> (i32, i32) {
    %c0_i32 = arith.constant 0 : i32
    %c0_i32_0 = arith.constant 0 : i32
    return %arg0, %c0_i32 : i32, i32
  }
  func.func @transform_1(%arg0: i32) -> (i32, i32) {
    %c0_i32 = arith.constant 0 : i32
    %c0_i32_0 = arith.constant 0 : i32
    %c0_i32_1 = arith.constant 0 : i32
    return %c0_i32, %c0_i32_0 : i32, i32
  }
  func.func @transform_2(%arg0: i32) -> (i32, i32) {
    %c0_i32 = arith.constant 0 : i32
    %c0_i32_0 = arith.constant 0 : i32
    return %arg0, %c0_i32 : i32, i32
  }
}

module attributes {stable_mosaic.version = 11 : i64} {
  func.func @_mm_swish_kernel(%arg0: i32, %arg1: memref<128x512xbf16, #tpu.memory_space<vmem>>, %arg2: memref<512x128xbf16, #tpu.memory_space<vmem>>, %arg3: memref<128x128xbf16, #tpu.memory_space<vmem>>) attributes {dimension_semantics = [#tpu.dimension_semantics<parallel>], iteration_bounds = array<i64: 1>, scalar_prefetch = 0 : i64, scratch_operands = 0 : i64, tpu.core_type = #tpu.core_type<tc>, window_params = [{transform_indices = @transform_0, window_bounds = array<i64: 128, 512>}, {pipeline_mode = #tpu.pipeline_mode<synchronous>, transform_indices = @transform_1, window_bounds = array<i64: 512, 128>}, {transform_indices = @transform_2, window_bounds = array<i64: 128, 128>}]} {
    %c0 = arith.constant 0 : index
    %c0_0 = arith.constant 0 : index
    %0 = vector.load %arg1[%c0, %c0_0] : memref<128x512xbf16, #tpu.memory_space<vmem>>, vector<128x512xbf16>
    %c0_1 = arith.constant 0 : index
    %c0_2 = arith.constant 0 : index
    %1 = vector.load %arg2[%c0_1, %c0_2] : memref<512x128xbf16, #tpu.memory_space<vmem>>, vector<512x128xbf16>
    %cst = arith.constant dense<0.000000e+00> : vector<128x128xf32>
    %2 = tpu.matmul %0, %1, %cst {dimension_numbers = #tpu.dot_dimension_numbers<[1], [0], [0], [1], [0, 0, 1, 1], [], []>} : vector<128x512xbf16>, vector<512x128xbf16>, vector<128x128xf32> -> vector<128x128xf32>
    %cst_3 = arith.constant 0.000000e+00 : f32
    %3 = vector.broadcast %cst_3 : f32 to vector<128x128xf32>
    %4 = arith.subf %3, %2 : vector<128x128xf32>
    %5 = math.exp %4 : vector<128x128xf32>
    %cst_4 = arith.constant 1.000000e+00 : f32
    %6 = vector.broadcast %cst_4 : f32 to vector<128x128xf32>
    %7 = arith.addf %6, %5 : vector<128x128xf32>
    %8 = tpu.reciprocal %7 {approx = true} : vector<128x128xf32> -> vector<128x128xf32>
    %9 = arith.mulf %2, %8 : vector<128x128xf32>
    %10 = arith.truncf %9 : vector<128x128xf32> to vector<128x128xbf16>
    %c0_5 = arith.constant 0 : index
    %c0_6 = arith.constant 0 : index
    %11 = vector.load %arg3[%c0_5, %c0_6] : memref<128x128xbf16, #tpu.memory_space<vmem>>, vector<128x128xbf16>
    tpu.vector_store %arg3[%c0_5, %c0_6], %10 {strides = array<i32>} : memref<128x128xbf16, #tpu.memory_space<vmem>>, vector<128x128xbf16>,
    return
  }
  func.func @transform_0(%arg0: i32) -> (i32, i32) {
    %c0_i32 = arith.constant 0 : i32
    %c0_i32_0 = arith.constant 0 : i32
    return %arg0, %c0_i32 : i32, i32
  }
  func.func @transform_1(%arg0: i32) -> (i32, i32) {
    %c0_i32 = arith.constant 0 : i32
    %c0_i32_0 = arith.constant 0 : i32
    %c0_i32_1 = arith.constant 0 : i32
    return %c0_i32, %c0_i32_0 : i32, i32
  }
  func.func @transform_2(%arg0: i32) -> (i32, i32) {
    %c0_i32 = arith.constant 0 : i32
    %c0_i32_0 = arith.constant 0 : i32
    return %arg0, %c0_i32 : i32, i32
  }
}

module attributes {stable_mosaic.version = 11 : i64} {
  func.func @_tail_kernel(%arg0: i32, %arg1: memref<32x1024xbf16, #tpu.memory_space<vmem>>, %arg2: memref<1024x128xbf16, #tpu.memory_space<vmem>>, %arg3: memref<16x128x512xbf16, #tpu.memory_space<vmem>>, %arg4: memref<1x512xf32, #tpu.memory_space<vmem>>, %arg5: memref<512x128xbf16, #tpu.memory_space<vmem>>, %arg6: memref<1x128xf32, #tpu.memory_space<vmem>>, %arg7: memref<2x128xf32, #tpu.memory_space<vmem>>) attributes {dimension_semantics = [#tpu.dimension_semantics<arbitrary>], iteration_bounds = array<i64: 1>, scalar_prefetch = 0 : i64, scratch_operands = 0 : i64, tpu.core_type = #tpu.core_type<tc>, window_params = [{pipeline_mode = #tpu.pipeline_mode<synchronous>, transform_indices = @transform_0, window_bounds = array<i64: 32, 1024>}, {pipeline_mode = #tpu.pipeline_mode<synchronous>, transform_indices = @transform_1, window_bounds = array<i64: 1024, 128>}, {pipeline_mode = #tpu.pipeline_mode<synchronous>, transform_indices = @transform_2, window_bounds = array<i64: 16, 128, 512>}, {pipeline_mode = #tpu.pipeline_mode<synchronous>, transform_indices = @transform_3, window_bounds = array<i64: 1, 512>}, {pipeline_mode = #tpu.pipeline_mode<synchronous>, transform_indices = @transform_4, window_bounds = array<i64: 512, 128>}, {pipeline_mode = #tpu.pipeline_mode<synchronous>, transform_indices = @transform_5, window_bounds = array<i64: 1, 128>}, {pipeline_mode = #tpu.pipeline_mode<synchronous>, transform_indices = @transform_6, window_bounds = array<i64: 2, 128>}]} {
    %c0 = arith.constant 0 : index
    %c0_0 = arith.constant 0 : index
    %0 = vector.load %arg1[%c0, %c0_0] : memref<32x1024xbf16, #tpu.memory_space<vmem>>, vector<32x1024xbf16>
    %c0_1 = arith.constant 0 : index
    %c0_2 = arith.constant 0 : index
    %1 = vector.load %arg2[%c0_1, %c0_2] : memref<1024x128xbf16, #tpu.memory_space<vmem>>, vector<1024x128xbf16>
    %cst = arith.constant dense<0.000000e+00> : vector<32x128xf32>
    %2 = tpu.matmul %0, %1, %cst {dimension_numbers = #tpu.dot_dimension_numbers<[1], [0], [0], [1], [0, 0, 1, 1], [], []>} : vector<32x1024xbf16>, vector<1024x128xbf16>, vector<32x128xf32> -> vector<32x128xf32>
    %cst_3 = arith.constant 0.000000e+00 : f32
    %3 = vector.broadcast %cst_3 : f32 to vector<32x128xf32>
    %4 = arith.subf %3, %2 : vector<32x128xf32>
    %5 = math.exp %4 : vector<32x128xf32>
    %cst_4 = arith.constant 1.000000e+00 : f32
    %6 = vector.broadcast %cst_4 : f32 to vector<32x128xf32>
    %7 = arith.addf %6, %5 : vector<32x128xf32>
    %8 = tpu.reciprocal %7 {approx = true} : vector<32x128xf32> -> vector<32x128xf32>
    %9 = arith.mulf %2, %8 : vector<32x128xf32>
    %10 = arith.truncf %9 : vector<32x128xf32> to vector<32x128xbf16>
    %cst_5 = arith.constant 0.000000e+00 : f32
    %11 = vector.broadcast %cst_5 : f32 to vector<2x512xf32>
    %12 = vector.extract_strided_slice %10 {offsets = [0, 0], sizes = [2, 128], strides = [1, 1]} : vector<32x128xbf16> to vector<2x128xbf16>
    %c0_6 = arith.constant 0 : index
    %c0_7 = arith.constant 0 : index
    %c0_8 = arith.constant 0 : index
    %13 = vector.load %arg3[%c0_6, %c0_7, %c0_8] : memref<16x128x512xbf16, #tpu.memory_space<vmem>>, vector<1x128x512xbf16>
    %14 = vector.shape_cast %13 : vector<1x128x512xbf16> to vector<128x512xbf16>
    %cst_9 = arith.constant dense<0.000000e+00> : vector<2x512xf32>
    %15 = tpu.matmul %12, %14, %cst_9 {dimension_numbers = #tpu.dot_dimension_numbers<[1], [0], [0], [1], [0, 0, 1, 1], [], []>} : vector<2x128xbf16>, vector<128x512xbf16>, vector<2x512xf32> -> vector<2x512xf32>
    %16 = arith.addf %11, %15 : vector<2x512xf32>
    %17 = vector.extract_strided_slice %10 {offsets = [2, 0], sizes = [2, 128], strides = [1, 1]} : vector<32x128xbf16> to vector<2x128xbf16>
    %c1 = arith.constant 1 : index
    %c0_10 = arith.constant 0 : index
    %c0_11 = arith.constant 0 : index
    %18 = vector.load %arg3[%c1, %c0_10, %c0_11] : memref<16x128x512xbf16, #tpu.memory_space<vmem>>, vector<1x128x512xbf16>
    %19 = vector.shape_cast %18 : vector<1x128x512xbf16> to vector<128x512xbf16>
    %cst_12 = arith.constant dense<0.000000e+00> : vector<2x512xf32>
    %20 = tpu.matmul %17, %19, %cst_12 {dimension_numbers = #tpu.dot_dimension_numbers<[1], [0], [0], [1], [0, 0, 1, 1], [], []>} : vector<2x128xbf16>, vector<128x512xbf16>, vector<2x512xf32> -> vector<2x512xf32>
    %21 = arith.addf %16, %20 : vector<2x512xf32>
    %22 = vector.extract_strided_slice %10 {offsets = [4, 0], sizes = [2, 128], strides = [1, 1]} : vector<32x128xbf16> to vector<2x128xbf16>
    %c2 = arith.constant 2 : index
    %c0_13 = arith.constant 0 : index
    %c0_14 = arith.constant 0 : index
    %23 = vector.load %arg3[%c2, %c0_13, %c0_14] : memref<16x128x512xbf16, #tpu.memory_space<vmem>>, vector<1x128x512xbf16>
    %24 = vector.shape_cast %23 : vector<1x128x512xbf16> to vector<128x512xbf16>
    %cst_15 = arith.constant dense<0.000000e+00> : vector<2x512xf32>
    %25 = tpu.matmul %22, %24, %cst_15 {dimension_numbers = #tpu.dot_dimension_numbers<[1], [0], [0], [1], [0, 0, 1, 1], [], []>} : vector<2x128xbf16>, vector<128x512xbf16>, vector<2x512xf32> -> vector<2x512xf32>
    %26 = arith.addf %21, %25 : vector<2x512xf32>
    %27 = vector.extract_strided_slice %10 {offsets = [6, 0], sizes = [2, 128], strides = [1, 1]} : vector<32x128xbf16> to vector<2x128xbf16>
    %c3 = arith.constant 3 : index
    %c0_16 = arith.constant 0 : index
    %c0_17 = arith.constant 0 : index
    %28 = vector.load %arg3[%c3, %c0_16, %c0_17] : memref<16x128x512xbf16, #tpu.memory_space<vmem>>, vector<1x128x512xbf16>
    %29 = vector.shape_cast %28 : vector<1x128x512xbf16> to vector<128x512xbf16>
    %cst_18 = arith.constant dense<0.000000e+00> : vector<2x512xf32>
    %30 = tpu.matmul %27, %29, %cst_18 {dimension_numbers = #tpu.dot_dimension_numbers<[1], [0], [0], [1], [0, 0, 1, 1], [], []>} : vector<2x128xbf16>, vector<128x512xbf16>, vector<2x512xf32> -> vector<2x512xf32>
    %31 = arith.addf %26, %30 : vector<2x512xf32>
    %32 = vector.extract_strided_slice %10 {offsets = [8, 0], sizes = [2, 128], strides = [1, 1]} : vector<32x128xbf16> to vector<2x128xbf16>
    %c4 = arith.constant 4 : index
    %c0_19 = arith.constant 0 : index
    %c0_20 = arith.constant 0 : index
    %33 = vector.load %arg3[%c4, %c0_19, %c0_20] : memref<16x128x512xbf16, #tpu.memory_space<vmem>>, vector<1x128x512xbf16>
    %34 = vector.shape_cast %33 : vector<1x128x512xbf16> to vector<128x512xbf16>
    %cst_21 = arith.constant dense<0.000000e+00> : vector<2x512xf32>
    %35 = tpu.matmul %32, %34, %cst_21 {dimension_numbers = #tpu.dot_dimension_numbers<[1], [0], [0], [1], [0, 0, 1, 1], [], []>} : vector<2x128xbf16>, vector<128x512xbf16>, vector<2x512xf32> -> vector<2x512xf32>
    %36 = arith.addf %31, %35 : vector<2x512xf32>
    %37 = vector.extract_strided_slice %10 {offsets = [10, 0], sizes = [2, 128], strides = [1, 1]} : vector<32x128xbf16> to vector<2x128xbf16>
    %c5 = arith.constant 5 : index
    %c0_22 = arith.constant 0 : index
    %c0_23 = arith.constant 0 : index
    %38 = vector.load %arg3[%c5, %c0_22, %c0_23] : memref<16x128x512xbf16, #tpu.memory_space<vmem>>, vector<1x128x512xbf16>
    %39 = vector.shape_cast %38 : vector<1x128x512xbf16> to vector<128x512xbf16>
    %cst_24 = arith.constant dense<0.000000e+00> : vector<2x512xf32>
    %40 = tpu.matmul %37, %39, %cst_24 {dimension_numbers = #tpu.dot_dimension_numbers<[1], [0], [0], [1], [0, 0, 1, 1], [], []>} : vector<2x128xbf16>, vector<128x512xbf16>, vector<2x512xf32> -> vector<2x512xf32>
    %41 = arith.addf %36, %40 : vector<2x512xf32>
    %42 = vector.extract_strided_slice %10 {offsets = [12, 0], sizes = [2, 128], strides = [1, 1]} : vector<32x128xbf16> to vector<2x128xbf16>
    %c6 = arith.constant 6 : index
    %c0_25 = arith.constant 0 : index
    %c0_26 = arith.constant 0 : index
    %43 = vector.load %arg3[%c6, %c0_25, %c0_26] : memref<16x128x512xbf16, #tpu.memory_space<vmem>>, vector<1x128x512xbf16>
    %44 = vector.shape_cast %43 : vector<1x128x512xbf16> to vector<128x512xbf16>
    %cst_27 = arith.constant dense<0.000000e+00> : vector<2x512xf32>
    %45 = tpu.matmul %42, %44, %cst_27 {dimension_numbers = #tpu.dot_dimension_numbers<[1], [0], [0], [1], [0, 0, 1, 1], [], []>} : vector<2x128xbf16>, vector<128x512xbf16>, vector<2x512xf32> -> vector<2x512xf32>
    %46 = arith.addf %41, %45 : vector<2x512xf32>
    %47 = vector.extract_strided_slice %10 {offsets = [14, 0], sizes = [2, 128], strides = [1, 1]} : vector<32x128xbf16> to vector<2x128xbf16>
    %c7 = arith.constant 7 : index
    %c0_28 = arith.constant 0 : index
    %c0_29 = arith.constant 0 : index
    %48 = vector.load %arg3[%c7, %c0_28, %c0_29] : memref<16x128x512xbf16, #tpu.memory_space<vmem>>, vector<1x128x512xbf16>
    %49 = vector.shape_cast %48 : vector<1x128x512xbf16> to vector<128x512xbf16>
    %cst_30 = arith.constant dense<0.000000e+00> : vector<2x512xf32>
    %50 = tpu.matmul %47, %49, %cst_30 {dimension_numbers = #tpu.dot_dimension_numbers<[1], [0], [0], [1], [0, 0, 1, 1], [], []>} : vector<2x128xbf16>, vector<128x512xbf16>, vector<2x512xf32> -> vector<2x512xf32>
    %51 = arith.addf %46, %50 : vector<2x512xf32>
    %52 = vector.extract_strided_slice %10 {offsets = [16, 0], sizes = [2, 128], strides = [1, 1]} : vector<32x128xbf16> to vector<2x128xbf16>
    %c8 = arith.constant 8 : index
    %c0_31 = arith.constant 0 : index
    %c0_32 = arith.constant 0 : index
    %53 = vector.load %arg3[%c8, %c0_31, %c0_32] : memref<16x128x512xbf16, #tpu.memory_space<vmem>>, vector<1x128x512xbf16>
    %54 = vector.shape_cast %53 : vector<1x128x512xbf16> to vector<128x512xbf16>
    %cst_33 = arith.constant dense<0.000000e+00> : vector<2x512xf32>
    %55 = tpu.matmul %52, %54, %cst_33 {dimension_numbers = #tpu.dot_dimension_numbers<[1], [0], [0], [1], [0, 0, 1, 1], [], []>} : vector<2x128xbf16>, vector<128x512xbf16>, vector<2x512xf32> -> vector<2x512xf32>
    %56 = arith.addf %51, %55 : vector<2x512xf32>
    %57 = vector.extract_strided_slice %10 {offsets = [18, 0], sizes = [2, 128], strides = [1, 1]} : vector<32x128xbf16> to vector<2x128xbf16>
    %c9 = arith.constant 9 : index
    %c0_34 = arith.constant 0 : index
    %c0_35 = arith.constant 0 : index
    %58 = vector.load %arg3[%c9, %c0_34, %c0_35] : memref<16x128x512xbf16, #tpu.memory_space<vmem>>, vector<1x128x512xbf16>
    %59 = vector.shape_cast %58 : vector<1x128x512xbf16> to vector<128x512xbf16>
    %cst_36 = arith.constant dense<0.000000e+00> : vector<2x512xf32>
    %60 = tpu.matmul %57, %59, %cst_36 {dimension_numbers = #tpu.dot_dimension_numbers<[1], [0], [0], [1], [0, 0, 1, 1], [], []>} : vector<2x128xbf16>, vector<128x512xbf16>, vector<2x512xf32> -> vector<2x512xf32>
    %61 = arith.addf %56, %60 : vector<2x512xf32>
    %62 = vector.extract_strided_slice %10 {offsets = [20, 0], sizes = [2, 128], strides = [1, 1]} : vector<32x128xbf16> to vector<2x128xbf16>
    %c10 = arith.constant 10 : index
    %c0_37 = arith.constant 0 : index
    %c0_38 = arith.constant 0 : index
    %63 = vector.load %arg3[%c10, %c0_37, %c0_38] : memref<16x128x512xbf16, #tpu.memory_space<vmem>>, vector<1x128x512xbf16>
    %64 = vector.shape_cast %63 : vector<1x128x512xbf16> to vector<128x512xbf16>
    %cst_39 = arith.constant dense<0.000000e+00> : vector<2x512xf32>
    %65 = tpu.matmul %62, %64, %cst_39 {dimension_numbers = #tpu.dot_dimension_numbers<[1], [0], [0], [1], [0, 0, 1, 1], [], []>} : vector<2x128xbf16>, vector<128x512xbf16>, vector<2x512xf32> -> vector<2x512xf32>
    %66 = arith.addf %61, %65 : vector<2x512xf32>
    %67 = vector.extract_strided_slice %10 {offsets = [22, 0], sizes = [2, 128], strides = [1, 1]} : vector<32x128xbf16> to vector<2x128xbf16>
    %c11 = arith.constant 11 : index
    %c0_40 = arith.constant 0 : index
    %c0_41 = arith.constant 0 : index
    %68 = vector.load %arg3[%c11, %c0_40, %c0_41] : memref<16x128x512xbf16, #tpu.memory_space<vmem>>, vector<1x128x512xbf16>
    %69 = vector.shape_cast %68 : vector<1x128x512xbf16> to vector<128x512xbf16>
    %cst_42 = arith.constant dense<0.000000e+00> : vector<2x512xf32>
    %70 = tpu.matmul %67, %69, %cst_42 {dimension_numbers = #tpu.dot_dimension_numbers<[1], [0], [0], [1], [0, 0, 1, 1], [], []>} : vector<2x128xbf16>, vector<128x512xbf16>, vector<2x512xf32> -> vector<2x512xf32>
    %71 = arith.addf %66, %70 : vector<2x512xf32>
    %72 = vector.extract_strided_slice %10 {offsets = [24, 0], sizes = [2, 128], strides = [1, 1]} : vector<32x128xbf16> to vector<2x128xbf16>
    %c12 = arith.constant 12 : index
    %c0_43 = arith.constant 0 : index
    %c0_44 = arith.constant 0 : index
    %73 = vector.load %arg3[%c12, %c0_43, %c0_44] : memref<16x128x512xbf16, #tpu.memory_space<vmem>>, vector<1x128x512xbf16>
    %74 = vector.shape_cast %73 : vector<1x128x512xbf16> to vector<128x512xbf16>
    %cst_45 = arith.constant dense<0.000000e+00> : vector<2x512xf32>
    %75 = tpu.matmul %72, %74, %cst_45 {dimension_numbers = #tpu.dot_dimension_numbers<[1], [0], [0], [1], [0, 0, 1, 1], [], []>} : vector<2x128xbf16>, vector<128x512xbf16>, vector<2x512xf32> -> vector<2x512xf32>
    %76 = arith.addf %71, %75 : vector<2x512xf32>
    %77 = vector.extract_strided_slice %10 {offsets = [26, 0], sizes = [2, 128], strides = [1, 1]} : vector<32x128xbf16> to vector<2x128xbf16>
    %c13 = arith.constant 13 : index
    %c0_46 = arith.constant 0 : index
    %c0_47 = arith.constant 0 : index
    %78 = vector.load %arg3[%c13, %c0_46, %c0_47] : memref<16x128x512xbf16, #tpu.memory_space<vmem>>, vector<1x128x512xbf16>
    %79 = vector.shape_cast %78 : vector<1x128x512xbf16> to vector<128x512xbf16>
    %cst_48 = arith.constant dense<0.000000e+00> : vector<2x512xf32>
    %80 = tpu.matmul %77, %79, %cst_48 {dimension_numbers = #tpu.dot_dimension_numbers<[1], [0], [0], [1], [0, 0, 1, 1], [], []>} : vector<2x128xbf16>, vector<128x512xbf16>, vector<2x512xf32> -> vector<2x512xf32>
    %81 = arith.addf %76, %80 : vector<2x512xf32>
    %82 = vector.extract_strided_slice %10 {offsets = [28, 0], sizes = [2, 128], strides = [1, 1]} : vector<32x128xbf16> to vector<2x128xbf16>
    %c14 = arith.constant 14 : index
    %c0_49 = arith.constant 0 : index
    %c0_50 = arith.constant 0 : index
    %83 = vector.load %arg3[%c14, %c0_49, %c0_50] : memref<16x128x512xbf16, #tpu.memory_space<vmem>>, vector<1x128x512xbf16>
    %84 = vector.shape_cast %83 : vector<1x128x512xbf16> to vector<128x512xbf16>
    %cst_51 = arith.constant dense<0.000000e+00> : vector<2x512xf32>
    %85 = tpu.matmul %82, %84, %cst_51 {dimension_numbers = #tpu.dot_dimension_numbers<[1], [0], [0], [1], [0, 0, 1, 1], [], []>} : vector<2x128xbf16>, vector<128x512xbf16>, vector<2x512xf32> -> vector<2x512xf32>
    %86 = arith.addf %81, %85 : vector<2x512xf32>
    %87 = vector.extract_strided_slice %10 {offsets = [30, 0], sizes = [2, 128], strides = [1, 1]} : vector<32x128xbf16> to vector<2x128xbf16>
    %c15 = arith.constant 15 : index
    %c0_52 = arith.constant 0 : index
    %c0_53 = arith.constant 0 : index
    %88 = vector.load %arg3[%c15, %c0_52, %c0_53] : memref<16x128x512xbf16, #tpu.memory_space<vmem>>, vector<1x128x512xbf16>
    %89 = vector.shape_cast %88 : vector<1x128x512xbf16> to vector<128x512xbf16>
    %cst_54 = arith.constant dense<0.000000e+00> : vector<2x512xf32>
    %90 = tpu.matmul %87, %89, %cst_54 {dimension_numbers = #tpu.dot_dimension_numbers<[1], [0], [0], [1], [0, 0, 1, 1], [], []>} : vector<2x128xbf16>, vector<128x512xbf16>, vector<2x512xf32> -> vector<2x512xf32>
    %91 = arith.addf %86, %90 : vector<2x512xf32>
    %c0_55 = arith.constant 0 : index
    %c0_56 = arith.constant 0 : index
    %92 = vector.load %arg4[%c0_55, %c0_56] : memref<1x512xf32, #tpu.memory_space<vmem>>, vector<1x512xf32>
    %93 = vector.broadcast %92 : vector<1x512xf32> to vector<2x512xf32>
    %94 = arith.addf %91, %93 : vector<2x512xf32>
    %cst_57 = arith.constant 0.000000e+00 : f32
    %95 = vector.broadcast %cst_57 : f32 to vector<2x512xf32>
    %96 = arith.subf %95, %94 : vector<2x512xf32>
    %97 = math.exp %96 : vector<2x512xf32>
    %cst_58 = arith.constant 1.000000e+00 : f32
    %98 = vector.broadcast %cst_58 : f32 to vector<2x512xf32>
    %99 = arith.addf %98, %97 : vector<2x512xf32>
    %100 = tpu.reciprocal %99 {approx = true} : vector<2x512xf32> -> vector<2x512xf32>
    %101 = arith.mulf %94, %100 : vector<2x512xf32>
    %102 = arith.truncf %101 : vector<2x512xf32> to vector<2x512xbf16>
    %c0_59 = arith.constant 0 : index
    %c0_60 = arith.constant 0 : index
    %103 = vector.load %arg5[%c0_59, %c0_60] : memref<512x128xbf16, #tpu.memory_space<vmem>>, vector<512x128xbf16>
    %cst_61 = arith.constant dense<0.000000e+00> : vector<2x128xf32>
    %104 = tpu.matmul %102, %103, %cst_61 {dimension_numbers = #tpu.dot_dimension_numbers<[1], [0], [0], [1], [0, 0, 1, 1], [], []>} : vector<2x512xbf16>, vector<512x128xbf16>, vector<2x128xf32> -> vector<2x128xf32>
    %c0_62 = arith.constant 0 : index
    %c0_63 = arith.constant 0 : index
    %105 = vector.load %arg6[%c0_62, %c0_63] : memref<1x128xf32, #tpu.memory_space<vmem>>, vector<1x128xf32>
    %106 = vector.broadcast %105 : vector<1x128xf32> to vector<2x128xf32>
    %107 = arith.addf %104, %106 : vector<2x128xf32>
    %c0_64 = arith.constant 0 : index
    %c0_65 = arith.constant 0 : index
    %108 = vector.load %arg7[%c0_64, %c0_65] : memref<2x128xf32, #tpu.memory_space<vmem>>, vector<2x128xf32>
    tpu.vector_store %arg7[%c0_64, %c0_65], %107 {strides = array<i32>} : memref<2x128xf32, #tpu.memory_space<vmem>>, vector<2x128xf32>,
    return
  }
  func.func @transform_0(%arg0: i32) -> (i32, i32) {
    %c0_i32 = arith.constant 0 : i32
    %c0_i32_0 = arith.constant 0 : i32
    %c0_i32_1 = arith.constant 0 : i32
    return %c0_i32, %c0_i32_0 : i32, i32
  }
  func.func @transform_1(%arg0: i32) -> (i32, i32) {
    %c0_i32 = arith.constant 0 : i32
    %c0_i32_0 = arith.constant 0 : i32
    %c0_i32_1 = arith.constant 0 : i32
    return %c0_i32, %c0_i32_0 : i32, i32
  }
  func.func @transform_2(%arg0: i32) -> (i32, i32, i32) {
    %c0_i32 = arith.constant 0 : i32
    %c0_i32_0 = arith.constant 0 : i32
    %c0_i32_1 = arith.constant 0 : i32
    %c0_i32_2 = arith.constant 0 : i32
    return %c0_i32, %c0_i32_0, %c0_i32_1 : i32, i32, i32
  }
  func.func @transform_3(%arg0: i32) -> (i32, i32) {
    %c0_i32 = arith.constant 0 : i32
    %c0_i32_0 = arith.constant 0 : i32
    %c0_i32_1 = arith.constant 0 : i32
    return %c0_i32, %c0_i32_0 : i32, i32
  }
  func.func @transform_4(%arg0: i32) -> (i32, i32) {
    %c0_i32 = arith.constant 0 : i32
    %c0_i32_0 = arith.constant 0 : i32
    %c0_i32_1 = arith.constant 0 : i32
    return %c0_i32, %c0_i32_0 : i32, i32
  }
  func.func @transform_5(%arg0: i32) -> (i32, i32) {
    %c0_i32 = arith.constant 0 : i32
    %c0_i32_0 = arith.constant 0 : i32
    %c0_i32_1 = arith.constant 0 : i32
    return %c0_i32, %c0_i32_0 : i32, i32
  }
  func.func @transform_6(%arg0: i32) -> (i32, i32) {
    %c0_i32 = arith.constant 0 : i32
    %c0_i32_0 = arith.constant 0 : i32
    %c0_i32_1 = arith.constant 0 : i32
    return %c0_i32, %c0_i32_0 : i32, i32
  }
}

</mosaic_0001>

<bundles_post_ra>
// kernel: encoder_b_forward.3
= control target key start
LH: loop header
LB: loop body
LE: loop exit
PB: predicated region body
PF: predicated region fallthrough
CT: control target
= control target key end

     0   :  { %s1348_s9 = smov 0   ;;  %s1570_s0 = inlined_call_operand.vmem [shape: bf16[512,48], index: 0, kind: input, shape index: {}]   ;;  %s1571_s1 = inlined_call_operand.vmem [shape: bf16[48,128], index: 1, kind: input, shape index: {}]   ;;  %s1572_s2 = inlined_call_operand.vmem [shape: bf16[512,128], index: 2, kind: output, shape index: {}]  }
   0x1 LB: > { %s902_s10 = sadd.s32 4294967295, %s1331_s9   ;;  %p906_p0 = scmp.ge.s32.totalorder %s1331_s9, 1  ;;  %s1331_s9 = sphi %s1348_s9, %s12_s9  }
   0x2   : > { %p113_p1 = scmp.lt.s32.totalorder %s1331_s9, 3 }
   0x4   : > { %p114_p2 = pnand %p906_p0, %p113_p1 }
   0x5   : > { %v1178_v0 = vld [vmem:[%s1571_s1] sm:$0xff] (!%p114_p2)   ;;  %s907_s13 = sshll.u32 (!%p114_p2), %s902_s10, 5  ;;  %v1179_v1 = vld [vmem:[%s1571_s1 + $0x8] sm:$0xff] (!%p114_p2)   ;;  %v1180_v2 = vld [vmem:[%s1571_s1 + $0x10] sm:$0xff] (!%p114_p2)   ;;  %vm284_vm0 = vcmask (!%p114_p2), 392192  }
   0x6   : > { %117 = sbr.rel (%p114_p2) target bundleno = 320 (0x140), region = 28  ;;  %p136_p3 = scmp.lt.s32.totalorder (!%p114_p2), %s907_s13, 63  ;;  %1126 = vmatprep.subr.bf16.mxu0 (!%p114_p2), %v1178_v0  ;;  %1164 = vmatprep.subr.bf16.mxu1 (!%p114_p2), %v1178_v0 }
   0x7   : > { %1127 = vmatpush3.bf16.msra.mxu0 (!%p114_p2), %v1178_v0  ;;  %1167 = vmatpush3.bf16.msra.mxu1 (!%p114_p2), %v1178_v0 }
   0x8   : > { %1128 = vmatprep.subr.bf16.mxu0 (!%p114_p2), %v1179_v1  ;;  %1165 = vmatprep.subr.bf16.mxu1 (!%p114_p2), %v1179_v1 }
   0xb   : > { %1129 = vmatpush3.bf16.msra.mxu0 (!%p114_p2), %v1179_v1  ;;  %1168 = vmatpush3.bf16.msra.mxu1 (!%p114_p2), %v1179_v1 }
   0xc   : > { %1130 = vmatprep.subr.bf16.mxu0 (!%p114_p2), %v1180_v2  ;;  %1166 = vmatprep.subr.bf16.mxu1 (!%p114_p2), %v1180_v2 }
   0xd   : > { %s1574_s13 = smov (!%p136_p3, %s907_s13), 63 }
   0xe   : > { %s908_s18 = sshll.u32 %s1574_s13, 2 }
   0xf   : > { %s1373_s21 = scalar_lea.vmem %s1570_s0, %s908_s18  ;;  %1131 = vmatpush3.bf16.msra.mxu0 %v1180_v2  ;;  %1169 = vmatpush3.bf16.msra.mxu1 %v1180_v2  ;;  %s1504_s24 = scalar_lea.vmem %s1572_s2, %s908_s18 }
  0x10   : > { %v1181_v3 = vld [vmem:[%s1373_s21] sm:$0xff]   ;;  %v1183_v5 = vld [vmem:[%s1373_s21 + $0x8] sm:$0xff]   ;;  %v1185_v7 = vld [vmem:[%s1373_s21 + $0x10] sm:$0xff]  }
  0x11   : > { %v1182_v4 = vld [vmem:[%s1373_s21 + $0x40] sm:$0xff]   ;;  %1132 = vmatprep.mubr.msk.bf16.mxu0 %vm284_vm0, %v1181_v3  ;;  %v1184_v6 = vld [vmem:[%s1373_s21 + $0x48] sm:$0xff]   ;;  %v1186_v8 = vld [vmem:[%s1373_s21 + $0x50] sm:$0xff]  }
  0x12   : > { %1148 = vmatprep.mubr.msk.bf16.mxu1 %vm284_vm0, %v1182_v4  ;;  %1133 = vmatmul.mubr.msk.bf16.vlgmr.msra.gmra.mrb[0].mxu0 %vm284_vm0, %v1183_v5  ;;  %v1187_v9 = vld [vmem:[%s1373_s21 + $0x18] sm:$0xff]   ;;  %v1189_v11 = vld [vmem:[%s1373_s21 + $0x20] sm:$0xff]   ;;  %v1191_v13 = vld [vmem:[%s1373_s21 + $0x28] sm:$0xff]  }
  0x13   : > { %1149 = vmatmul.mubr.msk.bf16.vlgmr.msra.gmra.mrb[0].mxu1 %vm284_vm0, %v1184_v6  ;;  %1136 = vmatprep.mubr.msk.bf16.mxu0 %vm284_vm0, %v1185_v7  ;;  %v1188_v10 = vld [vmem:[%s1373_s21 + $0x58] sm:$0xff]   ;;  %v1190_v12 = vld [vmem:[%s1373_s21 + $0x60] sm:$0xff]   ;;  %v1192_v14 = vld [vmem:[%s1373_s21 + $0x68] sm:$0xff]  }
  0x14   : > { %1152 = vmatprep.mubr.msk.bf16.mxu1 %vm284_vm0, %v1186_v8  ;;  %v1193_v15 = vld [vmem:[%s1373_s21 + $0x30] sm:$0xff]   ;;  %v1195_v17 = vld [vmem:[%s1373_s21 + $0x38] sm:$0xff]  }
  0x15   : > { %v1194_v16 = vld [vmem:[%s1373_s21 + $0x70] sm:$0xff]   ;;  %v1196_v18 = vld [vmem:[%s1373_s21 + $0x78] sm:$0xff]  }
  0x1a   : > { %1137 = vmatmul.mubr.msk.bf16.gmra.mrb[4].mxu0 %vm284_vm0, %v1187_v9 }
  0x1b   : > { %1153 = vmatmul.mubr.msk.bf16.gmra.mrb[4].mxu1 %vm284_vm0, %v1188_v10  ;;  %1140 = vmatprep.mubr.msk.bf16.mxu0 %vm284_vm0, %v1189_v11 }
  0x1c   : > { %1156 = vmatprep.mubr.msk.bf16.mxu1 %vm284_vm0, %v1190_v12 }
  0x22   : > { %1141 = vmatmul.mubr.msk.bf16.gmra.mrb[8].mxu0 %vm284_vm0, %v1191_v13 }
  0x23   : > { %1157 = vmatmul.mubr.msk.bf16.gmra.mrb[8].mxu1 %vm284_vm0, %v1192_v14  ;;  %1144 = vmatprep.mubr.msk.bf16.mxu0 %vm284_vm0, %v1193_v15 }
  0x24   : > { %1160 = vmatprep.mubr.msk.bf16.mxu1 %vm284_vm0, %v1194_v16 }
  0x2a   : > { %1145 = vmatmul.mubr.msk.bf16.gmra.mrb[12].mxu0 %vm284_vm0, %v1195_v17 }
  0x2b   : > { %1161 = vmatmul.mubr.msk.bf16.gmra.mrb[12].mxu1 %vm284_vm0, %v1196_v18 }
  0xe5   : > { %v1407_v19 = vpop.f32.mrb[0].mxu0 }
  0xe6   : > { %v1409_v20 = vpop.f32.mrb[0].mxu1  ;;  %v496_v21 = vsub.f32 0.0, %v1407_v19  ;;  %v1413_v23 = vpop.f32.mrb[1].mxu0 }
  0xe7   : > { %v512_v22 = vsub.f32 0.0, %v1409_v20  ;;  %v1415_v24 = vpop.f32.mrb[1].mxu1  ;;  %v494_v25 = vsub.f32 0.0, %v1413_v23  ;;  %v1419_v27 = vpop.f32.mrb[2].mxu0 }
  0xe8   : > { %v510_v26 = vsub.f32 0.0, %v1415_v24  ;;  %v1421_v28 = vpop.f32.mrb[2].mxu1  ;;  %v530_v29 = vmul.f32 1.442695, %v496_v21  ;;  %v497_v31 = vsub.f32 0.0, %v1419_v27  ;;  %v1425_v35 = vpop.f32.mrb[3].mxu0 }
  0xe9   : > { %v562_v30 = vmul.f32 1.442695, %v512_v22  ;;  %v513_v32 = vsub.f32 0.0, %v1421_v28  ;;  %v526_v33 = vmul.f32 1.442695, %v494_v25  ;;  %v1427_v36 = vpop.f32.mrb[3].mxu1 }
  0xea   : > { %v558_v34 = vmul.f32 1.442695, %v510_v26  ;;  %1197 = vpow2.f32 %v530_v29  ;;  %v532_v37 = vmul.f32 1.442695, %v497_v31  ;;  %v495_v38 = vsub.f32 0.0, %v1425_v35 }
  0xeb   : > { %1199 = vpow2.f32 %v562_v30  ;;  %v564_v39 = vmul.f32 1.442695, %v513_v32  ;;  %v511_v40 = vsub.f32 0.0, %v1427_v36 }
  0xec   : > { %1201 = vpow2.f32 %v526_v33  ;;  %v528_v41 = vmul.f32 1.442695, %v495_v38 }
  0xed   : > { %1203 = vpow2.f32 %v558_v34  ;;  %v560_v42 = vmul.f32 1.442695, %v511_v40  ;;  %v1431_v43 = vpop.f32.mrb[4].mxu0 }
  0xee   : > { %v1433_v44 = vpop.f32.mrb[4].mxu1  ;;  %1205 = vpow2.f32 %v532_v37  ;;  %v500_v45 = vsub.f32 0.0, %v1431_v43  ;;  %v1437_v47 = vpop.f32.mrb[5].mxu0 }
  0xef   : > { %v516_v46 = vsub.f32 0.0, %v1433_v44  ;;  %v1439_v48 = vpop.f32.mrb[5].mxu1  ;;  %1207 = vpow2.f32 %v564_v39  ;;  %v498_v49 = vsub.f32 0.0, %v1437_v47  ;;  %v1443_v51 = vpop.f32.mrb[6].mxu0 }
  0xf0   : > { %v514_v50 = vsub.f32 0.0, %v1439_v48  ;;  %v1445_v52 = vpop.f32.mrb[6].mxu1  ;;  %1209 = vpow2.f32 %v528_v41  ;;  %v538_v53 = vmul.f32 1.442695, %v500_v45  ;;  %v501_v55 = vsub.f32 0.0, %v1443_v51  ;;  %v1448_v56 = vpop.f32.mrb[7].mxu0 }
  0xf1   : > { %v570_v54 = vmul.f32 1.442695, %v516_v46  ;;  %1211 = vpow2.f32 %v560_v42  ;;  %v534_v57 = vmul.f32 1.442695, %v498_v49  ;;  %v1450_v59 = vpop.f32.mrb[7].mxu1  ;;  %v517_v15 = vsub.f32 0.0, %v1445_v52 }
  0xf2   : > { %v566_v58 = vmul.f32 1.442695, %v514_v50  ;;  %1213 = vpow2.f32 %v538_v53  ;;  %v540_v60 = vmul.f32 1.442695, %v501_v55  ;;  %v499_v21 = vsub.f32 0.0, %v1448_v56 }
  0xf3   : > { %1215 = vpow2.f32 %v570_v54  ;;  %v572_v32 = vmul.f32 1.442695, %v517_v15  ;;  %v515_v33 = vsub.f32 0.0, %v1450_v59 }
  0xf4   : > { %v1198_v61 = vpop.eup %1197  ;;  %1217 = vpow2.f32 %v534_v57  ;;  %v536_v39 = vmul.f32 1.442695, %v499_v21 }
  0xf5   : > { %v1200_v62 = vpop.eup %1199  ;;  %v592_v63 = vadd.f32 1.0, %v1198_v61  ;;  %1219 = vpow2.f32 %v566_v58  ;;  %v1452_v0 = vpop.f32.mrb[8].mxu0 }
  0xf6   : > { %v1454_v1 = vpop.f32.mrb[8].mxu1  ;;  %v1202_v2 = vpop.eup %1201  ;;  %v608_v3 = vadd.f32 1.0, %v1200_v62  ;;  %1221 = vpow2.f32 %v540_v60  ;;  %v504_v40 = vsub.f32 0.0, %v1452_v0 }
  0xf7   : > { %v1456_v4 = vpop.f32.mrb[9].mxu0  ;;  %v1458_v5 = vpop.f32.mrb[9].mxu1  ;;  %1223 = vrcp.f32 %v592_v63  ;;  %v590_v7 = vadd.f32 1.0, %v1202_v2  ;;  %v520_v49 = vsub.f32 0.0, %v1454_v1 }
  0xf8   : > { %v1204_v6 = vpop.eup %1203  ;;  %v1460_v8 = vpop.f32.mrb[10].mxu0  ;;  %1225 = vrcp.f32 %v608_v3  ;;  %v502_v50 = vsub.f32 0.0, %v1456_v4  ;;  %v518_v58 = vsub.f32 0.0, %v1458_v5 }
  0xf9   : > { %v1462_v9 = vpop.f32.mrb[10].mxu1  ;;  %v1206_v10 = vpop.eup %1205  ;;  %v606_v11 = vadd.f32 1.0, %v1204_v6  ;;  %1227 = vrcp.f32 %v590_v7  ;;  %v505_v60 = vsub.f32 0.0, %v1460_v8  ;;  %v578_v15 = vmul.f32 1.442695, %v520_v49 }
  0xfa   : > { %v1464_v12 = vpop.f32.mrb[11].mxu0  ;;  %v1208_v13 = vpop.eup %1207  ;;  %v593_v14 = vadd.f32 1.0, %v1206_v10  ;;  %v521_v3 = vsub.f32 0.0, %v1462_v9  ;;  %v574_v21 = vmul.f32 1.442695, %v518_v58 }
  0xfb   : > { %v1467_v16 = vpop.f32.mrb[11].mxu1  ;;  %v1210_v17 = vpop.eup %1209  ;;  %1229 = vrcp.f32 %v606_v11  ;;  %v609_v18 = vadd.f32 1.0, %v1208_v13  ;;  %v503_v6 = vsub.f32 0.0, %v1464_v12  ;;  %v568_v11 = vmul.f32 1.442695, %v515_v33 }
  0xfc   : > { %v1212_v22 = vpop.eup %1211  ;;  %1231 = vrcp.f32 %v593_v14  ;;  %v591_v25 = vadd.f32 1.0, %v1210_v17  ;;  %v546_v14 = vmul.f32 1.442695, %v504_v40 }
  0xfd   : > { %v1214_v26 = vpop.eup %1213  ;;  %1233 = vrcp.f32 %v609_v18  ;;  %v607_v29 = vadd.f32 1.0, %v1212_v22  ;;  %v1471_v34 = vpop.f32.mrb[12].mxu0  ;;  %v542_v18 = vmul.f32 1.442695, %v502_v50  ;;  %v519_v22 = vsub.f32 0.0, %v1467_v16 }
  0xfe   : > { %v1216_v30 = vpop.eup %1215  ;;  %1235 = vrcp.f32 %v591_v25  ;;  %v596_v31 = vadd.f32 1.0, %v1214_v26  ;;  %v1474_v41 = vpop.f32.mrb[12].mxu1  ;;  %v548_v26 = vmul.f32 1.442695, %v505_v60 }
  0xff   : > { %v1218_v37 = vpop.eup %1217  ;;  %1237 = vrcp.f32 %v607_v29  ;;  %v612_v38 = vadd.f32 1.0, %v1216_v30  ;;  %v1476_v42 = vpop.f32.mrb[13].mxu0  ;;  %v580_v29 = vmul.f32 1.442695, %v521_v3  ;;  %v544_v30 = vmul.f32 1.442695, %v503_v6 }
 0x100   : > { %v1220_v45 = vpop.eup %1219  ;;  %1239 = vrcp.f32 %v596_v31  ;;  %v594_v46 = vadd.f32 1.0, %v1218_v37  ;;  %v1480_v53 = vpop.f32.mrb[13].mxu1  ;;  %v576_v60 = vmul.f32 1.442695, %v519_v22 }
 0x101   : > { %v1482_v54 = vpop.f32.mrb[14].mxu0  ;;  %v1222_v55 = vpop.eup %1221  ;;  %1241 = vrcp.f32 %v612_v38  ;;  %v610_v57 = vadd.f32 1.0, %v1220_v45  ;;  %v508_v38 = vsub.f32 0.0, %v1471_v34 }
 0x102   : > { %v1486_v61 = vpop.f32.mrb[14].mxu1  ;;  %v1488_v62 = vpop.f32.mrb[15].mxu0  ;;  %1243 = vrcp.f32 %v594_v46  ;;  %v597_v2 = vadd.f32 1.0, %v1222_v55 }
 0x103   : > { %v1224_v63 = vpop.eup %1223  ;;  %v1492_v7 = vpop.f32.mrb[15].mxu1  ;;  %1245 = vrcp.f32 %v610_v57 }
 0x104   : > { %v1226_v10 = vpop.eup %1225  ;;  %1247 = vrcp.f32 %v597_v2  ;;  %v656_v37 = vmul.f32 %v1224_v63, %v1407_v19  ;;  %v524_v19 = vsub.f32 0.0, %v1474_v41  ;;  %v554_v63 = vmul.f32 1.442695, %v508_v38 }
 0x105   : > { %v1228_v13 = vpop.eup %1227  ;;  %1249 = vpow2.f32 %v572_v32  ;;  %v672_v32 = vmul.f32 %v1226_v10, %v1409_v20  ;;  %v506_v38 = vsub.f32 0.0, %v1476_v42 }
 0x106   : > { %v1230_v17 = vpop.eup %1229  ;;  %1251 = vpow2.f32 %v536_v39 }
 0x107   : > { %v1232_v25 = vpop.eup %1231  ;;  %1253 = vpow2.f32 %v568_v11  ;;  %v670_v50 = vmul.f32 %v1230_v17, %v1415_v24  ;;  %v586_v24 = vmul.f32 1.442695, %v524_v19 }
 0x108   : > { %v1234_v31 = vpop.eup %1233  ;;  %v657_v33 = vmul.f32 %v1232_v25, %v1419_v27  ;;  %1255 = vpow2.f32 %v546_v14  ;;  %v654_v27 = vmul.f32 %v1228_v13, %v1413_v23 }
 0x109   : > { %v1236_v40 = vpop.eup %1235  ;;  %v673_v39 = vmul.f32 %v1234_v31, %v1421_v28  ;;  %1257 = vpow2.f32 %v578_v15 }
 0x10a   : > { %v1238_v45 = vpop.eup %1237  ;;  %v1020_v46 = vpack.c.bf16 %v657_v33, %v656_v37  ;;  %v655_v49 = vmul.f32 %v1236_v40, %v1425_v35  ;;  %1259 = vpow2.f32 %v542_v18 }
 0x10b   : > { %v1240_v20 = vpop.eup %1239  ;;  %v1060_v55 = vpack.c.bf16 %v673_v39, %v672_v32  ;;  %v671_v57 = vmul.f32 %v1238_v45, %v1427_v36  ;;  %1261 = vpow2.f32 %v574_v21  ;;  %v522_v39 = vsub.f32 0.0, %v1480_v53 }
 0x10c   : > { %v1512_v28 = vpop.eup %1241  ;;  %1092 = vst [vmem:[%s1504_s24 + $0x8] sm:$0xff] %v1020_v46   ;;  %v1015_v58 = vpack.c.bf16 %v655_v49, %v654_v27  ;;  %1263 = vpow2.f32 %v548_v26  ;;  %v660_v6 = vmul.f32 %v1240_v20, %v1431_v43  ;;  %v509_v27 = vsub.f32 0.0, %v1482_v54 }
 0x10d   : > { %v1515_v23 = vpop.eup %1243  ;;  %1100 = vst [vmem:[%s1504_s24 + $0x48] sm:$0xff] %v1060_v55   ;;  %v1055_v35 = vpack.c.bf16 %v671_v57, %v670_v50  ;;  %1265 = vpow2.f32 %v580_v29  ;;  %v525_v20 = vsub.f32 0.0, %v1486_v61  ;;  %v507_v50 = vsub.f32 0.0, %v1488_v62 }
 0x10e   : > { %v1518_v2 = vpop.eup %1245  ;;  %1016 = vst [vmem:[%s1504_s24] sm:$0xff] %v1015_v58   ;;  %1267 = vpow2.f32 %v544_v30  ;;  %v550_v57 = vmul.f32 1.442695, %v506_v38 }
 0x10f   : > { %v1248_v36 = vpop.eup %1247  ;;  %1099 = vst [vmem:[%s1504_s24 + $0x40] sm:$0xff] %v1055_v35   ;;  %1269 = vpow2.f32 %v576_v60  ;;  %v582_v60 = vmul.f32 1.442695, %v522_v39  ;;  %v523_v35 = vsub.f32 0.0, %v1492_v7 }
 0x110   : > { %v1250_v3 = vpop.eup %1249  ;;  %v661_v10 = vmul.f32 %v1248_v36, %v1443_v51  ;;  %1271 = vpow2.f32 %v554_v63 }
 0x111   : > { %v1252_v11 = vpop.eup %1251  ;;  %v613_v13 = vadd.f32 1.0, %v1250_v3  ;;  %1273 = vpow2.f32 %v586_v24  ;;  %v676_v24 = vmul.f32 %v1512_v28, %v1433_v44  ;;  %v556_v3 = vmul.f32 1.442695, %v509_v27 }
 0x112   : > { %v1254_v14 = vpop.eup %1253  ;;  %v1030_v15 = vpack.c.bf16 %v661_v10, %v660_v6  ;;  %v595_v17 = vadd.f32 1.0, %v1252_v11  ;;  %v658_v10 = vmul.f32 %v1515_v23, %v1437_v47 }
 0x113   : > { %v1256_v18 = vpop.eup %1255  ;;  %1275 = vrcp.f32 %v613_v13  ;;  %v611_v21 = vadd.f32 1.0, %v1254_v14  ;;  %v588_v13 = vmul.f32 1.442695, %v525_v20  ;;  %v552_v14 = vmul.f32 1.442695, %v507_v50 }
 0x114   : > { %v1258_v22 = vpop.eup %1257  ;;  %1094 = vst [vmem:[%s1504_s24 + $0x18] sm:$0xff] %v1030_v15   ;;  %1277 = vrcp.f32 %v595_v17  ;;  %v600_v25 = vadd.f32 1.0, %v1256_v18  ;;  %v674_v17 = vmul.f32 %v1518_v2, %v1439_v48 }
 0x115   : > { %v1260_v26 = vpop.eup %1259  ;;  %1279 = vrcp.f32 %v611_v21  ;;  %v616_v43 = vadd.f32 1.0, %v1258_v22  ;;  %v584_v21 = vmul.f32 1.442695, %v523_v35 }
 0x116   : > { %v1262_v29 = vpop.eup %1261  ;;  %1281 = vrcp.f32 %v600_v25  ;;  %v598_v51 = vadd.f32 1.0, %v1260_v26 }
 0x117   : > { %v1264_v30 = vpop.eup %1263  ;;  %1283 = vrcp.f32 %v616_v43  ;;  %v614_v31 = vadd.f32 1.0, %v1262_v29 }
 0x118   : > { %v1266_v37 = vpop.eup %1265  ;;  %1285 = vrcp.f32 %v598_v51  ;;  %v601_v33 = vadd.f32 1.0, %v1264_v30 }
 0x119   : > { %v1268_v40 = vpop.eup %1267  ;;  %1287 = vrcp.f32 %v614_v31  ;;  %v617_v32 = vadd.f32 1.0, %v1266_v37 }
 0x11a   : > { %v1270_v19 = vpop.eup %1269  ;;  %1289 = vrcp.f32 %v601_v33  ;;  %v599_v45 = vadd.f32 1.0, %v1268_v40 }
 0x11b   : > { %v1272_v46 = vpop.eup %1271  ;;  %1291 = vrcp.f32 %v617_v32  ;;  %v615_v49 = vadd.f32 1.0, %v1270_v19 }
 0x11c   : > { %v1274_v55 = vpop.eup %1273  ;;  %1293 = vrcp.f32 %v599_v45  ;;  %v604_v37 = vadd.f32 1.0, %v1272_v46 }
 0x11d   : > { %v1276_v58 = vpop.eup %1275  ;;  %1295 = vrcp.f32 %v615_v49  ;;  %v620_v38 = vadd.f32 1.0, %v1274_v55 }
 0x11e   : > { %v1278_v63 = vpop.eup %1277  ;;  %v677_v36 = vmul.f32 %v1276_v58, %v1445_v52  ;;  %1297 = vpow2.f32 %v550_v57 }
 0x11f   : > { %v1280_v6 = vpop.eup %1279  ;;  %v659_v11 = vmul.f32 %v1278_v63, %v1448_v56  ;;  %1299 = vpow2.f32 %v582_v60 }
 0x120   : > { %v1282_v15 = vpop.eup %1281  ;;  %v1070_v18 = vpack.c.bf16 %v677_v36, %v676_v24  ;;  %v675_v44 = vmul.f32 %v1280_v6, %v1450_v59  ;;  %1301 = vpow2.f32 %v556_v3 }
 0x121   : > { %v1284_v52 = vpop.eup %1283  ;;  %v1025_v28 = vpack.c.bf16 %v659_v11, %v658_v10  ;;  %1303 = vpow2.f32 %v588_v13  ;;  %v664_v2 = vmul.f32 %v1282_v15, %v1452_v0 }
 0x122   : > { %v1286_v22 = vpop.eup %1285  ;;  %1102 = vst [vmem:[%s1504_s24 + $0x58] sm:$0xff] %v1070_v18   ;;  %v1065_v47 = vpack.c.bf16 %v675_v44, %v674_v17  ;;  %1305 = vpow2.f32 %v552_v14  ;;  %v680_v26 = vmul.f32 %v1284_v52, %v1454_v1 }
 0x123   : > { %v1288_v56 = vpop.eup %1287  ;;  %1093 = vst [vmem:[%s1504_s24 + $0x10] sm:$0xff] %v1025_v28   ;;  %1307 = vpow2.f32 %v584_v21  ;;  %v662_v51 = vmul.f32 %v1286_v22, %v1456_v4 }
 0x124   : > { %v1290_v23 = vpop.eup %1289  ;;  %1101 = vst [vmem:[%s1504_s24 + $0x50] sm:$0xff] %v1065_v47   ;;  %v678_v0 = vmul.f32 %v1288_v56, %v1458_v5  ;;  %1309 = vrcp.f32 %v604_v37 }
 0x125   : > { %v1292_v48 = vpop.eup %1291  ;;  %v665_v59 = vmul.f32 %v1290_v23, %v1460_v8  ;;  %1311 = vrcp.f32 %v620_v38 }
 0x126   : > { %v1294_v25 = vpop.eup %1293  ;;  %v681_v43 = vmul.f32 %v1292_v48, %v1462_v9 }
 0x127   : > { %v1296_v29 = vpop.eup %1295  ;;  %v1040_v30 = vpack.c.bf16 %v665_v59, %v664_v2  ;;  %v663_v31 = vmul.f32 %v1294_v25, %v1464_v12 }
 0x128   : > { %v1080_v33 = vpack.c.bf16 %v681_v43, %v680_v26  ;;  %v679_v8 = vmul.f32 %v1296_v29, %v1467_v16  ;;  %v1298_v1 = vpop.eup %1297 }
 0x129   : > { %1096 = vst [vmem:[%s1504_s24 + $0x28] sm:$0xff] %v1040_v30   ;;  %v1035_v40 = vpack.c.bf16 %v663_v31, %v662_v51  ;;  %v1300_v32 = vpop.eup %1299  ;;  %v602_v4 = vadd.f32 1.0, %v1298_v1 }
 0x12a   : > { %1104 = vst [vmem:[%s1504_s24 + $0x68] sm:$0xff] %v1080_v33   ;;  %v1075_v9 = vpack.c.bf16 %v679_v8, %v678_v0  ;;  %v1302_v39 = vpop.eup %1301  ;;  %v618_v12 = vadd.f32 1.0, %v1300_v32 }
 0x12b   : > { %1095 = vst [vmem:[%s1504_s24 + $0x20] sm:$0xff] %v1035_v40   ;;  %v1304_v19 = vpop.eup %1303  ;;  %1313 = vrcp.f32 %v602_v4  ;;  %v605_v5 = vadd.f32 1.0, %v1302_v39 }
 0x12c   : > { %1103 = vst [vmem:[%s1504_s24 + $0x60] sm:$0xff] %v1075_v9   ;;  %v1306_v45 = vpop.eup %1305  ;;  %1315 = vrcp.f32 %v618_v12  ;;  %v621_v16 = vadd.f32 1.0, %v1304_v19 }
 0x12d   : > { %v1308_v27 = vpop.eup %1307  ;;  %1317 = vrcp.f32 %v605_v5  ;;  %v603_v46 = vadd.f32 1.0, %v1306_v45 }
 0x12e   : > { %1319 = vrcp.f32 %v621_v16  ;;  %v619_v49 = vadd.f32 1.0, %v1308_v27  ;;  %v1310_v20 = vpop.eup %1309 }
 0x12f   : > { %1321 = vrcp.f32 %v603_v46  ;;  %v1312_v50 = vpop.eup %1311  ;;  %v668_v35 = vmul.f32 %v1310_v20, %v1471_v34 }
 0x130   : > { %1323 = vrcp.f32 %v619_v49  ;;  %v684_v36 = vmul.f32 %v1312_v50, %v1474_v41 }
 0x135   : > { %v1314_v55 = vpop.eup %1313 }
 0x136   : > { %v1316_v57 = vpop.eup %1315  ;;  %v666_v10 = vmul.f32 %v1314_v55, %v1476_v42 }
 0x137   : > { %v1318_v58 = vpop.eup %1317  ;;  %v682_v14 = vmul.f32 %v1316_v57, %v1480_v53 }
 0x138   : > { %v1320_v60 = vpop.eup %1319  ;;  %v669_v63 = vmul.f32 %v1318_v58, %v1482_v54 }
 0x139   : > { %v1322_v24 = vpop.eup %1321  ;;  %v685_v3 = vmul.f32 %v1320_v60, %v1486_v61 }
 0x13a   : > { %v1324_v6 = vpop.eup %1323  ;;  %v1050_v11 = vpack.c.bf16 %v669_v63, %v668_v35  ;;  %v667_v13 = vmul.f32 %v1322_v24, %v1488_v62 }
 0x13b   : > { %v1090_v15 = vpack.c.bf16 %v685_v3, %v684_v36  ;;  %v683_v34 = vmul.f32 %v1324_v6, %v1492_v7 }
 0x13c   : > { %1098 = vst [vmem:[%s1504_s24 + $0x38] sm:$0xff] %v1050_v11   ;;  %v1045_v17 = vpack.c.bf16 %v667_v13, %v666_v10 }
 0x13d   : > { %1106 = vst [vmem:[%s1504_s24 + $0x78] sm:$0xff] %v1090_v15   ;;  %v1085_v54 = vpack.c.bf16 %v683_v34, %v682_v14 }
 0x13e   : > { %1097 = vst [vmem:[%s1504_s24 + $0x30] sm:$0xff] %v1045_v17  }
 0x13f   : > { %1105 = vst [vmem:[%s1504_s24 + $0x70] sm:$0xff] %v1085_v54  }
 0x140 PF: > { %s12_s9 = sadd.s32 1, %s1331_s9  }
 0x141   : > { %p9_p4 = scmp.ge.s32.totalorder %s12_s9, 4  }
 0x143   :  { %11 = sbr.rel (!%p9_p4) target bundleno = 1 (0x1), region = 58 }

// kernel: encoder_b_forward.4
= control target key start
LH: loop header
LB: loop body
LE: loop exit
PB: predicated region body
PF: predicated region fallthrough
CT: control target
= control target key end

     0   :  { %s1536_s1 = inlined_call_operand.vmem [shape: bf16[512,128], index: 1, kind: input, shape index: {}]   ;;  %s1537_s0 = inlined_call_operand.vmem [shape: bf16[128,512], index: 0, kind: input, shape index: {}]   ;;  %s1538_s2 = inlined_call_operand.vmem [shape: bf16[128,128], index: 2, kind: output, shape index: {}]  }
   0x1   :  { %v1105_v0 = vld [vmem:[%s1536_s1 + $0x40] sm:$0xff]   ;;  %v1109_v4 = vld [vmem:[%s1536_s1 + $0x48] sm:$0xff]   ;;  %v1113_v8 = vld [vmem:[%s1536_s1 + $0x50] sm:$0xff]  }
   0x2   :  { %v1106_v1 = vld [vmem:[%s1536_s1 + $0xc0] sm:$0xff]   ;;  %977 = vmatprep.subr.bf16.mxu0 %v1105_v0  ;;  %v1110_v5 = vld [vmem:[%s1536_s1 + $0xc8] sm:$0xff]   ;;  %v1114_v9 = vld [vmem:[%s1536_s1 + $0xd0] sm:$0xff]  }
   0x3   :  { %v1107_v2 = vld [vmem:[%s1536_s1] sm:$0xff]   ;;  %1041 = vmatprep.subr.bf16.mxu1 %v1106_v1  ;;  %v1111_v6 = vld [vmem:[%s1536_s1 + $0x8] sm:$0xff]   ;;  %v1115_v10 = vld [vmem:[%s1536_s1 + $0x10] sm:$0xff]  }
   0x4   :  { %v1108_v3 = vld [vmem:[%s1536_s1 + $0x80] sm:$0xff]   ;;  %978 = vmatpush3.bf16.msra.mxu0 %v1107_v2  ;;  %v1112_v7 = vld [vmem:[%s1536_s1 + $0x88] sm:$0xff]   ;;  %v1116_v11 = vld [vmem:[%s1536_s1 + $0x90] sm:$0xff]  }
   0x5   :  { %1042 = vmatpush3.bf16.msra.mxu1 %v1108_v3  ;;  %979 = vmatprep.subr.bf16.mxu0 %v1109_v4  ;;  %v1117_v12 = vld [vmem:[%s1536_s1 + $0x58] sm:$0xff]   ;;  %v1121_v16 = vld [vmem:[%s1536_s1 + $0x60] sm:$0xff]   ;;  %v1125_v20 = vld [vmem:[%s1536_s1 + $0x68] sm:$0xff]  }
   0x6   :  { %1043 = vmatprep.subr.bf16.mxu1 %v1110_v5  ;;  %v1118_v13 = vld [vmem:[%s1536_s1 + $0xd8] sm:$0xff]   ;;  %v1122_v17 = vld [vmem:[%s1536_s1 + $0xe0] sm:$0xff]   ;;  %v1126_v21 = vld [vmem:[%s1536_s1 + $0xe8] sm:$0xff]  }
   0x7   :  { %v1119_v14 = vld [vmem:[%s1536_s1 + $0x18] sm:$0xff]   ;;  %v1123_v18 = vld [vmem:[%s1536_s1 + $0x20] sm:$0xff]   ;;  %v1127_v22 = vld [vmem:[%s1536_s1 + $0x28] sm:$0xff]  }
   0x8   :  { %980 = vmatpush3.bf16.msra.mxu0 %v1111_v6  ;;  %v1120_v15 = vld [vmem:[%s1536_s1 + $0x98] sm:$0xff]   ;;  %v1124_v19 = vld [vmem:[%s1536_s1 + $0xa0] sm:$0xff]   ;;  %v1128_v23 = vld [vmem:[%s1536_s1 + $0xa8] sm:$0xff]  }
   0x9   :  { %1044 = vmatpush3.bf16.msra.mxu1 %v1112_v7  ;;  %981 = vmatprep.subr.bf16.mxu0 %v1113_v8  ;;  %v1129_v24 = vld [vmem:[%s1536_s1 + $0x70] sm:$0xff]   ;;  %v1133_v28 = vld [vmem:[%s1536_s1 + $0x78] sm:$0xff]  }
   0xa   :  { %1045 = vmatprep.subr.bf16.mxu1 %v1114_v9  ;;  %v1130_v25 = vld [vmem:[%s1536_s1 + $0xf0] sm:$0xff]   ;;  %v1134_v29 = vld [vmem:[%s1536_s1 + $0xf8] sm:$0xff]  }
   0xb   :  { %v1131_v26 = vld [vmem:[%s1536_s1 + $0x30] sm:$0xff]   ;;  %v1135_v30 = vld [vmem:[%s1536_s1 + $0x38] sm:$0xff]  }
   0xc   :  { %982 = vmatpush3.bf16.msra.mxu0 %v1115_v10  ;;  %v1132_v27 = vld [vmem:[%s1536_s1 + $0xb0] sm:$0xff]   ;;  %v1136_v31 = vld [vmem:[%s1536_s1 + $0xb8] sm:$0xff]  }
   0xd   :  { %1046 = vmatpush3.bf16.msra.mxu1 %v1116_v11  ;;  %983 = vmatprep.subr.bf16.mxu0 %v1117_v12  ;;  %v1137_v32 = vld [vmem:[%s1537_s0] ss:$16 sps:$4 sm:$0xff]   ;;  %v1139_v33 = vld [vmem:[%s1537_s0 + $0x4] ss:$16 sps:$4 sm:$0xff]   ;;  %v1140_v34 = vld [vmem:[%s1537_s0 + $0x8] ss:$16 sps:$4 sm:$0xff]  }
   0xe   :  { %1047 = vmatprep.subr.bf16.mxu1 %v1118_v13  ;;  %v1142_v35 = vld [vmem:[%s1537_s0 + $0xc] ss:$16 sps:$4 sm:$0xff]   ;;  %492 = vmatprep.mubr.bf16.mxu0 %v1139_v33  ;;  %v1143_v36 = vld [vmem:[%s1537_s0 + $0x24] ss:$16 sps:$4 sm:$0xff]   ;;  %v1147_v38 = vld [vmem:[%s1537_s0 + $0x20] ss:$16 sps:$4 sm:$0xff]  }
   0xf   :  { %589 = vmatprep.mubr.bf16.mxu1 %v1142_v35  ;;  %v1145_v37 = vld [vmem:[%s1537_s0 + $0x2c] ss:$16 sps:$4 sm:$0xff]   ;;  %v1148_v39 = vld [vmem:[%s1537_s0 + $0x28] ss:$16 sps:$4 sm:$0xff]   ;;  %v1149_v40 = vld [vmem:[%s1537_s0 + $0x44] ss:$16 sps:$4 sm:$0xff]  }
  0x10   :  { %984 = vmatpush3.bf16.msra.mxu0 %v1119_v14  ;;  %v1151_v41 = vld [vmem:[%s1537_s0 + $0x4c] ss:$16 sps:$4 sm:$0xff]   ;;  %v1153_v42 = vld [vmem:[%s1537_s0 + $0x40] ss:$16 sps:$4 sm:$0xff]   ;;  %v1154_v43 = vld [vmem:[%s1537_s0 + $0x48] ss:$16 sps:$4 sm:$0xff]  }
  0x11   :  { %1048 = vmatpush3.bf16.msra.mxu1 %v1120_v15  ;;  %985 = vmatprep.subr.bf16.mxu0 %v1121_v16  ;;  %v1155_v44 = vld [vmem:[%s1537_s0 + $0x64] ss:$16 sps:$4 sm:$0xff]   ;;  %v1157_v45 = vld [vmem:[%s1537_s0 + $0x6c] ss:$16 sps:$4 sm:$0xff]   ;;  %v1159_v46 = vld [vmem:[%s1537_s0 + $0x60] ss:$16 sps:$4 sm:$0xff]  }
  0x12   :  { %1049 = vmatprep.subr.bf16.mxu1 %v1122_v17  ;;  %v1160_v47 = vld [vmem:[%s1537_s0 + $0x68] ss:$16 sps:$4 sm:$0xff]   ;;  %v1161_v48 = vld [vmem:[%s1537_s0 + $0x84] ss:$16 sps:$4 sm:$0xff]   ;;  %v1163_v49 = vld [vmem:[%s1537_s0 + $0x8c] ss:$16 sps:$4 sm:$0xff]  }
  0x13   :  { %v1165_v50 = vld [vmem:[%s1537_s0 + $0x80] ss:$16 sps:$4 sm:$0xff]   ;;  %v1166_v51 = vld [vmem:[%s1537_s0 + $0x88] ss:$16 sps:$4 sm:$0xff]   ;;  %v1167_v52 = vld [vmem:[%s1537_s0 + $0xa4] ss:$16 sps:$4 sm:$0xff]  }
  0x14   :  { %986 = vmatpush3.bf16.msra.mxu0 %v1123_v18  ;;  %v1169_v53 = vld [vmem:[%s1537_s0 + $0xac] ss:$16 sps:$4 sm:$0xff]   ;;  %v1171_v54 = vld [vmem:[%s1537_s0 + $0xa0] ss:$16 sps:$4 sm:$0xff]   ;;  %v1172_v55 = vld [vmem:[%s1537_s0 + $0xa8] ss:$16 sps:$4 sm:$0xff]  }
  0x15   :  { %1050 = vmatpush3.bf16.msra.mxu1 %v1124_v19  ;;  %987 = vmatprep.subr.bf16.mxu0 %v1125_v20  ;;  %v1173_v56 = vld [vmem:[%s1537_s0 + $0xc4] ss:$16 sps:$4 sm:$0xff]   ;;  %v1175_v57 = vld [vmem:[%s1537_s0 + $0xcc] ss:$16 sps:$4 sm:$0xff]   ;;  %v1177_v58 = vld [vmem:[%s1537_s0 + $0xc0] ss:$16 sps:$4 sm:$0xff]  }
  0x16   :  { %1051 = vmatprep.subr.bf16.mxu1 %v1126_v21  ;;  %v1178_v59 = vld [vmem:[%s1537_s0 + $0xc8] ss:$16 sps:$4 sm:$0xff]   ;;  %v1179_v60 = vld [vmem:[%s1537_s0 + $0xe4] ss:$16 sps:$4 sm:$0xff]   ;;  %v1181_v61 = vld [vmem:[%s1537_s0 + $0xec] ss:$16 sps:$4 sm:$0xff]  }
  0x17   :  { %v1183_v62 = vld [vmem:[%s1537_s0 + $0xe0] ss:$16 sps:$4 sm:$0xff]   ;;  %v1184_v63 = vld [vmem:[%s1537_s0 + $0xe8] ss:$16 sps:$4 sm:$0xff]  }
  0x18   :  { %988 = vmatpush3.bf16.msra.mxu0 %v1127_v22 }
  0x19   :  { %1052 = vmatpush3.bf16.msra.mxu1 %v1128_v23  ;;  %989 = vmatprep.subr.bf16.mxu0 %v1129_v24 }
  0x1a   :  { %1053 = vmatprep.subr.bf16.mxu1 %v1130_v25 }
  0x1c   :  { %990 = vmatpush3.bf16.msra.mxu0 %v1131_v26 }
  0x1d   :  { %1054 = vmatpush3.bf16.msra.mxu1 %v1132_v27  ;;  %991 = vmatprep.subr.bf16.mxu0 %v1133_v28 }
  0x1e   :  { %1055 = vmatprep.subr.bf16.mxu1 %v1134_v29 }
  0x20   :  { %992 = vmatpush3.bf16.msra.mxu0 %v1135_v30 }
  0x21   :  { %1056 = vmatpush3.bf16.msra.mxu1 %v1136_v31 }
  0x23   :  { %493 = vmatmul.mubr.bf16.vlgmr.msra.gmra.mrb[0].mxu0 %v1137_v32 }
  0x24   :  { %590 = vmatmul.mubr.bf16.vlgmr.msra.gmra.mrb[0].mxu1 %v1140_v34  ;;  %500 = vmatprep.mubr.bf16.mxu0 %v1143_v36 }
  0x25   :  { %597 = vmatprep.mubr.bf16.mxu1 %v1145_v37 }
  0x2b   :  { %501 = vmatmul.mubr.bf16.gmra.mrb[4].mxu0 %v1147_v38 }
  0x2c   :  { %598 = vmatmul.mubr.bf16.gmra.mrb[4].mxu1 %v1148_v39  ;;  %508 = vmatprep.mubr.bf16.mxu0 %v1149_v40 }
  0x2d   :  { %605 = vmatprep.mubr.bf16.mxu1 %v1151_v41 }
  0x33   :  { %509 = vmatmul.mubr.bf16.gmra.mrb[8].mxu0 %v1153_v42 }
  0x34   :  { %606 = vmatmul.mubr.bf16.gmra.mrb[8].mxu1 %v1154_v43  ;;  %516 = vmatprep.mubr.bf16.mxu0 %v1155_v44 }
  0x35   :  { %613 = vmatprep.mubr.bf16.mxu1 %v1157_v45 }
  0x3b   :  { %517 = vmatmul.mubr.bf16.gmra.mrb[12].mxu0 %v1159_v46 }
  0x3c   :  { %614 = vmatmul.mubr.bf16.gmra.mrb[12].mxu1 %v1160_v47  ;;  %524 = vmatprep.mubr.bf16.mxu0 %v1161_v48 }
  0x3d   :  { %621 = vmatprep.mubr.bf16.mxu1 %v1163_v49 }
  0x43   :  { %525 = vmatmul.mubr.bf16.gmra.mrb[16].mxu0 %v1165_v50 }
  0x44   :  { %622 = vmatmul.mubr.bf16.gmra.mrb[16].mxu1 %v1166_v51  ;;  %532 = vmatprep.mubr.bf16.mxu0 %v1167_v52 }
  0x45   :  { %629 = vmatprep.mubr.bf16.mxu1 %v1169_v53 }
  0x4b   :  { %533 = vmatmul.mubr.bf16.gmra.mrb[20].mxu0 %v1171_v54 }
  0x4c   :  { %630 = vmatmul.mubr.bf16.gmra.mrb[20].mxu1 %v1172_v55  ;;  %540 = vmatprep.mubr.bf16.mxu0 %v1173_v56 }
  0x4d   :  { %637 = vmatprep.mubr.bf16.mxu1 %v1175_v57 }
  0x53   :  { %541 = vmatmul.mubr.bf16.gmra.mrb[24].mxu0 %v1177_v58 }
  0x54   :  { %638 = vmatmul.mubr.bf16.gmra.mrb[24].mxu1 %v1178_v59  ;;  %548 = vmatprep.mubr.bf16.mxu0 %v1179_v60 }
  0x55   :  { %645 = vmatprep.mubr.bf16.mxu1 %v1181_v61 }
  0x5b   :  { %549 = vmatmul.mubr.bf16.gmra.mrb[28].mxu0 %v1183_v62 }
  0x5c   :  { %646 = vmatmul.mubr.bf16.gmra.mrb[28].mxu1 %v1184_v63 }
  0xf6   :  { %v993_v0 = vpop.f32.mrb[0].mxu0 }
  0xf7   :  { %v1057_v1 = vpop.f32.mrb[0].mxu1  ;;  %v994_v2 = vpop.f32.mrb[1].mxu0 }
  0xf8   :  { %v995_v3 = vadd.f32 %v994_v2, %v993_v0  ;;  %v1058_v4 = vpop.f32.mrb[1].mxu1  ;;  %v996_v5 = vpop.f32.mrb[2].mxu0 }
  0xf9   :  { %v1059_v6 = vadd.f32 %v1058_v4, %v1057_v1  ;;  %v1060_v7 = vpop.f32.mrb[2].mxu1  ;;  %v997_v8 = vpop.f32.mrb[3].mxu0 }
  0xfa   :  { %v998_v9 = vadd.f32 %v997_v8, %v996_v5  ;;  %v1061_v10 = vpop.f32.mrb[3].mxu1 }
  0xfb   :  { %v1456_v11 = vadd.f32 %v1059_v6, %v995_v3  ;;  %v1062_v12 = vadd.f32 %v1061_v10, %v1060_v7 }
  0xfd   :  { %v654_v13 = vsub.f32 0.0, %v1456_v11  ;;  %v1459_v14 = vadd.f32 %v1062_v12, %v998_v9 }
  0xfe   :  { %v999_v15 = vpop.f32.mrb[4].mxu0 }
  0xff   :  { %v670_v16 = vmul.f32 1.442695, %v654_v13  ;;  %v655_v17 = vsub.f32 0.0, %v1459_v14  ;;  %v1063_v18 = vpop.f32.mrb[4].mxu1  ;;  %v1000_v19 = vpop.f32.mrb[5].mxu0 }
 0x100   :  { %v1001_v20 = vadd.f32 %v1000_v19, %v999_v15  ;;  %v1064_v21 = vpop.f32.mrb[5].mxu1  ;;  %v1002_v22 = vpop.f32.mrb[6].mxu0 }
 0x101   :  { %1185 = vpow2.f32 %v670_v16  ;;  %v672_v23 = vmul.f32 1.442695, %v655_v17  ;;  %v1065_v24 = vadd.f32 %v1064_v21, %v1063_v18  ;;  %v1066_v25 = vpop.f32.mrb[6].mxu1  ;;  %v1003_v26 = vpop.f32.mrb[7].mxu0 }
 0x102   :  { %v1004_v27 = vadd.f32 %v1003_v26, %v1002_v22  ;;  %v1067_v28 = vpop.f32.mrb[7].mxu1 }
 0x103   :  { %1187 = vpow2.f32 %v672_v23  ;;  %v1462_v29 = vadd.f32 %v1065_v24, %v1001_v20  ;;  %v1068_v30 = vadd.f32 %v1067_v28, %v1066_v25 }
 0x105   :  { %v656_v31 = vsub.f32 0.0, %v1462_v29  ;;  %v1465_v32 = vadd.f32 %v1068_v30, %v1004_v27 }
 0x106   :  { %v1005_v33 = vpop.f32.mrb[8].mxu0 }
 0x107   :  { %v674_v34 = vmul.f32 1.442695, %v656_v31  ;;  %v657_v35 = vsub.f32 0.0, %v1465_v32  ;;  %v1069_v36 = vpop.f32.mrb[8].mxu1  ;;  %v1006_v37 = vpop.f32.mrb[9].mxu0 }
 0x108   :  { %v1007_v38 = vadd.f32 %v1006_v37, %v1005_v33  ;;  %v1070_v39 = vpop.f32.mrb[9].mxu1  ;;  %v1008_v40 = vpop.f32.mrb[10].mxu0 }
 0x109   :  { %1189 = vpow2.f32 %v674_v34  ;;  %v676_v41 = vmul.f32 1.442695, %v657_v35  ;;  %v1071_v42 = vadd.f32 %v1070_v39, %v1069_v36  ;;  %v1072_v43 = vpop.f32.mrb[10].mxu1  ;;  %v1009_v44 = vpop.f32.mrb[11].mxu0 }
 0x10a   :  { %v1010_v45 = vadd.f32 %v1009_v44, %v1008_v40  ;;  %v1073_v46 = vpop.f32.mrb[11].mxu1 }
 0x10b   :  { %v1186_v47 = vpop.eup %1185  ;;  %1191 = vpow2.f32 %v676_v41  ;;  %v1468_v48 = vadd.f32 %v1071_v42, %v1007_v38  ;;  %v1074_v49 = vadd.f32 %v1073_v46, %v1072_v43 }
 0x10c   :  { %v702_v50 = vadd.f32 1.0, %v1186_v47 }
 0x10d   :  { %v1188_v51 = vpop.eup %1187  ;;  %v658_v52 = vsub.f32 0.0, %v1468_v48  ;;  %v1471_v53 = vadd.f32 %v1074_v49, %v1010_v45 }
 0x10e   :  { %1193 = vrcp.f32 %v702_v50  ;;  %v703_v54 = vadd.f32 1.0, %v1188_v51  ;;  %v1011_v55 = vpop.f32.mrb[12].mxu0 }
 0x10f   :  { %v678_v56 = vmul.f32 1.442695, %v658_v52  ;;  %v659_v57 = vsub.f32 0.0, %v1471_v53  ;;  %v1075_v58 = vpop.f32.mrb[12].mxu1  ;;  %v1012_v59 = vpop.f32.mrb[13].mxu0 }
 0x110   :  { %1195 = vrcp.f32 %v703_v54  ;;  %v1013_v60 = vadd.f32 %v1012_v59, %v1011_v55  ;;  %v1076_v61 = vpop.f32.mrb[13].mxu1  ;;  %v1014_v62 = vpop.f32.mrb[14].mxu0 }
 0x111   :  { %1197 = vpow2.f32 %v678_v56  ;;  %v680_v63 = vmul.f32 1.442695, %v659_v57  ;;  %v1077_v0 = vadd.f32 %v1076_v61, %v1075_v58  ;;  %v1078_v1 = vpop.f32.mrb[14].mxu1  ;;  %v1015_v2 = vpop.f32.mrb[15].mxu0 }
 0x112   :  { %v1016_v3 = vadd.f32 %v1015_v2, %v1014_v62  ;;  %v1079_v4 = vpop.f32.mrb[15].mxu1 }
 0x113   :  { %v1190_v5 = vpop.eup %1189  ;;  %1199 = vpow2.f32 %v680_v63  ;;  %v1474_v6 = vadd.f32 %v1077_v0, %v1013_v60  ;;  %v1080_v7 = vadd.f32 %v1079_v4, %v1078_v1 }
 0x114   :  { %v704_v8 = vadd.f32 1.0, %v1190_v5 }
 0x115   :  { %v1192_v9 = vpop.eup %1191  ;;  %v660_v10 = vsub.f32 0.0, %v1474_v6  ;;  %v1477_v12 = vadd.f32 %v1080_v7, %v1016_v3 }
 0x116   :  { %1201 = vrcp.f32 %v704_v8  ;;  %v705_v13 = vadd.f32 1.0, %v1192_v9  ;;  %v1017_v15 = vpop.f32.mrb[16].mxu0 }
 0x117   :  { %v682_v16 = vmul.f32 1.442695, %v660_v10  ;;  %v661_v17 = vsub.f32 0.0, %v1477_v12  ;;  %v1081_v18 = vpop.f32.mrb[16].mxu1  ;;  %v1018_v19 = vpop.f32.mrb[17].mxu0 }
 0x118   :  { %v1194_v20 = vpop.eup %1193  ;;  %1203 = vrcp.f32 %v705_v13  ;;  %v1019_v21 = vadd.f32 %v1018_v19, %v1017_v15  ;;  %v1082_v22 = vpop.f32.mrb[17].mxu1 }
 0x119   :  { %v1020_v23 = vpop.f32.mrb[18].mxu0  ;;  %1205 = vpow2.f32 %v682_v16  ;;  %v684_v24 = vmul.f32 1.442695, %v661_v17  ;;  %v1083_v25 = vadd.f32 %v1082_v22, %v1081_v18  ;;  %v1084_v26 = vpop.f32.mrb[18].mxu1  ;;  %v734_v30 = vmul.f32 %v1194_v20, %v1456_v11 }
 0x11a   :  { %v1021_v27 = vpop.f32.mrb[19].mxu0  ;;  %v1196_v28 = vpop.eup %1195 }
 0x11b   :  { %v1022_v31 = vadd.f32 %v1021_v27, %v1020_v23  ;;  %v1085_v33 = vpop.f32.mrb[19].mxu1  ;;  %v1198_v34 = vpop.eup %1197  ;;  %v735_v35 = vmul.f32 %v1196_v28, %v1459_v14  ;;  %1207 = vpow2.f32 %v684_v24  ;;  %v1482_v36 = vadd.f32 %v1083_v25, %v1019_v21 }
 0x11c   :  { %v1086_v37 = vadd.f32 %v1085_v33, %v1084_v26  ;;  %v706_v38 = vadd.f32 1.0, %v1198_v34 }
 0x11d   :  { %v1200_v39 = vpop.eup %1199  ;;  %v933_v40 = vpack.c.bf16 %v735_v35, %v734_v30  ;;  %v662_v41 = vsub.f32 0.0, %v1482_v36 }
 0x11e   :  { %v1485_v42 = vadd.f32 %v1086_v37, %v1022_v31  ;;  %1209 = vrcp.f32 %v706_v38  ;;  %v707_v43 = vadd.f32 1.0, %v1200_v39  ;;  %v1023_v44 = vpop.f32.mrb[20].mxu0 }
 0x11f   :  { %934 = vst [vmem:[%s1538_s2] sm:$0xff] %v933_v40   ;;  %v686_v11 = vmul.f32 1.442695, %v662_v41  ;;  %v1087_v45 = vpop.f32.mrb[20].mxu1  ;;  %v1024_v46 = vpop.f32.mrb[21].mxu0 }
 0x120   :  { %v663_v14 = vsub.f32 0.0, %v1485_v42  ;;  %v1202_v47 = vpop.eup %1201  ;;  %1211 = vrcp.f32 %v707_v43  ;;  %v1025_v49 = vadd.f32 %v1024_v46, %v1023_v44  ;;  %v1088_v50 = vpop.f32.mrb[21].mxu1 }
 0x121   :  { %v1026_v51 = vpop.f32.mrb[22].mxu0  ;;  %1213 = vpow2.f32 %v686_v11  ;;  %v1089_v54 = vadd.f32 %v1088_v50, %v1087_v45  ;;  %v1090_v55 = vpop.f32.mrb[22].mxu1  ;;  %v736_v58 = vmul.f32 %v1202_v47, %v1462_v29 }
 0x122   :  { %v688_v52 = vmul.f32 1.442695, %v663_v14  ;;  %v1027_v56 = vpop.f32.mrb[23].mxu0  ;;  %v1204_v57 = vpop.eup %1203 }
 0x123   :  { %v1028_v59 = vadd.f32 %v1027_v56, %v1026_v51  ;;  %v1091_v60 = vpop.f32.mrb[23].mxu1  ;;  %v1206_v61 = vpop.eup %1205  ;;  %v737_v62 = vmul.f32 %v1204_v57, %v1465_v32  ;;  %v1493_v63 = vadd.f32 %v1089_v54, %v1025_v49 }
 0x124   :  { %1215 = vpow2.f32 %v688_v52  ;;  %v1092_v0 = vadd.f32 %v1091_v60, %v1090_v55  ;;  %v708_v1 = vadd.f32 1.0, %v1206_v61 }
 0x125   :  { %v1208_v2 = vpop.eup %1207  ;;  %v938_v3 = vpack.c.bf16 %v737_v62, %v736_v58  ;;  %v664_v4 = vsub.f32 0.0, %v1493_v63 }
 0x126   :  { %v1496_v5 = vadd.f32 %v1092_v0, %v1028_v59  ;;  %1217 = vrcp.f32 %v708_v1  ;;  %v709_v7 = vadd.f32 1.0, %v1208_v2  ;;  %v1029_v8 = vpop.f32.mrb[24].mxu0 }
 0x127   :  { %970 = vst [vmem:[%s1538_s2 + $0x8] sm:$0xff] %v938_v3   ;;  %v690_v29 = vmul.f32 1.442695, %v664_v4  ;;  %v1093_v9 = vpop.f32.mrb[24].mxu1  ;;  %v1030_v10 = vpop.f32.mrb[25].mxu0 }
 0x128   :  { %v665_v32 = vsub.f32 0.0, %v1496_v5  ;;  %v1210_v13 = vpop.eup %1209  ;;  %1219 = vrcp.f32 %v709_v7  ;;  %v1031_v15 = vadd.f32 %v1030_v10, %v1029_v8  ;;  %v1094_v16 = vpop.f32.mrb[25].mxu1 }
 0x129   :  { %v1032_v17 = vpop.f32.mrb[26].mxu0  ;;  %1221 = vpow2.f32 %v690_v29  ;;  %v1095_v19 = vadd.f32 %v1094_v16, %v1093_v9  ;;  %v1096_v20 = vpop.f32.mrb[26].mxu1  ;;  %v738_v23 = vmul.f32 %v1210_v13, %v1468_v48 }
 0x12a   :  { %v692_v18 = vmul.f32 1.442695, %v665_v32  ;;  %v1033_v21 = vpop.f32.mrb[27].mxu0  ;;  %v1212_v22 = vpop.eup %1211 }
 0x12b   :  { %v1034_v24 = vadd.f32 %v1033_v21, %v1032_v17  ;;  %v1097_v25 = vpop.f32.mrb[27].mxu1  ;;  %v1214_v26 = vpop.eup %1213  ;;  %v739_v27 = vmul.f32 %v1212_v22, %v1471_v53  ;;  %v1504_v28 = vadd.f32 %v1095_v19, %v1031_v15 }
 0x12c   :  { %1223 = vpow2.f32 %v692_v18  ;;  %v1098_v30 = vadd.f32 %v1097_v25, %v1096_v20  ;;  %v710_v31 = vadd.f32 1.0, %v1214_v26 }
 0x12d   :  { %v943_v34 = vpack.c.bf16 %v739_v27, %v738_v23  ;;  %v666_v35 = vsub.f32 0.0, %v1504_v28 }
 0x12e   :  { %v1216_v33 = vpop.eup %1215  ;;  %v1507_v37 = vadd.f32 %v1098_v30, %v1034_v24  ;;  %1225 = vrcp.f32 %v710_v31  ;;  %v1035_v39 = vpop.f32.mrb[28].mxu0 }
 0x12f   :  { %v711_v38 = vadd.f32 1.0, %v1216_v33  ;;  %971 = vst [vmem:[%s1538_s2 + $0x10] sm:$0xff] %v943_v34   ;;  %v694_v48 = vmul.f32 1.442695, %v666_v35  ;;  %v1099_v40 = vpop.f32.mrb[28].mxu1  ;;  %v1036_v41 = vpop.f32.mrb[29].mxu0 }
 0x130   :  { %v667_v53 = vsub.f32 0.0, %v1507_v37  ;;  %v1218_v43 = vpop.eup %1217  ;;  %v1037_v44 = vadd.f32 %v1036_v41, %v1035_v39  ;;  %v1100_v11 = vpop.f32.mrb[29].mxu1 }
 0x131   :  { %1227 = vrcp.f32 %v711_v38  ;;  %v1038_v14 = vpop.f32.mrb[30].mxu0  ;;  %v1101_v46 = vadd.f32 %v1100_v11, %v1099_v40  ;;  %v1102_v47 = vpop.f32.mrb[30].mxu1  ;;  %v740_v51 = vmul.f32 %v1218_v43, %v1474_v6 }
 0x132   :  { %1229 = vpow2.f32 %v694_v48  ;;  %v696_v45 = vmul.f32 1.442695, %v667_v53  ;;  %v1039_v49 = vpop.f32.mrb[31].mxu0  ;;  %v1220_v50 = vpop.eup %1219 }
 0x133   :  { %v1040_v52 = vadd.f32 %v1039_v49, %v1038_v14  ;;  %v1103_v54 = vpop.f32.mrb[31].mxu1  ;;  %v1222_v55 = vpop.eup %1221  ;;  %v741_v56 = vmul.f32 %v1220_v50, %v1477_v12  ;;  %v648_v57 = vadd.f32 %v1101_v46, %v1037_v44 }
 0x134   :  { %1231 = vpow2.f32 %v696_v45  ;;  %v1104_v58 = vadd.f32 %v1103_v54, %v1102_v47  ;;  %v712_v59 = vadd.f32 1.0, %v1222_v55 }
 0x135   :  { %v948_v61 = vpack.c.bf16 %v741_v56, %v740_v51  ;;  %v668_v62 = vsub.f32 0.0, %v648_v57 }
 0x136   :  { %v1224_v60 = vpop.eup %1223  ;;  %v651_v0 = vadd.f32 %v1104_v58, %v1040_v52  ;;  %1233 = vrcp.f32 %v712_v59 }
 0x137   :  { %v713_v1 = vadd.f32 1.0, %v1224_v60  ;;  %972 = vst [vmem:[%s1538_s2 + $0x18] sm:$0xff] %v948_v61   ;;  %v698_v6 = vmul.f32 1.442695, %v668_v62 }
 0x138   :  { %v669_v2 = vsub.f32 0.0, %v651_v0  ;;  %v1226_v3 = vpop.eup %1225 }
 0x139   :  { %1235 = vrcp.f32 %v713_v1  ;;  %v742_v8 = vmul.f32 %v1226_v3, %v1482_v36 }
 0x13a   :  { %1237 = vpow2.f32 %v698_v6  ;;  %v700_v12 = vmul.f32 1.442695, %v669_v2 }
 0x13b   :  { %v1228_v4 = vpop.eup %1227 }
 0x13c   :  { %v1230_v7 = vpop.eup %1229  ;;  %v743_v29 = vmul.f32 %v1228_v4, %v1485_v42  ;;  %1239 = vpow2.f32 %v700_v12 }
 0x13d   :  { %v714_v32 = vadd.f32 1.0, %v1230_v7 }
 0x13e   :  { %v1232_v9 = vpop.eup %1231  ;;  %v953_v10 = vpack.c.bf16 %v743_v29, %v742_v8 }
 0x13f   :  { %1241 = vrcp.f32 %v714_v32  ;;  %v715_v13 = vadd.f32 1.0, %v1232_v9 }
 0x140   :  { %973 = vst [vmem:[%s1538_s2 + $0x20] sm:$0xff] %v953_v10   ;;  %v1234_v15 = vpop.eup %1233 }
 0x141   :  { %1243 = vrcp.f32 %v715_v13  ;;  %v744_v18 = vmul.f32 %v1234_v15, %v1493_v63 }
 0x143   :  { %v1236_v16 = vpop.eup %1235 }
 0x144   :  { %v1238_v17 = vpop.eup %1237  ;;  %v745_v36 = vmul.f32 %v1236_v16, %v1496_v5 }
 0x145   :  { %v716_v19 = vadd.f32 1.0, %v1238_v17 }
 0x146   :  { %v1240_v42 = vpop.eup %1239  ;;  %v958_v20 = vpack.c.bf16 %v745_v36, %v744_v18 }
 0x147   :  { %1245 = vrcp.f32 %v716_v19  ;;  %v717_v21 = vadd.f32 1.0, %v1240_v42 }
 0x148   :  { %974 = vst [vmem:[%s1538_s2 + $0x28] sm:$0xff] %v958_v20  }
 0x149   :  { %v1242_v22 = vpop.eup %1241  ;;  %1247 = vrcp.f32 %v717_v21 }
 0x14a   :  { %v746_v24 = vmul.f32 %v1242_v22, %v1504_v28 }
 0x14b   :  { %v1244_v23 = vpop.eup %1243 }
 0x14c   :  { %v747_v25 = vmul.f32 %v1244_v23, %v1507_v37 }
 0x14e   :  { %v963_v26 = vpack.c.bf16 %v747_v25, %v746_v24 }
 0x150   :  { %975 = vst [vmem:[%s1538_s2 + $0x30] sm:$0xff] %v963_v26  }
 0x151   :  { %v1246_v63 = vpop.eup %1245 }
 0x152   :  { %v748_v27 = vmul.f32 %v1246_v63, %v648_v57 }
 0x153   :  { %v1248_v5 = vpop.eup %1247 }
 0x154   :  { %v749_v30 = vmul.f32 %v1248_v5, %v651_v0 }
 0x156   :  { %v968_v31 = vpack.c.bf16 %v749_v30, %v748_v27 }
 0x158   :  { %976 = vst [vmem:[%s1538_s2 + $0x38] sm:$0xff] %v968_v31  }

// kernel: encoder_b_forward.5
= control target key start
LH: loop header
LB: loop body
LE: loop exit
PB: predicated region body
PF: predicated region fallthrough
CT: control target
= control target key end

     0   :  { %s9972_s1 = inlined_call_operand.vmem [shape: bf16[1024,128], index: 1, kind: input, shape index: {}]   ;;  %s9973_s0 = inlined_call_operand.vmem [shape: bf16[32,1024], index: 0, kind: input, shape index: {}]   ;;  %s9974_s2 = inlined_call_operand.vmem [shape: bf16[16,128,512], index: 2, kind: input, shape index: {}]   ;;  %s9975_s4 = inlined_call_operand.vmem [shape: bf16[512,128], index: 4, kind: input, shape index: {}]   ;;  %s9976_s3 = inlined_call_operand.vmem [shape: f32[1,512], index: 3, kind: input, shape index: {}]   ;;  %s9977_s5 = inlined_call_operand.vmem [shape: f32[1,128], index: 5, kind: input, shape index: {}]   ;;  %s9978_s6 = inlined_call_operand.vmem [shape: f32[2,128], index: 6, kind: output, shape index: {}]  }
   0x1   :  { %v7003_v0 = vld [vmem:[%s9972_s1 + $0x40] sm:$0xff]   ;;  %v7007_v4 = vld [vmem:[%s9972_s1 + $0x48] sm:$0xff]   ;;  %v7011_v8 = vld [vmem:[%s9972_s1 + $0x50] sm:$0xff]  }
   0x2   :  { %v7004_v1 = vld [vmem:[%s9972_s1 + $0xc0] sm:$0xff]   ;;  %6846 = vmatprep.subr.bf16.mxu0 %v7003_v0  ;;  %v7008_v5 = vld [vmem:[%s9972_s1 + $0xc8] sm:$0xff]   ;;  %v7012_v9 = vld [vmem:[%s9972_s1 + $0xd0] sm:$0xff]  }
   0x3   :  { %v7005_v2 = vld [vmem:[%s9972_s1] sm:$0xff]   ;;  %6874 = vmatprep.subr.bf16.mxu1 %v7004_v1  ;;  %v7009_v6 = vld [vmem:[%s9972_s1 + $0x8] sm:$0xff]   ;;  %v7013_v10 = vld [vmem:[%s9972_s1 + $0x10] sm:$0xff]  }
   0x4   :  { %v7006_v3 = vld [vmem:[%s9972_s1 + $0x80] sm:$0xff]   ;;  %6847 = vmatpush3.bf16.msra.mxu0 %v7005_v2  ;;  %v7010_v7 = vld [vmem:[%s9972_s1 + $0x88] sm:$0xff]   ;;  %v7014_v11 = vld [vmem:[%s9972_s1 + $0x90] sm:$0xff]  }
   0x5   :  { %6875 = vmatpush3.bf16.msra.mxu1 %v7006_v3  ;;  %6848 = vmatprep.subr.bf16.mxu0 %v7007_v4  ;;  %v7015_v12 = vld [vmem:[%s9972_s1 + $0x58] sm:$0xff]   ;;  %v7019_v16 = vld [vmem:[%s9972_s1 + $0x60] sm:$0xff]   ;;  %v7023_v20 = vld [vmem:[%s9972_s1 + $0x68] sm:$0xff]  }
   0x6   :  { %6876 = vmatprep.subr.bf16.mxu1 %v7008_v5  ;;  %v7016_v13 = vld [vmem:[%s9972_s1 + $0xd8] sm:$0xff]   ;;  %v7020_v17 = vld [vmem:[%s9972_s1 + $0xe0] sm:$0xff]   ;;  %v7024_v21 = vld [vmem:[%s9972_s1 + $0xe8] sm:$0xff]  }
   0x7   :  { %v7017_v14 = vld [vmem:[%s9972_s1 + $0x18] sm:$0xff]   ;;  %v7021_v18 = vld [vmem:[%s9972_s1 + $0x20] sm:$0xff]   ;;  %v7025_v22 = vld [vmem:[%s9972_s1 + $0x28] sm:$0xff]  }
   0x8   :  { %6849 = vmatpush3.bf16.msra.mxu0 %v7009_v6  ;;  %v7018_v15 = vld [vmem:[%s9972_s1 + $0x98] sm:$0xff]   ;;  %v7022_v19 = vld [vmem:[%s9972_s1 + $0xa0] sm:$0xff]   ;;  %v7026_v23 = vld [vmem:[%s9972_s1 + $0xa8] sm:$0xff]  }
   0x9   :  { %6877 = vmatpush3.bf16.msra.mxu1 %v7010_v7  ;;  %6850 = vmatprep.subr.bf16.mxu0 %v7011_v8  ;;  %v7027_v24 = vld [vmem:[%s9972_s1 + $0x70] sm:$0xff]   ;;  %v7031_v28 = vld [vmem:[%s9972_s1 + $0x78] sm:$0xff]   ;;  %v24_v32 = vld [vmem:[%s9973_s0] sm:$0xff] }
   0xa   :  { %6878 = vmatprep.subr.bf16.mxu1 %v7012_v9  ;;  %v7028_v25 = vld [vmem:[%s9972_s1 + $0xf0] sm:$0xff]   ;;  %v7032_v29 = vld [vmem:[%s9972_s1 + $0xf8] sm:$0xff]   ;;  %v28_v33 = vld [vmem:[%s9973_s0 + $0x20] sm:$0xff] }
   0xb   :  { %v7029_v26 = vld [vmem:[%s9972_s1 + $0x30] sm:$0xff]   ;;  %v7033_v30 = vld [vmem:[%s9972_s1 + $0x38] sm:$0xff]   ;;  %v25_v34 = vld [vmem:[%s9973_s0 + $0x8] sm:$0xff]  ;;  %v5741_v35 = vcombine.low %v24_v32, %v28_v33  ;;  %v5742_v36 = vcombine.high %v24_v32, %v28_v33 }
   0xc   :  { %6851 = vmatpush3.bf16.msra.mxu0 %v7013_v10  ;;  %v7030_v27 = vld [vmem:[%s9972_s1 + $0xb0] sm:$0xff]   ;;  %v7034_v31 = vld [vmem:[%s9972_s1 + $0xb8] sm:$0xff]   ;;  %v29_v37 = vld [vmem:[%s9973_s0 + $0x28] sm:$0xff] }
   0xd   :  { %6879 = vmatpush3.bf16.msra.mxu1 %v7014_v11  ;;  %6852 = vmatprep.subr.bf16.mxu0 %v7015_v12  ;;  %v5743_v38 = vcombine.low %v25_v34, %v29_v37  ;;  %v5744_v39 = vcombine.high %v25_v34, %v29_v37  ;;  %v7035_v40 = vld [vmem:[%s9972_s1 + $0x140] sm:$0xff]   ;;  %v7039_v44 = vld [vmem:[%s9972_s1 + $0x148] sm:$0xff]   ;;  %v7043_v48 = vld [vmem:[%s9972_s1 + $0x150] sm:$0xff]  }
   0xe   :  { %6880 = vmatprep.subr.bf16.mxu1 %v7016_v13  ;;  %664 = vmatprep.mubr.bf16.mxu0 %v5742_v36  ;;  %v7036_v41 = vld [vmem:[%s9972_s1 + $0x1c0] sm:$0xff]   ;;  %v7040_v45 = vld [vmem:[%s9972_s1 + $0x1c8] sm:$0xff]   ;;  %v7044_v49 = vld [vmem:[%s9972_s1 + $0x1d0] sm:$0xff]  }
   0xf   :  { %713 = vmatprep.mubr.bf16.mxu1 %v5744_v39  ;;  %v7037_v42 = vld [vmem:[%s9972_s1 + $0x100] sm:$0xff]   ;;  %v7041_v46 = vld [vmem:[%s9972_s1 + $0x108] sm:$0xff]   ;;  %v7045_v50 = vld [vmem:[%s9972_s1 + $0x110] sm:$0xff]  }
  0x10   :  { %6853 = vmatpush3.bf16.msra.mxu0 %v7017_v14  ;;  %v7038_v43 = vld [vmem:[%s9972_s1 + $0x180] sm:$0xff]   ;;  %v7042_v47 = vld [vmem:[%s9972_s1 + $0x188] sm:$0xff]   ;;  %v7046_v51 = vld [vmem:[%s9972_s1 + $0x190] sm:$0xff]  }
  0x11   :  { %6881 = vmatpush3.bf16.msra.mxu1 %v7018_v15  ;;  %6854 = vmatprep.subr.bf16.mxu0 %v7019_v16  ;;  %v7047_v52 = vld [vmem:[%s9972_s1 + $0x158] sm:$0xff]   ;;  %v7051_v56 = vld [vmem:[%s9972_s1 + $0x160] sm:$0xff]   ;;  %v33_v63 = vld [vmem:[%s9973_s0 + $0x48] sm:$0xff] }
  0x12   :  { %6882 = vmatprep.subr.bf16.mxu1 %v7020_v17  ;;  %v7048_v53 = vld [vmem:[%s9972_s1 + $0x1d8] sm:$0xff]   ;;  %v7052_v57 = vld [vmem:[%s9972_s1 + $0x1e0] sm:$0xff]   ;;  %v37_v0 = vld [vmem:[%s9973_s0 + $0x68] sm:$0xff] }
  0x13   :  { %v7049_v54 = vld [vmem:[%s9972_s1 + $0x118] sm:$0xff]   ;;  %v7053_v58 = vld [vmem:[%s9972_s1 + $0x120] sm:$0xff]   ;;  %v5752_v2 = vcombine.high %v33_v63, %v37_v0  ;;  %v7055_v3 = vld [vmem:[%s9972_s1 + $0x168] sm:$0xff]   ;;  %v5751_v4 = vcombine.low %v33_v63, %v37_v0 }
  0x14   :  { %6855 = vmatpush3.bf16.msra.mxu0 %v7021_v18  ;;  %v7050_v55 = vld [vmem:[%s9972_s1 + $0x198] sm:$0xff]   ;;  %v7054_v59 = vld [vmem:[%s9972_s1 + $0x1a0] sm:$0xff]   ;;  %v7056_v5 = vld [vmem:[%s9972_s1 + $0x1e8] sm:$0xff]  }
  0x15   :  { %6883 = vmatpush3.bf16.msra.mxu1 %v7022_v19  ;;  %6856 = vmatprep.subr.bf16.mxu0 %v7023_v20  ;;  %v32_v60 = vld [vmem:[%s9973_s0 + $0x40] sm:$0xff]  ;;  %v7057_v6 = vld [vmem:[%s9972_s1 + $0x128] sm:$0xff]   ;;  %v7059_v8 = vld [vmem:[%s9972_s1 + $0x170] sm:$0xff]  }
  0x16   :  { %6884 = vmatprep.subr.bf16.mxu1 %v7024_v21  ;;  %v36_v61 = vld [vmem:[%s9973_s0 + $0x60] sm:$0xff]  ;;  %v7058_v7 = vld [vmem:[%s9972_s1 + $0x1a8] sm:$0xff]   ;;  %v7060_v9 = vld [vmem:[%s9972_s1 + $0x1f0] sm:$0xff]  }
  0x17   :  { %v5750_v62 = vcombine.high %v32_v60, %v36_v61  ;;  %v5749_v1 = vcombine.low %v32_v60, %v36_v61  ;;  %v7061_v10 = vld [vmem:[%s9972_s1 + $0x130] sm:$0xff]   ;;  %v7063_v12 = vld [vmem:[%s9972_s1 + $0x178] sm:$0xff]  }
  0x18   :  { %6857 = vmatpush3.bf16.msra.mxu0 %v7025_v22  ;;  %v7062_v11 = vld [vmem:[%s9972_s1 + $0x1b0] sm:$0xff]   ;;  %v7064_v13 = vld [vmem:[%s9972_s1 + $0x1f8] sm:$0xff]  }
  0x19   :  { %6885 = vmatpush3.bf16.msra.mxu1 %v7026_v23  ;;  %6858 = vmatprep.subr.bf16.mxu0 %v7027_v24  ;;  %v7065_v14 = vld [vmem:[%s9972_s1 + $0x138] sm:$0xff]   ;;  %v26_v16 = vld [vmem:[%s9973_s0 + $0x10] sm:$0xff] }
  0x1a   :  { %6886 = vmatprep.subr.bf16.mxu1 %v7028_v25  ;;  %v7066_v15 = vld [vmem:[%s9972_s1 + $0x1b8] sm:$0xff]   ;;  %v30_v17 = vld [vmem:[%s9973_s0 + $0x30] sm:$0xff] }
  0x1b   :  { %v27_v18 = vld [vmem:[%s9973_s0 + $0x18] sm:$0xff]  ;;  %v5745_v20 = vcombine.low %v26_v16, %v30_v17  ;;  %v5746_v21 = vcombine.high %v26_v16, %v30_v17  ;;  %v34_v24 = vld [vmem:[%s9973_s0 + $0x50] sm:$0xff] }
  0x1c   :  { %6859 = vmatpush3.bf16.msra.mxu0 %v7029_v26  ;;  %v31_v19 = vld [vmem:[%s9973_s0 + $0x38] sm:$0xff]  ;;  %v38_v25 = vld [vmem:[%s9973_s0 + $0x70] sm:$0xff] }
  0x1d   :  { %6887 = vmatpush3.bf16.msra.mxu1 %v7030_v27  ;;  %6860 = vmatprep.subr.bf16.mxu0 %v7031_v28  ;;  %v5747_v22 = vcombine.low %v27_v18, %v31_v19  ;;  %v5748_v23 = vcombine.high %v27_v18, %v31_v19  ;;  %v35_v26 = vld [vmem:[%s9973_s0 + $0x58] sm:$0xff]  ;;  %v5754_v27 = vcombine.high %v34_v24, %v38_v25  ;;  %v7069_v32 = vld [vmem:[%s9974_s2 + $0x104] ss:$16 sps:$4 sm:$0xff]   ;;  %v7067_v33 = vld [vmem:[%s9974_s2 + $0x100] ss:$16 sps:$4 sm:$0xff]  }
  0x1e   :  { %6888 = vmatprep.subr.bf16.mxu1 %v7032_v29  ;;  %v39_v28 = vld [vmem:[%s9973_s0 + $0x78] sm:$0xff]  ;;  %v7075_v36 = vld [vmem:[%s9974_s2 + $0x124] ss:$16 sps:$4 sm:$0xff]  }
  0x1f   :  { %v5756_v29 = vcombine.high %v35_v26, %v39_v28  ;;  %v7070_v34 = vld [vmem:[%s9974_s2 + $0x108] ss:$16 sps:$4 sm:$0xff]   ;;  %v7078_v37 = vld [vmem:[%s9974_s2 + $0x12c] ss:$16 sps:$4 sm:$0xff]   ;;  %v7111_v60 = vld [vmem:[%s9974_s2 + $0x1e4] ss:$16 sps:$4 sm:$0xff]  }
  0x20   :  { %6861 = vmatpush3.bf16.msra.mxu0 %v7033_v30  ;;  %v5753_v30 = vcombine.low %v34_v24, %v38_v25  ;;  %v7076_v39 = vld [vmem:[%s9974_s2 + $0x128] ss:$16 sps:$4 sm:$0xff]   ;;  %v7114_v61 = vld [vmem:[%s9974_s2 + $0x1ec] ss:$16 sps:$4 sm:$0xff]   ;;  %v7117_v0 = vld [vmem:[%s9974_s2 + $0x4] ss:$16 sps:$4 sm:$0xff]  }
  0x21   :  { %6889 = vmatpush3.bf16.msra.mxu1 %v7034_v31  ;;  %6902 = vmatprep.subr.bf16.mxu0 %v7035_v40  ;;  %v5755_v31 = vcombine.low %v35_v26, %v39_v28  ;;  %v7081_v40 = vld [vmem:[%s9974_s2 + $0x144] ss:$16 sps:$4 sm:$0xff]   ;;  %v7112_v63 = vld [vmem:[%s9974_s2 + $0x1e8] ss:$16 sps:$4 sm:$0xff]  }
  0x22   :  { %6930 = vmatprep.subr.bf16.mxu1 %v7036_v41  ;;  %v7084_v41 = vld [vmem:[%s9974_s2 + $0x14c] ss:$16 sps:$4 sm:$0xff]  }
  0x23   :  { %665 = vmatmul.mubr.bf16.vlgmr.msra.gmra.mrb[0].mxu0 %v5741_v35  ;;  %v7072_v35 = vld [vmem:[%s9974_s2 + $0x10c] ss:$16 sps:$4 sm:$0xff]  }
  0x24   :  { %714 = vmatmul.mubr.bf16.vlgmr.msra.gmra.mrb[0].mxu1 %v5743_v38  ;;  %6903 = vmatpush3.bf16.msra.mxu0 %v7037_v42  ;;  %v7073_v38 = vld [vmem:[%s9974_s2 + $0x120] ss:$16 sps:$4 sm:$0xff]  }
  0x25   :  { %6931 = vmatpush3.bf16.msra.mxu1 %v7038_v43  ;;  %6904 = vmatprep.subr.bf16.mxu0 %v7039_v44  ;;  %v7079_v42 = vld [vmem:[%s9974_s2 + $0x140] ss:$16 sps:$4 sm:$0xff]   ;;  %v7082_v43 = vld [vmem:[%s9974_s2 + $0x148] ss:$16 sps:$4 sm:$0xff]   ;;  %v7087_v44 = vld [vmem:[%s9974_s2 + $0x164] ss:$16 sps:$4 sm:$0xff]  }
  0x26   :  { %6932 = vmatprep.subr.bf16.mxu1 %v7040_v45  ;;  %672 = vmatprep.mubr.bf16.mxu0 %v5750_v62  ;;  %v7090_v45 = vld [vmem:[%s9974_s2 + $0x16c] ss:$16 sps:$4 sm:$0xff]   ;;  %v7109_v62 = vld [vmem:[%s9974_s2 + $0x1e0] ss:$16 sps:$4 sm:$0xff]  }
  0x27   :  { %721 = vmatprep.mubr.bf16.mxu1 %v5752_v2  ;;  %v7899_v2 = vmov 0  }
  0x28   :  { %6905 = vmatpush3.bf16.msra.mxu0 %v7041_v46  ;;  %v7085_v46 = vld [vmem:[%s9974_s2 + $0x160] ss:$16 sps:$4 sm:$0xff]  }
  0x29   :  { %6933 = vmatpush3.bf16.msra.mxu1 %v7042_v47  ;;  %6906 = vmatprep.subr.bf16.mxu0 %v7043_v48  ;;  %v7088_v47 = vld [vmem:[%s9974_s2 + $0x168] ss:$16 sps:$4 sm:$0xff]   ;;  %v7093_v48 = vld [vmem:[%s9974_s2 + $0x184] ss:$16 sps:$4 sm:$0xff]  }
  0x2a   :  { %6934 = vmatprep.subr.bf16.mxu1 %v7044_v49  ;;  %v7096_v49 = vld [vmem:[%s9974_s2 + $0x18c] ss:$16 sps:$4 sm:$0xff]  }
  0x2b   :  { %673 = vmatmul.mubr.bf16.gmra.mrb[4].mxu0 %v5749_v1  ;;  %v7120_v1 = vld [vmem:[%s9974_s2 + $0xc] ss:$16 sps:$4 sm:$0xff]  }
  0x2c   :  { %6907 = vmatpush3.bf16.msra.mxu0 %v7045_v50  ;;  %722 = vmatmul.mubr.bf16.gmra.mrb[4].mxu1 %v5751_v4  ;;  %v7091_v50 = vld [vmem:[%s9974_s2 + $0x180] ss:$16 sps:$4 sm:$0xff]  }
  0x2d   :  { %6935 = vmatpush3.bf16.msra.mxu1 %v7046_v51  ;;  %6908 = vmatprep.subr.bf16.mxu0 %v7047_v52  ;;  %v7094_v51 = vld [vmem:[%s9974_s2 + $0x188] ss:$16 sps:$4 sm:$0xff]   ;;  %v7099_v52 = vld [vmem:[%s9974_s2 + $0x1a4] ss:$16 sps:$4 sm:$0xff]  }
  0x2e   :  { %6936 = vmatprep.subr.bf16.mxu1 %v7048_v53  ;;  %762 = vmatprep.mubr.bf16.mxu0 %v5746_v21  ;;  %v7102_v53 = vld [vmem:[%s9974_s2 + $0x1ac] ss:$16 sps:$4 sm:$0xff]  }
  0x2f   :  { %811 = vmatprep.mubr.bf16.mxu1 %v5748_v23 }
  0x30   :  { %6909 = vmatpush3.bf16.msra.mxu0 %v7049_v54  ;;  %v7097_v54 = vld [vmem:[%s9974_s2 + $0x1a0] ss:$16 sps:$4 sm:$0xff]  }
  0x31   :  { %6937 = vmatpush3.bf16.msra.mxu1 %v7050_v55  ;;  %6910 = vmatprep.subr.bf16.mxu0 %v7051_v56  ;;  %v7100_v55 = vld [vmem:[%s9974_s2 + $0x1a8] ss:$16 sps:$4 sm:$0xff]   ;;  %v7105_v56 = vld [vmem:[%s9974_s2 + $0x1c4] ss:$16 sps:$4 sm:$0xff]  }
  0x32   :  { %6938 = vmatprep.subr.bf16.mxu1 %v7052_v57  ;;  %v7108_v57 = vld [vmem:[%s9974_s2 + $0x1cc] ss:$16 sps:$4 sm:$0xff]  }
  0x34   :  { %6911 = vmatpush3.bf16.msra.mxu0 %v7053_v58  ;;  %v7103_v58 = vld [vmem:[%s9974_s2 + $0x1c0] ss:$16 sps:$4 sm:$0xff]  }
  0x35   :  { %6939 = vmatpush3.bf16.msra.mxu1 %v7054_v59  ;;  %6912 = vmatprep.subr.bf16.mxu0 %v7055_v3  ;;  %v7106_v59 = vld [vmem:[%s9974_s2 + $0x1c8] ss:$16 sps:$4 sm:$0xff]  }
  0x36   :  { %6940 = vmatprep.subr.bf16.mxu1 %v7056_v5 }
  0x38   :  { %6913 = vmatpush3.bf16.msra.mxu0 %v7057_v6 }
  0x39   :  { %6941 = vmatpush3.bf16.msra.mxu1 %v7058_v7  ;;  %6914 = vmatprep.subr.bf16.mxu0 %v7059_v8 }
  0x3a   :  { %6942 = vmatprep.subr.bf16.mxu1 %v7060_v9 }
  0x3c   :  { %6915 = vmatpush3.bf16.msra.mxu0 %v7061_v10 }
  0x3d   :  { %6943 = vmatpush3.bf16.msra.mxu1 %v7062_v11  ;;  %6916 = vmatprep.subr.bf16.mxu0 %v7063_v12 }
  0x3e   :  { %6944 = vmatprep.subr.bf16.mxu1 %v7064_v13 }
  0x40   :  { %6917 = vmatpush3.bf16.msra.mxu0 %v7065_v14 }
  0x41   :  { %6945 = vmatpush3.bf16.msra.mxu1 %v7066_v15  ;;  %1082 = vmatprep.subr.bf16.mxu0 %v7069_v32 }
  0x42   :  { %1123 = vmatprep.subr.bf16.mxu1 %v7072_v35 }
  0x43   :  { %763 = vmatmul.mubr.bf16.vlgmr.msra.gmra.mrb[8].mxu0 %v5745_v20 }
  0x44   :  { %812 = vmatmul.mubr.bf16.vlgmr.msra.gmra.mrb[8].mxu1 %v5747_v22  ;;  %770 = vmatprep.mubr.bf16.mxu0 %v5754_v27 }
  0x45   :  { %819 = vmatprep.mubr.bf16.mxu1 %v5756_v29  ;;  %1083 = vmatpush1.bf16.msra.mxu0 %v7067_v33 }
  0x46   :  { %1124 = vmatpush1.bf16.msra.mxu1 %v7070_v34  ;;  %1084 = vmatprep.subr.bf16.mxu0 %v7075_v36 }
  0x47   :  { %1125 = vmatprep.subr.bf16.mxu1 %v7078_v37 }
  0x49   :  { %1085 = vmatpush1.bf16.msra.mxu0 %v7073_v38 }
  0x4a   :  { %1126 = vmatpush1.bf16.msra.mxu1 %v7076_v39  ;;  %1086 = vmatprep.subr.bf16.mxu0 %v7081_v40 }
  0x4b   :  { %771 = vmatmul.mubr.bf16.gmra.mrb[12].mxu0 %v5753_v30  ;;  %1127 = vmatprep.subr.bf16.mxu1 %v7084_v41 }
  0x4c   :  { %820 = vmatmul.mubr.bf16.gmra.mrb[12].mxu1 %v5755_v31  ;;  %1114 = vmatprep.mubr.bf16.mxu0 %v7899_v2 }
  0x4d   :  { %1087 = vmatpush1.bf16.msra.mxu0 %v7079_v42  ;;  %1155 = vmatprep.mubr.bf16.mxu1 %v7899_v2 }
  0x4e   :  { %1128 = vmatpush1.bf16.msra.mxu1 %v7082_v43  ;;  %1088 = vmatprep.subr.bf16.mxu0 %v7087_v44 }
  0x4f   :  { %1129 = vmatprep.subr.bf16.mxu1 %v7090_v45 }
  0x51   :  { %1089 = vmatpush1.bf16.msra.mxu0 %v7085_v46 }
  0x52   :  { %1130 = vmatpush1.bf16.msra.mxu1 %v7088_v47  ;;  %1090 = vmatprep.subr.bf16.mxu0 %v7093_v48 }
  0x53   :  { %1131 = vmatprep.subr.bf16.mxu1 %v7096_v49 }
  0x55   :  { %1091 = vmatpush1.bf16.msra.mxu0 %v7091_v50 }
  0x56   :  { %1132 = vmatpush1.bf16.msra.mxu1 %v7094_v51  ;;  %1092 = vmatprep.subr.bf16.mxu0 %v7099_v52 }
  0x57   :  { %1133 = vmatprep.subr.bf16.mxu1 %v7102_v53 }
  0x59   :  { %1093 = vmatpush1.bf16.msra.mxu0 %v7097_v54 }
  0x5a   :  { %1134 = vmatpush1.bf16.msra.mxu1 %v7100_v55  ;;  %1094 = vmatprep.subr.bf16.mxu0 %v7105_v56 }
  0x5b   :  { %1135 = vmatprep.subr.bf16.mxu1 %v7108_v57 }
  0x5d   :  { %1095 = vmatpush1.bf16.msra.mxu0 %v7103_v58 }
  0x5e   :  { %1136 = vmatpush1.bf16.msra.mxu1 %v7106_v59  ;;  %1096 = vmatprep.subr.bf16.mxu0 %v7111_v60 }
  0x5f   :  { %1137 = vmatprep.subr.bf16.mxu1 %v7114_v61 }
  0x61   :  { %1097 = vmatpush1.bf16.msra.mxu0 %v7109_v62 }
  0x62   :  { %1138 = vmatpush1.bf16.msra.mxu1 %v7112_v63  ;;  %1324 = vmatprep.subr.bf16.mxu0 %v7117_v0 }
  0x63   :  { %1365 = vmatprep.subr.bf16.mxu1 %v7120_v1 }
  0xf6   :  { %v6862_v3 = vpop.f32.mrb[0].mxu0 }
  0xf7   :  { %v6890_v4 = vpop.f32.mrb[0].mxu1  ;;  %v6863_v5 = vpop.f32.mrb[1].mxu0 }
  0xf8   :  { %v6864_v6 = vadd.f32 %v6863_v5, %v6862_v3  ;;  %v6891_v7 = vpop.f32.mrb[1].mxu1  ;;  %v6865_v8 = vpop.f32.mrb[2].mxu0 }
  0xf9   :  { %v6892_v9 = vadd.f32 %v6891_v7, %v6890_v4  ;;  %v6893_v10 = vpop.f32.mrb[2].mxu1  ;;  %v6866_v11 = vpop.f32.mrb[3].mxu0 }
  0xfa   :  { %v6867_v12 = vadd.f32 %v6866_v11, %v6865_v8  ;;  %v6894_v13 = vpop.f32.mrb[3].mxu1 }
  0xfb   :  { %v716_v14 = vadd.f32 %v6892_v9, %v6864_v6  ;;  %v6895_v15 = vadd.f32 %v6894_v13, %v6893_v10 }
  0xfd   :  { %v719_v16 = vadd.f32 %v6895_v15, %v6867_v12 }
  0xfe   :  { %v6868_v17 = vpop.f32.mrb[4].mxu0 }
  0xff   :  { %v6896_v18 = vpop.f32.mrb[4].mxu1  ;;  %v6869_v19 = vpop.f32.mrb[5].mxu0 }
 0x100   :  { %v6870_v20 = vadd.f32 %v6869_v19, %v6868_v17  ;;  %v6897_v21 = vpop.f32.mrb[5].mxu1  ;;  %v6871_v22 = vpop.f32.mrb[6].mxu0 }
 0x101   :  { %v6898_v23 = vadd.f32 %v6897_v21, %v6896_v18  ;;  %v6899_v24 = vpop.f32.mrb[6].mxu1  ;;  %v6872_v25 = vpop.f32.mrb[7].mxu0  ;;  %v7118_v21 = vld [vmem:[%s9974_s2 + $0x8] ss:$16 sps:$4 sm:$0xff]  }
 0x102   :  { %v6873_v26 = vadd.f32 %v6872_v25, %v6871_v22  ;;  %v6900_v27 = vpop.f32.mrb[7].mxu1  ;;  %v7126_v25 = vld [vmem:[%s9974_s2 + $0x2c] ss:$16 sps:$4 sm:$0xff]  }
 0x103   :  { %v724_v28 = vadd.f32 %v6898_v23, %v6870_v20  ;;  %v6901_v29 = vadd.f32 %v6900_v27, %v6899_v24  ;;  %v7115_v20 = vld [vmem:[%s9974_s2] ss:$16 sps:$4 sm:$0xff]   ;;  %v7123_v24 = vld [vmem:[%s9974_s2 + $0x24] ss:$16 sps:$4 sm:$0xff]  }
 0x105   :  { %v727_v30 = vadd.f32 %v6901_v29, %v6873_v26  ;;  %v7124_v29 = vld [vmem:[%s9974_s2 + $0x28] ss:$16 sps:$4 sm:$0xff]  }
 0x116   :  { %v6918_v31 = vpop.f32.mrb[8].mxu0 }
 0x117   :  { %v6946_v32 = vpop.f32.mrb[8].mxu1  ;;  %v6919_v33 = vpop.f32.mrb[9].mxu0 }
 0x118   :  { %v6947_v34 = vpop.f32.mrb[9].mxu1  ;;  %v6920_v35 = vadd.f32 %v6919_v33, %v6918_v31  ;;  %v6921_v37 = vpop.f32.mrb[10].mxu0  ;;  %v7132_v33 = vld [vmem:[%s9974_s2 + $0x4c] ss:$16 sps:$4 sm:$0xff]  }
 0x119   :  { %v6948_v36 = vadd.f32 %v6947_v34, %v6946_v32  ;;  %v6949_v38 = vpop.f32.mrb[10].mxu1  ;;  %v6922_v39 = vpop.f32.mrb[11].mxu0  ;;  %v7129_v32 = vld [vmem:[%s9974_s2 + $0x44] ss:$16 sps:$4 sm:$0xff]  }
 0x11a   :  { %v6950_v40 = vpop.f32.mrb[11].mxu1  ;;  %v765_v41 = vadd.f32 %v6920_v35, %v716_v14  ;;  %v6923_v42 = vadd.f32 %v6922_v39, %v6921_v37  ;;  %v7127_v35 = vld [vmem:[%s9974_s2 + $0x40] ss:$16 sps:$4 sm:$0xff]   ;;  %v7135_v37 = vld [vmem:[%s9974_s2 + $0x64] ss:$16 sps:$4 sm:$0xff]  }
 0x11b   :  { %v6951_v43 = vadd.f32 %v6950_v40, %v6949_v38  ;;  %v7138_v38 = vld [vmem:[%s9974_s2 + $0x6c] ss:$16 sps:$4 sm:$0xff]   ;;  %v7133_v39 = vld [vmem:[%s9974_s2 + $0x60] ss:$16 sps:$4 sm:$0xff]   ;;  %v7136_v40 = vld [vmem:[%s9974_s2 + $0x68] ss:$16 sps:$4 sm:$0xff]  }
 0x11c   :  { %v814_v44 = vadd.f32 %v6948_v36, %v765_v41  ;;  %v768_v45 = vadd.f32 %v6923_v42, %v719_v16  ;;  %v7130_v36 = vld [vmem:[%s9974_s2 + $0x48] ss:$16 sps:$4 sm:$0xff]   ;;  %v7141_v41 = vld [vmem:[%s9974_s2 + $0x84] ss:$16 sps:$4 sm:$0xff]   ;;  %v7144_v42 = vld [vmem:[%s9974_s2 + $0x8c] ss:$16 sps:$4 sm:$0xff]  }
 0x11e   :  { %v828_v46 = vsub.f32 0.0, %v814_v44  ;;  %v817_v47 = vadd.f32 %v6951_v43, %v768_v45  ;;  %v6924_v48 = vpop.f32.mrb[12].mxu0  ;;  %v7139_v43 = vld [vmem:[%s9974_s2 + $0x80] ss:$16 sps:$4 sm:$0xff]   ;;  %v7147_v45 = vld [vmem:[%s9974_s2 + $0xa4] ss:$16 sps:$4 sm:$0xff]  }
 0x11f   :  { %v6952_v49 = vpop.f32.mrb[12].mxu1  ;;  %v6925_v50 = vpop.f32.mrb[13].mxu0 }
 0x120   :  { %v6953_v51 = vpop.f32.mrb[13].mxu1  ;;  %v832_v52 = vmul.f32 1.442695, %v828_v46  ;;  %v829_v53 = vsub.f32 0.0, %v817_v47  ;;  %v6926_v54 = vadd.f32 %v6925_v50, %v6924_v48  ;;  %v6927_v55 = vpop.f32.mrb[14].mxu0 }
 0x121   :  { %v6954_v56 = vadd.f32 %v6953_v51, %v6952_v49  ;;  %v6955_v57 = vpop.f32.mrb[14].mxu1  ;;  %v6928_v58 = vpop.f32.mrb[15].mxu0  ;;  %v7150_v46 = vld [vmem:[%s9974_s2 + $0xac] ss:$16 sps:$4 sm:$0xff]   ;;  %v7148_v48 = vld [vmem:[%s9974_s2 + $0xa8] ss:$16 sps:$4 sm:$0xff]  }
 0x122   :  { %v6956_v59 = vpop.f32.mrb[15].mxu1  ;;  %7867 = vpow2.f32 %v832_v52  ;;  %v834_v60 = vmul.f32 1.442695, %v829_v53  ;;  %v773_v61 = vadd.f32 %v6926_v54, %v724_v28  ;;  %v6929_v62 = vadd.f32 %v6928_v58, %v6927_v55  ;;  %v7121_v28 = vld [vmem:[%s9974_s2 + $0x20] ss:$16 sps:$4 sm:$0xff]  }
 0x123   :  { %v6957_v63 = vadd.f32 %v6956_v59, %v6955_v57  ;;  %v7153_v49 = vld [vmem:[%s9974_s2 + $0xc4] ss:$16 sps:$4 sm:$0xff]   ;;  %v7156_v50 = vld [vmem:[%s9974_s2 + $0xcc] ss:$16 sps:$4 sm:$0xff]   ;;  %v7151_v51 = vld [vmem:[%s9974_s2 + $0xc0] ss:$16 sps:$4 sm:$0xff]  }
 0x124   :  { %7869 = vpow2.f32 %v834_v60  ;;  %v776_v0 = vadd.f32 %v6929_v62, %v727_v30  ;;  %v822_v1 = vadd.f32 %v6954_v56, %v773_v61  ;;  %v7154_v52 = vld [vmem:[%s9974_s2 + $0xc8] ss:$16 sps:$4 sm:$0xff]   ;;  %v7159_v53 = vld [vmem:[%s9974_s2 + $0xe4] ss:$16 sps:$4 sm:$0xff]   ;;  %v7162_v54 = vld [vmem:[%s9974_s2 + $0xec] ss:$16 sps:$4 sm:$0xff]  }
 0x125   :  { %v7157_v55 = vld [vmem:[%s9974_s2 + $0xe0] ss:$16 sps:$4 sm:$0xff]   ;;  %v7160_v56 = vld [vmem:[%s9974_s2 + $0xe8] ss:$16 sps:$4 sm:$0xff]   ;;  %v7165_v57 = vld [vmem:[%s9974_s2 + $0x204] ss:$16 sps:$4 sm:$0xff]  }
 0x126   :  { %v830_v3 = vsub.f32 0.0, %v822_v1  ;;  %v825_v4 = vadd.f32 %v6957_v63, %v776_v0  ;;  %v7168_v58 = vld [vmem:[%s9974_s2 + $0x20c] ss:$16 sps:$4 sm:$0xff]   ;;  %v7163_v59 = vld [vmem:[%s9974_s2 + $0x200] ss:$16 sps:$4 sm:$0xff]  }
 0x127   :  { %v7166_v60 = vld [vmem:[%s9974_s2 + $0x208] ss:$16 sps:$4 sm:$0xff]   ;;  %v7171_v61 = vld [vmem:[%s9974_s2 + $0x224] ss:$16 sps:$4 sm:$0xff]   ;;  %v7174_v62 = vld [vmem:[%s9974_s2 + $0x22c] ss:$16 sps:$4 sm:$0xff]  }
 0x128   :  { %v836_v5 = vmul.f32 1.442695, %v830_v3  ;;  %v831_v6 = vsub.f32 0.0, %v825_v4  ;;  %v7169_v63 = vld [vmem:[%s9974_s2 + $0x220] ss:$16 sps:$4 sm:$0xff]  }
 0x129   :  { %v7172_v0 = vld [vmem:[%s9974_s2 + $0x228] ss:$16 sps:$4 sm:$0xff]   ;;  %v7180_v3 = vld [vmem:[%s9974_s2 + $0x24c] ss:$16 sps:$4 sm:$0xff]  }
 0x12a   :  { %7871 = vpow2.f32 %v836_v5  ;;  %v838_v7 = vmul.f32 1.442695, %v831_v6  ;;  %v7178_v5 = vld [vmem:[%s9974_s2 + $0x248] ss:$16 sps:$4 sm:$0xff]   ;;  %v7183_v6 = vld [vmem:[%s9974_s2 + $0x264] ss:$16 sps:$4 sm:$0xff]  }
 0x12c   :  { %v7868_v8 = vpop.eup %7867  ;;  %7873 = vpow2.f32 %v838_v7  ;;  %v7186_v7 = vld [vmem:[%s9974_s2 + $0x26c] ss:$16 sps:$4 sm:$0xff]  }
 0x12d   :  { %v840_v9 = vadd.f32 1.0, %v7868_v8  ;;  %v7181_v8 = vld [vmem:[%s9974_s2 + $0x260] ss:$16 sps:$4 sm:$0xff]  }
 0x12e   :  { %v7870_v10 = vpop.eup %7869 }
 0x12f   :  { %7875 = vrcp.f32 %v840_v9  ;;  %v841_v11 = vadd.f32 1.0, %v7870_v10  ;;  %v7184_v9 = vld [vmem:[%s9974_s2 + $0x268] ss:$16 sps:$4 sm:$0xff]   ;;  %v7189_v10 = vld [vmem:[%s9974_s2 + $0x284] ss:$16 sps:$4 sm:$0xff]  }
 0x131   :  { %7877 = vrcp.f32 %v841_v11  ;;  %v7192_v11 = vld [vmem:[%s9974_s2 + $0x28c] ss:$16 sps:$4 sm:$0xff]  }
 0x134   :  { %v7872_v12 = vpop.eup %7871 }
 0x135   :  { %v842_v13 = vadd.f32 1.0, %v7872_v12  ;;  %v7187_v12 = vld [vmem:[%s9974_s2 + $0x280] ss:$16 sps:$4 sm:$0xff]  }
 0x136   :  { %v7874_v14 = vpop.eup %7873 }
 0x137   :  { %7879 = vrcp.f32 %v842_v13  ;;  %v843_v15 = vadd.f32 1.0, %v7874_v14  ;;  %v7190_v13 = vld [vmem:[%s9974_s2 + $0x288] ss:$16 sps:$4 sm:$0xff]   ;;  %v7195_v14 = vld [vmem:[%s9974_s2 + $0x2a4] ss:$16 sps:$4 sm:$0xff]  }
 0x139   :  { %v7876_v16 = vpop.eup %7875  ;;  %7881 = vrcp.f32 %v843_v15  ;;  %v7198_v15 = vld [vmem:[%s9974_s2 + $0x2ac] ss:$16 sps:$4 sm:$0xff]  }
 0x13a   :  { %v848_v18 = vmul.f32 %v7876_v16, %v814_v44  ;;  %v7142_v44 = vld [vmem:[%s9974_s2 + $0x88] ss:$16 sps:$4 sm:$0xff]   ;;  %v7193_v16 = vld [vmem:[%s9974_s2 + $0x2a0] ss:$16 sps:$4 sm:$0xff]  }
 0x13b   :  { %v7878_v17 = vpop.eup %7877 }
 0x13c   :  { %v849_v19 = vmul.f32 %v7878_v17, %v817_v47  ;;  %v7145_v47 = vld [vmem:[%s9974_s2 + $0xa0] ss:$16 sps:$4 sm:$0xff]   ;;  %v7196_v17 = vld [vmem:[%s9974_s2 + $0x2a8] ss:$16 sps:$4 sm:$0xff]  }
 0x13e   :  { %v8285_v22 = vpack.c.bf16 %v849_v19, %v848_v18  ;;  %v7201_v18 = vld [vmem:[%s9974_s2 + $0x2c4] ss:$16 sps:$4 sm:$0xff]   ;;  %v7204_v19 = vld [vmem:[%s9974_s2 + $0x2cc] ss:$16 sps:$4 sm:$0xff]  }
 0x140   :  { %v920_v23 = vrot.slane %v8285_v22, 1 }
 0x141   :  { %v7880_v26 = vpop.eup %7879 }
 0x142   :  { %1115 = vmatmul.mubr.bf16.vlgmr.msra.gmra.mrb[16].mxu0 %v920_v23  ;;  %1156 = vmatmul.mubr.bf16.vlgmr.msra.gmra.mrb[16].mxu1 %v920_v23  ;;  %v850_v30 = vmul.f32 %v7880_v26, %v822_v1  ;;  %v7177_v1 = vld [vmem:[%s9974_s2 + $0x244] ss:$16 sps:$4 sm:$0xff]   ;;  %v7208_v26 = vld [vmem:[%s9974_s2 + $0x2e8] ss:$16 sps:$4 sm:$0xff]  }
 0x143   :  { %v7882_v27 = vpop.eup %7881  ;;  %1325 = vmatpush1.bf16.msra.mxu0 %v7115_v20  ;;  %1366 = vmatpush1.bf16.msra.mxu1 %v7118_v21  ;;  %v7199_v20 = vld [vmem:[%s9974_s2 + $0x2c0] ss:$16 sps:$4 sm:$0xff]   ;;  %v7202_v21 = vld [vmem:[%s9974_s2 + $0x2c8] ss:$16 sps:$4 sm:$0xff]   ;;  %v7207_v23 = vld [vmem:[%s9974_s2 + $0x2e4] ss:$16 sps:$4 sm:$0xff]  }
 0x144   :  { %v851_v31 = vmul.f32 %v7882_v27, %v825_v4  ;;  %1326 = vmatprep.subr.bf16.mxu0 %v7123_v24  ;;  %1367 = vmatprep.subr.bf16.mxu1 %v7126_v25  ;;  %v7175_v4 = vld [vmem:[%s9974_s2 + $0x240] ss:$16 sps:$4 sm:$0xff]   ;;  %v7210_v24 = vld [vmem:[%s9974_s2 + $0x2ec] ss:$16 sps:$4 sm:$0xff]   ;;  %v7213_v27 = vld [vmem:[%s9974_s2 + $0x304] ss:$16 sps:$4 sm:$0xff]  }
 0x145   :  { %1356 = vmatprep.mubr.bf16.mxu0 %v7899_v2  ;;  %1397 = vmatprep.mubr.bf16.mxu1 %v7899_v2  ;;  %v7205_v25 = vld [vmem:[%s9974_s2 + $0x2e0] ss:$16 sps:$4 sm:$0xff]  }
 0x146   :  { %v8308_v34 = vpack.c.bf16 %v851_v31, %v850_v30  ;;  %v7214_v30 = vld [vmem:[%s9974_s2 + $0x308] ss:$16 sps:$4 sm:$0xff]   ;;  %v7219_v31 = vld [vmem:[%s9974_s2 + $0x324] ss:$16 sps:$4 sm:$0xff]  }
 0x147   :  { %1327 = vmatpush1.bf16.msra.mxu0 %v7121_v28  ;;  %1368 = vmatpush1.bf16.msra.mxu1 %v7124_v29  ;;  %v7216_v28 = vld [vmem:[%s9974_s2 + $0x30c] ss:$16 sps:$4 sm:$0xff]   ;;  %v7211_v29 = vld [vmem:[%s9974_s2 + $0x300] ss:$16 sps:$4 sm:$0xff]  }
 0x148   :  { %1328 = vmatprep.subr.bf16.mxu0 %v7129_v32  ;;  %1369 = vmatprep.subr.bf16.mxu1 %v7132_v33  ;;  %v7222_v32 = vld [vmem:[%s9974_s2 + $0x32c] ss:$16 sps:$4 sm:$0xff]   ;;  %v1439_v33 = vrot.slane %v8285_v22, 2 }
 0x14b   :  { %1329 = vmatpush1.bf16.msra.mxu0 %v7127_v35  ;;  %1370 = vmatpush1.bf16.msra.mxu1 %v7130_v36  ;;  %v7217_v35 = vld [vmem:[%s9974_s2 + $0x320] ss:$16 sps:$4 sm:$0xff]   ;;  %v7220_v36 = vld [vmem:[%s9974_s2 + $0x328] ss:$16 sps:$4 sm:$0xff]  }
 0x14c   :  { %1330 = vmatprep.subr.bf16.mxu0 %v7135_v37  ;;  %1371 = vmatprep.subr.bf16.mxu1 %v7138_v38  ;;  %v7225_v37 = vld [vmem:[%s9974_s2 + $0x344] ss:$16 sps:$4 sm:$0xff]   ;;  %v7228_v38 = vld [vmem:[%s9974_s2 + $0x34c] ss:$16 sps:$4 sm:$0xff]  }
 0x14f   :  { %1331 = vmatpush1.bf16.msra.mxu0 %v7133_v39  ;;  %1372 = vmatpush1.bf16.msra.mxu1 %v7136_v40  ;;  %v7223_v39 = vld [vmem:[%s9974_s2 + $0x340] ss:$16 sps:$4 sm:$0xff]   ;;  %v7226_v40 = vld [vmem:[%s9974_s2 + $0x348] ss:$16 sps:$4 sm:$0xff]  }
 0x150   :  { %1332 = vmatprep.subr.bf16.mxu0 %v7141_v41  ;;  %1373 = vmatprep.subr.bf16.mxu1 %v7144_v42  ;;  %v7231_v41 = vld [vmem:[%s9974_s2 + $0x364] ss:$16 sps:$4 sm:$0xff]   ;;  %v7234_v42 = vld [vmem:[%s9974_s2 + $0x36c] ss:$16 sps:$4 sm:$0xff]  }
 0x153   :  { %1333 = vmatpush1.bf16.msra.mxu0 %v7139_v43  ;;  %1374 = vmatpush1.bf16.msra.mxu1 %v7142_v44  ;;  %v7229_v43 = vld [vmem:[%s9974_s2 + $0x360] ss:$16 sps:$4 sm:$0xff]   ;;  %v7232_v44 = vld [vmem:[%s9974_s2 + $0x368] ss:$16 sps:$4 sm:$0xff]  }
 0x154   :  { %1334 = vmatprep.subr.bf16.mxu0 %v7147_v45  ;;  %1375 = vmatprep.subr.bf16.mxu1 %v7150_v46  ;;  %v7237_v45 = vld [vmem:[%s9974_s2 + $0x384] ss:$16 sps:$4 sm:$0xff]   ;;  %v7240_v46 = vld [vmem:[%s9974_s2 + $0x38c] ss:$16 sps:$4 sm:$0xff]  }
 0x157   :  { %1335 = vmatpush1.bf16.msra.mxu0 %v7145_v47  ;;  %1376 = vmatpush1.bf16.msra.mxu1 %v7148_v48  ;;  %v7235_v47 = vld [vmem:[%s9974_s2 + $0x380] ss:$16 sps:$4 sm:$0xff]   ;;  %v7238_v48 = vld [vmem:[%s9974_s2 + $0x388] ss:$16 sps:$4 sm:$0xff]  }
 0x158   :  { %1336 = vmatprep.subr.bf16.mxu0 %v7153_v49  ;;  %1377 = vmatprep.subr.bf16.mxu1 %v7156_v50  ;;  %v7243_v49 = vld [vmem:[%s9974_s2 + $0x3a4] ss:$16 sps:$4 sm:$0xff]   ;;  %v7246_v50 = vld [vmem:[%s9974_s2 + $0x3ac] ss:$16 sps:$4 sm:$0xff]  }
 0x15b   :  { %1337 = vmatpush1.bf16.msra.mxu0 %v7151_v51  ;;  %1378 = vmatpush1.bf16.msra.mxu1 %v7154_v52  ;;  %v7241_v51 = vld [vmem:[%s9974_s2 + $0x3a0] ss:$16 sps:$4 sm:$0xff]   ;;  %v7244_v52 = vld [vmem:[%s9974_s2 + $0x3a8] ss:$16 sps:$4 sm:$0xff]  }
 0x15c   :  { %1338 = vmatprep.subr.bf16.mxu0 %v7159_v53  ;;  %1379 = vmatprep.subr.bf16.mxu1 %v7162_v54  ;;  %v7249_v53 = vld [vmem:[%s9974_s2 + $0x3c4] ss:$16 sps:$4 sm:$0xff]   ;;  %v7252_v54 = vld [vmem:[%s9974_s2 + $0x3cc] ss:$16 sps:$4 sm:$0xff]  }
 0x15f   :  { %1339 = vmatpush1.bf16.msra.mxu0 %v7157_v55  ;;  %1380 = vmatpush1.bf16.msra.mxu1 %v7160_v56  ;;  %v7247_v55 = vld [vmem:[%s9974_s2 + $0x3c0] ss:$16 sps:$4 sm:$0xff]   ;;  %v7250_v56 = vld [vmem:[%s9974_s2 + $0x3c8] ss:$16 sps:$4 sm:$0xff]  }
 0x160   :  { %1601 = vmatprep.subr.bf16.mxu0 %v7165_v57  ;;  %1642 = vmatprep.subr.bf16.mxu1 %v7168_v58  ;;  %v7255_v57 = vld [vmem:[%s9974_s2 + $0x3e4] ss:$16 sps:$4 sm:$0xff]   ;;  %v7258_v58 = vld [vmem:[%s9974_s2 + $0x3ec] ss:$16 sps:$4 sm:$0xff]  }
 0x162   :  { %1357 = vmatmul.mubr.bf16.vlgmr.msra.gmra.mrb[20].mxu0 %v8285_v22  ;;  %1398 = vmatmul.mubr.bf16.vlgmr.msra.gmra.mrb[20].mxu1 %v8285_v22 }
 0x163   :  { %1602 = vmatpush1.bf16.msra.mxu0 %v7163_v59  ;;  %1643 = vmatpush1.bf16.msra.mxu1 %v7166_v60  ;;  %v7253_v59 = vld [vmem:[%s9974_s2 + $0x3e0] ss:$16 sps:$4 sm:$0xff]   ;;  %v7256_v60 = vld [vmem:[%s9974_s2 + $0x3e8] ss:$16 sps:$4 sm:$0xff]  }
 0x164   :  { %1603 = vmatprep.subr.bf16.mxu0 %v7171_v61  ;;  %1644 = vmatprep.subr.bf16.mxu1 %v7174_v62  ;;  %v7261_v61 = vld [vmem:[%s9974_s2 + $0x404] ss:$16 sps:$4 sm:$0xff]   ;;  %v7264_v62 = vld [vmem:[%s9974_s2 + $0x40c] ss:$16 sps:$4 sm:$0xff]  }
 0x165   :  { %1633 = vmatprep.mubr.bf16.mxu0 %v7899_v2  ;;  %1674 = vmatprep.mubr.bf16.mxu1 %v7899_v2 }
 0x167   :  { %1604 = vmatpush1.bf16.msra.mxu0 %v7169_v63  ;;  %1645 = vmatpush1.bf16.msra.mxu1 %v7172_v0  ;;  %v7259_v63 = vld [vmem:[%s9974_s2 + $0x400] ss:$16 sps:$4 sm:$0xff]   ;;  %v7262_v0 = vld [vmem:[%s9974_s2 + $0x408] ss:$16 sps:$4 sm:$0xff]  }
 0x168   :  { %1605 = vmatprep.subr.bf16.mxu0 %v7177_v1  ;;  %1646 = vmatprep.subr.bf16.mxu1 %v7180_v3  ;;  %v7267_v1 = vld [vmem:[%s9974_s2 + $0x424] ss:$16 sps:$4 sm:$0xff]   ;;  %v7270_v3 = vld [vmem:[%s9974_s2 + $0x42c] ss:$16 sps:$4 sm:$0xff]  }
 0x16b   :  { %1606 = vmatpush1.bf16.msra.mxu0 %v7175_v4  ;;  %1647 = vmatpush1.bf16.msra.mxu1 %v7178_v5  ;;  %v1720_v4 = vrot.slane %v8285_v22, 3  ;;  %v7265_v5 = vld [vmem:[%s9974_s2 + $0x420] ss:$16 sps:$4 sm:$0xff]  }
 0x16c   :  { %1607 = vmatprep.subr.bf16.mxu0 %v7183_v6  ;;  %1648 = vmatprep.subr.bf16.mxu1 %v7186_v7  ;;  %v7268_v6 = vld [vmem:[%s9974_s2 + $0x428] ss:$16 sps:$4 sm:$0xff]   ;;  %v7273_v7 = vld [vmem:[%s9974_s2 + $0x444] ss:$16 sps:$4 sm:$0xff]  }
 0x16f   :  { %1608 = vmatpush1.bf16.msra.mxu0 %v7181_v8  ;;  %1649 = vmatpush1.bf16.msra.mxu1 %v7184_v9  ;;  %v7276_v8 = vld [vmem:[%s9974_s2 + $0x44c] ss:$16 sps:$4 sm:$0xff]   ;;  %v7271_v9 = vld [vmem:[%s9974_s2 + $0x440] ss:$16 sps:$4 sm:$0xff]  }
 0x170   :  { %1609 = vmatprep.subr.bf16.mxu0 %v7189_v10  ;;  %1650 = vmatprep.subr.bf16.mxu1 %v7192_v11  ;;  %v7274_v10 = vld [vmem:[%s9974_s2 + $0x448] ss:$16 sps:$4 sm:$0xff]   ;;  %v7279_v11 = vld [vmem:[%s9974_s2 + $0x464] ss:$16 sps:$4 sm:$0xff]  }
 0x173   :  { %1610 = vmatpush1.bf16.msra.mxu0 %v7187_v12  ;;  %1651 = vmatpush1.bf16.msra.mxu1 %v7190_v13  ;;  %v7282_v12 = vld [vmem:[%s9974_s2 + $0x46c] ss:$16 sps:$4 sm:$0xff]   ;;  %v7277_v13 = vld [vmem:[%s9974_s2 + $0x460] ss:$16 sps:$4 sm:$0xff]  }
 0x174   :  { %1611 = vmatprep.subr.bf16.mxu0 %v7195_v14  ;;  %1652 = vmatprep.subr.bf16.mxu1 %v7198_v15  ;;  %v7280_v14 = vld [vmem:[%s9974_s2 + $0x468] ss:$16 sps:$4 sm:$0xff]   ;;  %v7285_v15 = vld [vmem:[%s9974_s2 + $0x484] ss:$16 sps:$4 sm:$0xff]  }
 0x177   :  { %1612 = vmatpush1.bf16.msra.mxu0 %v7193_v16  ;;  %1653 = vmatpush1.bf16.msra.mxu1 %v7196_v17  ;;  %v7288_v16 = vld [vmem:[%s9974_s2 + $0x48c] ss:$16 sps:$4 sm:$0xff]   ;;  %v7283_v17 = vld [vmem:[%s9974_s2 + $0x480] ss:$16 sps:$4 sm:$0xff]  }
 0x178   :  { %1613 = vmatprep.subr.bf16.mxu0 %v7201_v18  ;;  %1654 = vmatprep.subr.bf16.mxu1 %v7204_v19  ;;  %v7286_v18 = vld [vmem:[%s9974_s2 + $0x488] ss:$16 sps:$4 sm:$0xff]   ;;  %v7291_v19 = vld [vmem:[%s9974_s2 + $0x4a4] ss:$16 sps:$4 sm:$0xff]  }
 0x17b   :  { %1614 = vmatpush1.bf16.msra.mxu0 %v7199_v20  ;;  %1655 = vmatpush1.bf16.msra.mxu1 %v7202_v21  ;;  %v7294_v20 = vld [vmem:[%s9974_s2 + $0x4ac] ss:$16 sps:$4 sm:$0xff]   ;;  %v7289_v21 = vld [vmem:[%s9974_s2 + $0x4a0] ss:$16 sps:$4 sm:$0xff]  }
 0x17c   :  { %1615 = vmatprep.subr.bf16.mxu0 %v7207_v23  ;;  %1656 = vmatprep.subr.bf16.mxu1 %v7210_v24  ;;  %v7292_v23 = vld [vmem:[%s9974_s2 + $0x4a8] ss:$16 sps:$4 sm:$0xff]   ;;  %v7297_v24 = vld [vmem:[%s9974_s2 + $0x4c4] ss:$16 sps:$4 sm:$0xff]  }
 0x17f   :  { %1616 = vmatpush1.bf16.msra.mxu0 %v7205_v25  ;;  %1657 = vmatpush1.bf16.msra.mxu1 %v7208_v26  ;;  %v7300_v25 = vld [vmem:[%s9974_s2 + $0x4cc] ss:$16 sps:$4 sm:$0xff]   ;;  %v7295_v26 = vld [vmem:[%s9974_s2 + $0x4c0] ss:$16 sps:$4 sm:$0xff]  }
 0x180   :  { %1882 = vmatprep.subr.bf16.mxu0 %v7213_v27  ;;  %1923 = vmatprep.subr.bf16.mxu1 %v7216_v28  ;;  %v7298_v27 = vld [vmem:[%s9974_s2 + $0x4c8] ss:$16 sps:$4 sm:$0xff]   ;;  %v7303_v28 = vld [vmem:[%s9974_s2 + $0x4e4] ss:$16 sps:$4 sm:$0xff]  }
 0x182   :  { %1634 = vmatmul.mubr.bf16.vlgmr.msra.gmra.mrb[24].mxu0 %v1439_v33  ;;  %1675 = vmatmul.mubr.bf16.vlgmr.msra.gmra.mrb[24].mxu1 %v1439_v33  ;;  %v7312_v33 = vld [vmem:[%s9974_s2 + $0x50c] ss:$16 sps:$4 sm:$0xff]  }
 0x183   :  { %1883 = vmatpush1.bf16.msra.mxu0 %v7211_v29  ;;  %1924 = vmatpush1.bf16.msra.mxu1 %v7214_v30  ;;  %v7306_v29 = vld [vmem:[%s9974_s2 + $0x4ec] ss:$16 sps:$4 sm:$0xff]   ;;  %v7301_v30 = vld [vmem:[%s9974_s2 + $0x4e0] ss:$16 sps:$4 sm:$0xff]  }
 0x184   :  { %1884 = vmatprep.subr.bf16.mxu0 %v7219_v31  ;;  %1925 = vmatprep.subr.bf16.mxu1 %v7222_v32  ;;  %v7304_v31 = vld [vmem:[%s9974_s2 + $0x4e8] ss:$16 sps:$4 sm:$0xff]   ;;  %v7309_v32 = vld [vmem:[%s9974_s2 + $0x504] ss:$16 sps:$4 sm:$0xff]  }
 0x185   :  { %1914 = vmatprep.mubr.bf16.mxu0 %v7899_v2  ;;  %1955 = vmatprep.mubr.bf16.mxu1 %v7899_v2 }
 0x187   :  { %1885 = vmatpush1.bf16.msra.mxu0 %v7217_v35  ;;  %1926 = vmatpush1.bf16.msra.mxu1 %v7220_v36  ;;  %v7307_v35 = vld [vmem:[%s9974_s2 + $0x500] ss:$16 sps:$4 sm:$0xff]   ;;  %v7310_v36 = vld [vmem:[%s9974_s2 + $0x508] ss:$16 sps:$4 sm:$0xff]  }
 0x188   :  { %1886 = vmatprep.subr.bf16.mxu0 %v7225_v37  ;;  %1927 = vmatprep.subr.bf16.mxu1 %v7228_v38  ;;  %v2001_v37 = vrot.slane %v8285_v22, 4  ;;  %v7315_v38 = vld [vmem:[%s9974_s2 + $0x524] ss:$16 sps:$4 sm:$0xff]  }
 0x18b   :  { %1887 = vmatpush1.bf16.msra.mxu0 %v7223_v39  ;;  %1928 = vmatpush1.bf16.msra.mxu1 %v7226_v40  ;;  %v7318_v39 = vld [vmem:[%s9974_s2 + $0x52c] ss:$16 sps:$4 sm:$0xff]   ;;  %v7313_v40 = vld [vmem:[%s9974_s2 + $0x520] ss:$16 sps:$4 sm:$0xff]  }
 0x18c   :  { %1888 = vmatprep.subr.bf16.mxu0 %v7231_v41  ;;  %1929 = vmatprep.subr.bf16.mxu1 %v7234_v42  ;;  %v7316_v41 = vld [vmem:[%s9974_s2 + $0x528] ss:$16 sps:$4 sm:$0xff]   ;;  %v7321_v42 = vld [vmem:[%s9974_s2 + $0x544] ss:$16 sps:$4 sm:$0xff]  }
 0x18f   :  { %1889 = vmatpush1.bf16.msra.mxu0 %v7229_v43  ;;  %1930 = vmatpush1.bf16.msra.mxu1 %v7232_v44  ;;  %v7324_v43 = vld [vmem:[%s9974_s2 + $0x54c] ss:$16 sps:$4 sm:$0xff]   ;;  %v7319_v44 = vld [vmem:[%s9974_s2 + $0x540] ss:$16 sps:$4 sm:$0xff]  }
 0x190   :  { %1890 = vmatprep.subr.bf16.mxu0 %v7237_v45  ;;  %1931 = vmatprep.subr.bf16.mxu1 %v7240_v46  ;;  %v7322_v45 = vld [vmem:[%s9974_s2 + $0x548] ss:$16 sps:$4 sm:$0xff]   ;;  %v7327_v46 = vld [vmem:[%s9974_s2 + $0x564] ss:$16 sps:$4 sm:$0xff]  }
 0x193   :  { %1891 = vmatpush1.bf16.msra.mxu0 %v7235_v47  ;;  %1932 = vmatpush1.bf16.msra.mxu1 %v7238_v48  ;;  %v7330_v47 = vld [vmem:[%s9974_s2 + $0x56c] ss:$16 sps:$4 sm:$0xff]   ;;  %v7325_v48 = vld [vmem:[%s9974_s2 + $0x560] ss:$16 sps:$4 sm:$0xff]  }
 0x194   :  { %1892 = vmatprep.subr.bf16.mxu0 %v7243_v49  ;;  %1933 = vmatprep.subr.bf16.mxu1 %v7246_v50  ;;  %v7328_v49 = vld [vmem:[%s9974_s2 + $0x568] ss:$16 sps:$4 sm:$0xff]   ;;  %v7333_v50 = vld [vmem:[%s9974_s2 + $0x584] ss:$16 sps:$4 sm:$0xff]  }
 0x197   :  { %1893 = vmatpush1.bf16.msra.mxu0 %v7241_v51  ;;  %1934 = vmatpush1.bf16.msra.mxu1 %v7244_v52  ;;  %v7336_v51 = vld [vmem:[%s9974_s2 + $0x58c] ss:$16 sps:$4 sm:$0xff]   ;;  %v7331_v52 = vld [vmem:[%s9974_s2 + $0x580] ss:$16 sps:$4 sm:$0xff]  }
 0x198   :  { %1894 = vmatprep.subr.bf16.mxu0 %v7249_v53  ;;  %1935 = vmatprep.subr.bf16.mxu1 %v7252_v54  ;;  %v7334_v53 = vld [vmem:[%s9974_s2 + $0x588] ss:$16 sps:$4 sm:$0xff]   ;;  %v7339_v54 = vld [vmem:[%s9974_s2 + $0x5a4] ss:$16 sps:$4 sm:$0xff]  }
 0x19b   :  { %1895 = vmatpush1.bf16.msra.mxu0 %v7247_v55  ;;  %1936 = vmatpush1.bf16.msra.mxu1 %v7250_v56  ;;  %v7342_v55 = vld [vmem:[%s9974_s2 + $0x5ac] ss:$16 sps:$4 sm:$0xff]   ;;  %v7337_v56 = vld [vmem:[%s9974_s2 + $0x5a0] ss:$16 sps:$4 sm:$0xff]  }
 0x19c   :  { %1896 = vmatprep.subr.bf16.mxu0 %v7255_v57  ;;  %1937 = vmatprep.subr.bf16.mxu1 %v7258_v58  ;;  %v7340_v57 = vld [vmem:[%s9974_s2 + $0x5a8] ss:$16 sps:$4 sm:$0xff]   ;;  %v7345_v58 = vld [vmem:[%s9974_s2 + $0x5c4] ss:$16 sps:$4 sm:$0xff]  }
 0x19f   :  { %1897 = vmatpush1.bf16.msra.mxu0 %v7253_v59  ;;  %1938 = vmatpush1.bf16.msra.mxu1 %v7256_v60  ;;  %v7348_v59 = vld [vmem:[%s9974_s2 + $0x5cc] ss:$16 sps:$4 sm:$0xff]   ;;  %v7343_v60 = vld [vmem:[%s9974_s2 + $0x5c0] ss:$16 sps:$4 sm:$0xff]  }
 0x1a0   :  { %2163 = vmatprep.subr.bf16.mxu0 %v7261_v61  ;;  %2204 = vmatprep.subr.bf16.mxu1 %v7264_v62  ;;  %v7346_v61 = vld [vmem:[%s9974_s2 + $0x5c8] ss:$16 sps:$4 sm:$0xff]   ;;  %v7351_v62 = vld [vmem:[%s9974_s2 + $0x5e4] ss:$16 sps:$4 sm:$0xff]  }
 0x1a2   :  { %1915 = vmatmul.mubr.bf16.vlgmr.msra.gmra.mrb[28].mxu0 %v1720_v4  ;;  %1956 = vmatmul.mubr.bf16.vlgmr.msra.gmra.mrb[28].mxu1 %v1720_v4  ;;  %v7360_v4 = vld [vmem:[%s9974_s2 + $0x60c] ss:$16 sps:$4 sm:$0xff]  }
 0x1a3   :  { %2164 = vmatpush1.bf16.msra.mxu0 %v7259_v63  ;;  %2205 = vmatpush1.bf16.msra.mxu1 %v7262_v0  ;;  %v7354_v63 = vld [vmem:[%s9974_s2 + $0x5ec] ss:$16 sps:$4 sm:$0xff]   ;;  %v7349_v0 = vld [vmem:[%s9974_s2 + $0x5e0] ss:$16 sps:$4 sm:$0xff]  }
 0x1a4   :  { %2165 = vmatprep.subr.bf16.mxu0 %v7267_v1  ;;  %2206 = vmatprep.subr.bf16.mxu1 %v7270_v3  ;;  %v7352_v1 = vld [vmem:[%s9974_s2 + $0x5e8] ss:$16 sps:$4 sm:$0xff]   ;;  %v7357_v3 = vld [vmem:[%s9974_s2 + $0x604] ss:$16 sps:$4 sm:$0xff]  }
 0x1a5   :  { %2195 = vmatprep.mubr.bf16.mxu0 %v7899_v2  ;;  %2236 = vmatprep.mubr.bf16.mxu1 %v7899_v2 }
 0x1a7   :  { %2166 = vmatpush1.bf16.msra.mxu0 %v7265_v5  ;;  %2207 = vmatpush1.bf16.msra.mxu1 %v7268_v6  ;;  %v7355_v5 = vld [vmem:[%s9974_s2 + $0x600] ss:$16 sps:$4 sm:$0xff]   ;;  %v7358_v6 = vld [vmem:[%s9974_s2 + $0x608] ss:$16 sps:$4 sm:$0xff]  }
 0x1a8   :  { %2167 = vmatprep.subr.bf16.mxu0 %v7273_v7  ;;  %2208 = vmatprep.subr.bf16.mxu1 %v7276_v8  ;;  %v2282_v7 = vrot.slane %v8285_v22, 5  ;;  %v7363_v8 = vld [vmem:[%s9974_s2 + $0x624] ss:$16 sps:$4 sm:$0xff]  }
 0x1ab   :  { %2168 = vmatpush1.bf16.msra.mxu0 %v7271_v9  ;;  %2209 = vmatpush1.bf16.msra.mxu1 %v7274_v10  ;;  %v7366_v9 = vld [vmem:[%s9974_s2 + $0x62c] ss:$16 sps:$4 sm:$0xff]   ;;  %v7361_v10 = vld [vmem:[%s9974_s2 + $0x620] ss:$16 sps:$4 sm:$0xff]  }
 0x1ac   :  { %2169 = vmatprep.subr.bf16.mxu0 %v7279_v11  ;;  %2210 = vmatprep.subr.bf16.mxu1 %v7282_v12  ;;  %v7364_v11 = vld [vmem:[%s9974_s2 + $0x628] ss:$16 sps:$4 sm:$0xff]   ;;  %v7369_v12 = vld [vmem:[%s9974_s2 + $0x644] ss:$16 sps:$4 sm:$0xff]  }
 0x1af   :  { %2170 = vmatpush1.bf16.msra.mxu0 %v7277_v13  ;;  %2211 = vmatpush1.bf16.msra.mxu1 %v7280_v14  ;;  %v7372_v13 = vld [vmem:[%s9974_s2 + $0x64c] ss:$16 sps:$4 sm:$0xff]   ;;  %v7367_v14 = vld [vmem:[%s9974_s2 + $0x640] ss:$16 sps:$4 sm:$0xff]  }
 0x1b0   :  { %2171 = vmatprep.subr.bf16.mxu0 %v7285_v15  ;;  %2212 = vmatprep.subr.bf16.mxu1 %v7288_v16  ;;  %v7370_v15 = vld [vmem:[%s9974_s2 + $0x648] ss:$16 sps:$4 sm:$0xff]   ;;  %v7375_v16 = vld [vmem:[%s9974_s2 + $0x664] ss:$16 sps:$4 sm:$0xff]  }
 0x1b3   :  { %2172 = vmatpush1.bf16.msra.mxu0 %v7283_v17  ;;  %2213 = vmatpush1.bf16.msra.mxu1 %v7286_v18  ;;  %v7378_v17 = vld [vmem:[%s9974_s2 + $0x66c] ss:$16 sps:$4 sm:$0xff]   ;;  %v7373_v18 = vld [vmem:[%s9974_s2 + $0x660] ss:$16 sps:$4 sm:$0xff]  }
 0x1b4   :  { %2173 = vmatprep.subr.bf16.mxu0 %v7291_v19  ;;  %2214 = vmatprep.subr.bf16.mxu1 %v7294_v20  ;;  %v7376_v19 = vld [vmem:[%s9974_s2 + $0x668] ss:$16 sps:$4 sm:$0xff]   ;;  %v7381_v20 = vld [vmem:[%s9974_s2 + $0x684] ss:$16 sps:$4 sm:$0xff]  }
 0x1b7   :  { %2174 = vmatpush1.bf16.msra.mxu0 %v7289_v21  ;;  %2215 = vmatpush1.bf16.msra.mxu1 %v7292_v23  ;;  %v7384_v21 = vld [vmem:[%s9974_s2 + $0x68c] ss:$16 sps:$4 sm:$0xff]   ;;  %v7379_v23 = vld [vmem:[%s9974_s2 + $0x680] ss:$16 sps:$4 sm:$0xff]  }
 0x1b8   :  { %2175 = vmatprep.subr.bf16.mxu0 %v7297_v24  ;;  %2216 = vmatprep.subr.bf16.mxu1 %v7300_v25  ;;  %v7382_v24 = vld [vmem:[%s9974_s2 + $0x688] ss:$16 sps:$4 sm:$0xff]   ;;  %v7387_v25 = vld [vmem:[%s9974_s2 + $0x6a4] ss:$16 sps:$4 sm:$0xff]  }
 0x1bb   :  { %2176 = vmatpush1.bf16.msra.mxu0 %v7295_v26  ;;  %2217 = vmatpush1.bf16.msra.mxu1 %v7298_v27  ;;  %v7390_v26 = vld [vmem:[%s9974_s2 + $0x6ac] ss:$16 sps:$4 sm:$0xff]   ;;  %v7385_v27 = vld [vmem:[%s9974_s2 + $0x6a0] ss:$16 sps:$4 sm:$0xff]  }
 0x1bc   :  { %2177 = vmatprep.subr.bf16.mxu0 %v7303_v28  ;;  %2218 = vmatprep.subr.bf16.mxu1 %v7306_v29  ;;  %v7388_v28 = vld [vmem:[%s9974_s2 + $0x6a8] ss:$16 sps:$4 sm:$0xff]   ;;  %v7393_v29 = vld [vmem:[%s9974_s2 + $0x6c4] ss:$16 sps:$4 sm:$0xff]  }
 0x1bf   :  { %2178 = vmatpush1.bf16.msra.mxu0 %v7301_v30  ;;  %2219 = vmatpush1.bf16.msra.mxu1 %v7304_v31  ;;  %v7396_v30 = vld [vmem:[%s9974_s2 + $0x6cc] ss:$16 sps:$4 sm:$0xff]   ;;  %v7391_v31 = vld [vmem:[%s9974_s2 + $0x6c0] ss:$16 sps:$4 sm:$0xff]  }
 0x1c0   :  { %2444 = vmatprep.subr.bf16.mxu0 %v7309_v32  ;;  %2485 = vmatprep.subr.bf16.mxu1 %v7312_v33  ;;  %v7394_v32 = vld [vmem:[%s9974_s2 + $0x6c8] ss:$16 sps:$4 sm:$0xff]   ;;  %v7399_v33 = vld [vmem:[%s9974_s2 + $0x6e4] ss:$16 sps:$4 sm:$0xff]  }
 0x1c2   :  { %2196 = vmatmul.mubr.bf16.vlgmr.msra.gmra.mrb[32].mxu0 %v2001_v37  ;;  %2237 = vmatmul.mubr.bf16.vlgmr.msra.gmra.mrb[32].mxu1 %v2001_v37  ;;  %v7400_v37 = vld [vmem:[%s9974_s2 + $0x6e8] ss:$16 sps:$4 sm:$0xff]  }
 0x1c3   :  { %2445 = vmatpush1.bf16.msra.mxu0 %v7307_v35  ;;  %2486 = vmatpush1.bf16.msra.mxu1 %v7310_v36  ;;  %v7402_v35 = vld [vmem:[%s9974_s2 + $0x6ec] ss:$16 sps:$4 sm:$0xff]   ;;  %v7397_v36 = vld [vmem:[%s9974_s2 + $0x6e0] ss:$16 sps:$4 sm:$0xff]  }
 0x1c4   :  { %2446 = vmatprep.subr.bf16.mxu0 %v7315_v38  ;;  %2487 = vmatprep.subr.bf16.mxu1 %v7318_v39  ;;  %v7405_v38 = vld [vmem:[%s9974_s2 + $0x704] ss:$16 sps:$4 sm:$0xff]   ;;  %v7408_v39 = vld [vmem:[%s9974_s2 + $0x70c] ss:$16 sps:$4 sm:$0xff]  }
 0x1c5   :  { %2476 = vmatprep.mubr.bf16.mxu0 %v7899_v2  ;;  %2517 = vmatprep.mubr.bf16.mxu1 %v7899_v2 }
 0x1c7   :  { %2447 = vmatpush1.bf16.msra.mxu0 %v7313_v40  ;;  %2488 = vmatpush1.bf16.msra.mxu1 %v7316_v41  ;;  %v7403_v40 = vld [vmem:[%s9974_s2 + $0x700] ss:$16 sps:$4 sm:$0xff]   ;;  %v7406_v41 = vld [vmem:[%s9974_s2 + $0x708] ss:$16 sps:$4 sm:$0xff]  }
 0x1c8   :  { %2448 = vmatprep.subr.bf16.mxu0 %v7321_v42  ;;  %2489 = vmatprep.subr.bf16.mxu1 %v7324_v43  ;;  %v2563_v42 = vrot.slane %v8285_v22, 6  ;;  %v7411_v43 = vld [vmem:[%s9974_s2 + $0x724] ss:$16 sps:$4 sm:$0xff]  }
 0x1cb   :  { %2449 = vmatpush1.bf16.msra.mxu0 %v7319_v44  ;;  %2490 = vmatpush1.bf16.msra.mxu1 %v7322_v45  ;;  %v7414_v44 = vld [vmem:[%s9974_s2 + $0x72c] ss:$16 sps:$4 sm:$0xff]   ;;  %v7409_v45 = vld [vmem:[%s9974_s2 + $0x720] ss:$16 sps:$4 sm:$0xff]  }
 0x1cc   :  { %2450 = vmatprep.subr.bf16.mxu0 %v7327_v46  ;;  %2491 = vmatprep.subr.bf16.mxu1 %v7330_v47  ;;  %v7412_v46 = vld [vmem:[%s9974_s2 + $0x728] ss:$16 sps:$4 sm:$0xff]   ;;  %v7417_v47 = vld [vmem:[%s9974_s2 + $0x744] ss:$16 sps:$4 sm:$0xff]  }
 0x1cf   :  { %2451 = vmatpush1.bf16.msra.mxu0 %v7325_v48  ;;  %2492 = vmatpush1.bf16.msra.mxu1 %v7328_v49  ;;  %v7420_v48 = vld [vmem:[%s9974_s2 + $0x74c] ss:$16 sps:$4 sm:$0xff]   ;;  %v7415_v49 = vld [vmem:[%s9974_s2 + $0x740] ss:$16 sps:$4 sm:$0xff]  }
 0x1d0   :  { %2452 = vmatprep.subr.bf16.mxu0 %v7333_v50  ;;  %2493 = vmatprep.subr.bf16.mxu1 %v7336_v51  ;;  %v7418_v50 = vld [vmem:[%s9974_s2 + $0x748] ss:$16 sps:$4 sm:$0xff]   ;;  %v7423_v51 = vld [vmem:[%s9974_s2 + $0x764] ss:$16 sps:$4 sm:$0xff]  }
 0x1d3   :  { %2453 = vmatpush1.bf16.msra.mxu0 %v7331_v52  ;;  %2494 = vmatpush1.bf16.msra.mxu1 %v7334_v53  ;;  %v7426_v52 = vld [vmem:[%s9974_s2 + $0x76c] ss:$16 sps:$4 sm:$0xff]   ;;  %v7421_v53 = vld [vmem:[%s9974_s2 + $0x760] ss:$16 sps:$4 sm:$0xff]  }
 0x1d4   :  { %2454 = vmatprep.subr.bf16.mxu0 %v7339_v54  ;;  %2495 = vmatprep.subr.bf16.mxu1 %v7342_v55  ;;  %v7424_v54 = vld [vmem:[%s9974_s2 + $0x768] ss:$16 sps:$4 sm:$0xff]   ;;  %v7429_v55 = vld [vmem:[%s9974_s2 + $0x784] ss:$16 sps:$4 sm:$0xff]  }
 0x1d7   :  { %2455 = vmatpush1.bf16.msra.mxu0 %v7337_v56  ;;  %2496 = vmatpush1.bf16.msra.mxu1 %v7340_v57  ;;  %v7432_v56 = vld [vmem:[%s9974_s2 + $0x78c] ss:$16 sps:$4 sm:$0xff]   ;;  %v7427_v57 = vld [vmem:[%s9974_s2 + $0x780] ss:$16 sps:$4 sm:$0xff]  }
 0x1d8   :  { %2456 = vmatprep.subr.bf16.mxu0 %v7345_v58  ;;  %2497 = vmatprep.subr.bf16.mxu1 %v7348_v59  ;;  %v7430_v58 = vld [vmem:[%s9974_s2 + $0x788] ss:$16 sps:$4 sm:$0xff]   ;;  %v7435_v59 = vld [vmem:[%s9974_s2 + $0x7a4] ss:$16 sps:$4 sm:$0xff]  }
 0x1db   :  { %2457 = vmatpush1.bf16.msra.mxu0 %v7343_v60  ;;  %2498 = vmatpush1.bf16.msra.mxu1 %v7346_v61  ;;  %v7438_v60 = vld [vmem:[%s9974_s2 + $0x7ac] ss:$16 sps:$4 sm:$0xff]   ;;  %v7433_v61 = vld [vmem:[%s9974_s2 + $0x7a0] ss:$16 sps:$4 sm:$0xff]  }
 0x1dc   :  { %2458 = vmatprep.subr.bf16.mxu0 %v7351_v62  ;;  %2499 = vmatprep.subr.bf16.mxu1 %v7354_v63  ;;  %v7436_v62 = vld [vmem:[%s9974_s2 + $0x7a8] ss:$16 sps:$4 sm:$0xff]   ;;  %v7441_v63 = vld [vmem:[%s9974_s2 + $0x7c4] ss:$16 sps:$4 sm:$0xff]  }
 0x1df   :  { %2459 = vmatpush1.bf16.msra.mxu0 %v7349_v0  ;;  %2500 = vmatpush1.bf16.msra.mxu1 %v7352_v1  ;;  %v7444_v0 = vld [vmem:[%s9974_s2 + $0x7cc] ss:$16 sps:$4 sm:$0xff]  }
 0x1e0   :  { %2725 = vmatprep.subr.bf16.mxu0 %v7357_v3  ;;  %2766 = vmatprep.subr.bf16.mxu1 %v7360_v4 }
 0x1e2   :  { %2477 = vmatmul.mubr.bf16.vlgmr.msra.gmra.mrb[36].mxu0 %v2282_v7  ;;  %2518 = vmatmul.mubr.bf16.vlgmr.msra.gmra.mrb[36].mxu1 %v2282_v7 }
 0x1e3   :  { %2726 = vmatpush1.bf16.msra.mxu0 %v7355_v5  ;;  %2767 = vmatpush1.bf16.msra.mxu1 %v7358_v6 }
 0x1e4   :  { %2727 = vmatprep.subr.bf16.mxu0 %v7363_v8  ;;  %2768 = vmatprep.subr.bf16.mxu1 %v7366_v9  ;;  %v7439_v8 = vld [vmem:[%s9974_s2 + $0x7c0] ss:$16 sps:$4 sm:$0xff]   ;;  %v7442_v9 = vld [vmem:[%s9974_s2 + $0x7c8] ss:$16 sps:$4 sm:$0xff]  }
 0x1e5   :  { %2757 = vmatprep.mubr.bf16.mxu0 %v7899_v2  ;;  %2798 = vmatprep.mubr.bf16.mxu1 %v7899_v2 }
 0x1e7   :  { %2728 = vmatpush1.bf16.msra.mxu0 %v7361_v10  ;;  %2769 = vmatpush1.bf16.msra.mxu1 %v7364_v11 }
 0x1e8   :  { %2729 = vmatprep.subr.bf16.mxu0 %v7369_v12  ;;  %2770 = vmatprep.subr.bf16.mxu1 %v7372_v13  ;;  %v7447_v12 = vld [vmem:[%s9974_s2 + $0x7e4] ss:$16 sps:$4 sm:$0xff]   ;;  %v7450_v13 = vld [vmem:[%s9974_s2 + $0x7ec] ss:$16 sps:$4 sm:$0xff]  }
 0x1eb   :  { %2730 = vmatpush1.bf16.msra.mxu0 %v7367_v14  ;;  %2771 = vmatpush1.bf16.msra.mxu1 %v7370_v15  ;;  %v7445_v14 = vld [vmem:[%s9974_s2 + $0x7e0] ss:$16 sps:$4 sm:$0xff]   ;;  %v7448_v15 = vld [vmem:[%s9974_s2 + $0x7e8] ss:$16 sps:$4 sm:$0xff]  }
 0x1ec   :  { %2731 = vmatprep.subr.bf16.mxu0 %v7375_v16  ;;  %2772 = vmatprep.subr.bf16.mxu1 %v7378_v17  ;;  %v7453_v16 = vld [vmem:[%s9974_s2 + $0x804] ss:$16 sps:$4 sm:$0xff]   ;;  %v7456_v17 = vld [vmem:[%s9974_s2 + $0x80c] ss:$16 sps:$4 sm:$0xff]  }
 0x1ef   :  { %2732 = vmatpush1.bf16.msra.mxu0 %v7373_v18  ;;  %2773 = vmatpush1.bf16.msra.mxu1 %v7376_v19  ;;  %v7451_v18 = vld [vmem:[%s9974_s2 + $0x800] ss:$16 sps:$4 sm:$0xff]   ;;  %v7454_v19 = vld [vmem:[%s9974_s2 + $0x808] ss:$16 sps:$4 sm:$0xff]  }
 0x1f0   :  { %2733 = vmatprep.subr.bf16.mxu0 %v7381_v20  ;;  %2774 = vmatprep.subr.bf16.mxu1 %v7384_v21  ;;  %v2844_v20 = vrot.slane %v8285_v22, 7  ;;  %v7459_v21 = vld [vmem:[%s9974_s2 + $0x824] ss:$16 sps:$4 sm:$0xff]   ;;  %v7460_v22 = vld [vmem:[%s9974_s2 + $0x828] ss:$16 sps:$4 sm:$0xff]  }
 0x1f3   :  { %2734 = vmatpush1.bf16.msra.mxu0 %v7379_v23  ;;  %2775 = vmatpush1.bf16.msra.mxu1 %v7382_v24  ;;  %v7462_v23 = vld [vmem:[%s9974_s2 + $0x82c] ss:$16 sps:$4 sm:$0xff]   ;;  %v7457_v24 = vld [vmem:[%s9974_s2 + $0x820] ss:$16 sps:$4 sm:$0xff]  }
 0x1f4   :  { %2735 = vmatprep.subr.bf16.mxu0 %v7387_v25  ;;  %2776 = vmatprep.subr.bf16.mxu1 %v7390_v26  ;;  %v7465_v25 = vld [vmem:[%s9974_s2 + $0x844] ss:$16 sps:$4 sm:$0xff]   ;;  %v7468_v26 = vld [vmem:[%s9974_s2 + $0x84c] ss:$16 sps:$4 sm:$0xff]  }
 0x1f7   :  { %2736 = vmatpush1.bf16.msra.mxu0 %v7385_v27  ;;  %2777 = vmatpush1.bf16.msra.mxu1 %v7388_v28  ;;  %v7463_v27 = vld [vmem:[%s9974_s2 + $0x840] ss:$16 sps:$4 sm:$0xff]   ;;  %v7466_v28 = vld [vmem:[%s9974_s2 + $0x848] ss:$16 sps:$4 sm:$0xff]  }
 0x1f8   :  { %2737 = vmatprep.subr.bf16.mxu0 %v7393_v29  ;;  %2778 = vmatprep.subr.bf16.mxu1 %v7396_v30  ;;  %v7471_v29 = vld [vmem:[%s9974_s2 + $0x864] ss:$16 sps:$4 sm:$0xff]   ;;  %v7474_v30 = vld [vmem:[%s9974_s2 + $0x86c] ss:$16 sps:$4 sm:$0xff]  }
 0x1fb   :  { %2738 = vmatpush1.bf16.msra.mxu0 %v7391_v31  ;;  %2779 = vmatpush1.bf16.msra.mxu1 %v7394_v32  ;;  %v7469_v31 = vld [vmem:[%s9974_s2 + $0x860] ss:$16 sps:$4 sm:$0xff]   ;;  %v7472_v32 = vld [vmem:[%s9974_s2 + $0x868] ss:$16 sps:$4 sm:$0xff]  }
 0x1fc   :  { %2739 = vmatprep.subr.bf16.mxu0 %v7399_v33  ;;  %2780 = vmatprep.subr.bf16.mxu1 %v7402_v35  ;;  %v7477_v33 = vld [vmem:[%s9974_s2 + $0x884] ss:$16 sps:$4 sm:$0xff]   ;;  %v7480_v35 = vld [vmem:[%s9974_s2 + $0x88c] ss:$16 sps:$4 sm:$0xff]  }
 0x1ff   :  { %2740 = vmatpush1.bf16.msra.mxu0 %v7397_v36  ;;  %2781 = vmatpush1.bf16.msra.mxu1 %v7400_v37  ;;  %v7475_v36 = vld [vmem:[%s9974_s2 + $0x880] ss:$16 sps:$4 sm:$0xff]   ;;  %v7478_v37 = vld [vmem:[%s9974_s2 + $0x888] ss:$16 sps:$4 sm:$0xff]  }
 0x200   :  { %3006 = vmatprep.subr.bf16.mxu0 %v7405_v38  ;;  %3047 = vmatprep.subr.bf16.mxu1 %v7408_v39  ;;  %v7483_v38 = vld [vmem:[%s9974_s2 + $0x8a4] ss:$16 sps:$4 sm:$0xff]   ;;  %v7486_v39 = vld [vmem:[%s9974_s2 + $0x8ac] ss:$16 sps:$4 sm:$0xff]  }
 0x202   :  { %2758 = vmatmul.mubr.bf16.vlgmr.msra.gmra.mrb[40].mxu0 %v2563_v42  ;;  %2799 = vmatmul.mubr.bf16.vlgmr.msra.gmra.mrb[40].mxu1 %v2563_v42  ;;  %v7489_v42 = vld [vmem:[%s9974_s2 + $0x8c4] ss:$16 sps:$4 sm:$0xff]  }
 0x203   :  { %3007 = vmatpush1.bf16.msra.mxu0 %v7403_v40  ;;  %3048 = vmatpush1.bf16.msra.mxu1 %v7406_v41  ;;  %v7481_v40 = vld [vmem:[%s9974_s2 + $0x8a0] ss:$16 sps:$4 sm:$0xff]   ;;  %v7484_v41 = vld [vmem:[%s9974_s2 + $0x8a8] ss:$16 sps:$4 sm:$0xff]  }
 0x204   :  { %3008 = vmatprep.subr.bf16.mxu0 %v7411_v43  ;;  %3049 = vmatprep.subr.bf16.mxu1 %v7414_v44  ;;  %v7492_v43 = vld [vmem:[%s9974_s2 + $0x8cc] ss:$16 sps:$4 sm:$0xff]  }
 0x205   :  { %3038 = vmatprep.mubr.bf16.mxu0 %v7899_v2  ;;  %3079 = vmatprep.mubr.bf16.mxu1 %v7899_v2 }
 0x207   :  { %3009 = vmatpush1.bf16.msra.mxu0 %v7409_v45  ;;  %3050 = vmatpush1.bf16.msra.mxu1 %v7412_v46 }
 0x208   :  { %3010 = vmatprep.subr.bf16.mxu0 %v7417_v47  ;;  %3051 = vmatprep.subr.bf16.mxu1 %v7420_v48 }
 0x20b   :  { %3011 = vmatpush1.bf16.msra.mxu0 %v7415_v49  ;;  %3052 = vmatpush1.bf16.msra.mxu1 %v7418_v50 }
 0x20c   :  { %3012 = vmatprep.subr.bf16.mxu0 %v7423_v51  ;;  %3053 = vmatprep.subr.bf16.mxu1 %v7426_v52 }
 0x20f   :  { %3013 = vmatpush1.bf16.msra.mxu0 %v7421_v53  ;;  %3054 = vmatpush1.bf16.msra.mxu1 %v7424_v54  ;;  %v7487_v54 = vld [vmem:[%s9974_s2 + $0x8c0] ss:$16 sps:$4 sm:$0xff]  }
 0x210   :  { %3014 = vmatprep.subr.bf16.mxu0 %v7429_v55  ;;  %3055 = vmatprep.subr.bf16.mxu1 %v7432_v56  ;;  %v7490_v55 = vld [vmem:[%s9974_s2 + $0x8c8] ss:$16 sps:$4 sm:$0xff]  }
 0x213   :  { %3015 = vmatpush1.bf16.msra.mxu0 %v7427_v57  ;;  %3056 = vmatpush1.bf16.msra.mxu1 %v7430_v58  ;;  %v7495_v58 = vld [vmem:[%s9974_s2 + $0x8e4] ss:$16 sps:$4 sm:$0xff]  }
 0x214   :  { %3016 = vmatprep.subr.bf16.mxu0 %v7435_v59  ;;  %3057 = vmatprep.subr.bf16.mxu1 %v7438_v60  ;;  %v7498_v59 = vld [vmem:[%s9974_s2 + $0x8ec] ss:$16 sps:$4 sm:$0xff]   ;;  %v7493_v60 = vld [vmem:[%s9974_s2 + $0x8e0] ss:$16 sps:$4 sm:$0xff]  }
 0x215   :  { %v8953_v1 = vpop.f32.mrb[16].mxu0  ;;  %v8955_v3 = vpop.f32.mrb[16].mxu1 }
 0x216   :  { %v8957_v4 = vpop.f32.mrb[17].mxu0  ;;  %v8959_v5 = vpop.f32.mrb[17].mxu1 }
 0x217   :  { %3017 = vmatpush1.bf16.msra.mxu0 %v7433_v61  ;;  %3058 = vmatpush1.bf16.msra.mxu1 %v7436_v62  ;;  %v1120_v6 = vpop.f32.mrb[18].mxu0  ;;  %v1161_v7 = vpop.f32.mrb[18].mxu1  ;;  %v7496_v61 = vld [vmem:[%s9974_s2 + $0x8e8] ss:$16 sps:$4 sm:$0xff]   ;;  %v7501_v62 = vld [vmem:[%s9974_s2 + $0x904] ss:$16 sps:$4 sm:$0xff]  }
 0x218   :  { %v1121_v10 = vpop.f32.mrb[19].mxu0  ;;  %v1162_v11 = vpop.f32.mrb[19].mxu1  ;;  %3018 = vmatprep.subr.bf16.mxu0 %v7441_v63  ;;  %3059 = vmatprep.subr.bf16.mxu1 %v7444_v0  ;;  %v7504_v63 = vld [vmem:[%s9974_s2 + $0x90c] ss:$16 sps:$4 sm:$0xff]   ;;  %v7499_v0 = vld [vmem:[%s9974_s2 + $0x900] ss:$16 sps:$4 sm:$0xff]  }
 0x219   :  { %v7508_v6 = vld [vmem:[%s9974_s2 + $0x928] ss:$16 sps:$4 sm:$0xff]   ;;  %v7513_v7 = vld [vmem:[%s9974_s2 + $0x944] ss:$16 sps:$4 sm:$0xff]  }
 0x21a   :  { %v7514_v10 = vld [vmem:[%s9974_s2 + $0x948] ss:$16 sps:$4 sm:$0xff]   ;;  %v7519_v11 = vld [vmem:[%s9974_s2 + $0x964] ss:$16 sps:$4 sm:$0xff]  }
 0x21b   :  { %3019 = vmatpush1.bf16.msra.mxu0 %v7439_v8  ;;  %3060 = vmatpush1.bf16.msra.mxu1 %v7442_v9  ;;  %v7516_v8 = vld [vmem:[%s9974_s2 + $0x94c] ss:$16 sps:$4 sm:$0xff]   ;;  %v7511_v9 = vld [vmem:[%s9974_s2 + $0x940] ss:$16 sps:$4 sm:$0xff]  }
 0x21c   :  { %3020 = vmatprep.subr.bf16.mxu0 %v7447_v12  ;;  %3061 = vmatprep.subr.bf16.mxu1 %v7450_v13  ;;  %v7522_v12 = vld [vmem:[%s9974_s2 + $0x96c] ss:$16 sps:$4 sm:$0xff]   ;;  %v7517_v13 = vld [vmem:[%s9974_s2 + $0x960] ss:$16 sps:$4 sm:$0xff]  }
 0x21f   :  { %3021 = vmatpush1.bf16.msra.mxu0 %v7445_v14  ;;  %3062 = vmatpush1.bf16.msra.mxu1 %v7448_v15  ;;  %v7520_v14 = vld [vmem:[%s9974_s2 + $0x968] ss:$16 sps:$4 sm:$0xff]   ;;  %v7525_v15 = vld [vmem:[%s9974_s2 + $0x984] ss:$16 sps:$4 sm:$0xff]  }
 0x220   :  { %3285 = vmatprep.subr.bf16.mxu0 %v7453_v16  ;;  %3326 = vmatprep.subr.bf16.mxu1 %v7456_v17  ;;  %v7528_v16 = vld [vmem:[%s9974_s2 + $0x98c] ss:$16 sps:$4 sm:$0xff]   ;;  %v7523_v17 = vld [vmem:[%s9974_s2 + $0x980] ss:$16 sps:$4 sm:$0xff]  }
 0x222   :  { %3039 = vmatmul.mubr.bf16.vlgmr.msra.gmra.mrb[44].mxu0 %v2844_v20  ;;  %3080 = vmatmul.mubr.bf16.vlgmr.msra.gmra.mrb[44].mxu1 %v2844_v20  ;;  %v7534_v20 = vld [vmem:[%s9974_s2 + $0x9ac] ss:$16 sps:$4 sm:$0xff]  }
 0x223   :  { %3286 = vmatpush1.bf16.msra.mxu0 %v7451_v18  ;;  %3327 = vmatpush1.bf16.msra.mxu1 %v7454_v19  ;;  %v7526_v18 = vld [vmem:[%s9974_s2 + $0x988] ss:$16 sps:$4 sm:$0xff]   ;;  %v7531_v19 = vld [vmem:[%s9974_s2 + $0x9a4] ss:$16 sps:$4 sm:$0xff]  }
 0x224   :  { %3287 = vmatprep.subr.bf16.mxu0 %v7459_v21  ;;  %3328 = vmatprep.subr.bf16.mxu1 %v7462_v23  ;;  %v7529_v21 = vld [vmem:[%s9974_s2 + $0x9a0] ss:$16 sps:$4 sm:$0xff]   ;;  %v7532_v23 = vld [vmem:[%s9974_s2 + $0x9a8] ss:$16 sps:$4 sm:$0xff]  }
 0x225   :  { %3317 = vmatprep.mubr.bf16.mxu0 %v7899_v2  ;;  %3358 = vmatprep.mubr.bf16.mxu1 %v7899_v2 }
 0x227   :  { %3288 = vmatpush1.bf16.msra.mxu0 %v7457_v24  ;;  %3329 = vmatpush1.bf16.msra.mxu1 %v7460_v22  ;;  %v7537_v24 = vld [vmem:[%s9974_s2 + $0x9c4] ss:$16 sps:$4 sm:$0xff]   ;;  %v7540_v22 = vld [vmem:[%s9974_s2 + $0x9cc] ss:$16 sps:$4 sm:$0xff]  }
 0x228   :  { %3289 = vmatprep.subr.bf16.mxu0 %v7465_v25  ;;  %3330 = vmatprep.subr.bf16.mxu1 %v7468_v26 }
 0x22b   :  { %3290 = vmatpush1.bf16.msra.mxu0 %v7463_v27  ;;  %3331 = vmatpush1.bf16.msra.mxu1 %v7466_v28 }
 0x22c   :  { %3291 = vmatprep.subr.bf16.mxu0 %v7471_v29  ;;  %3332 = vmatprep.subr.bf16.mxu1 %v7474_v30 }
 0x22f   :  { %3292 = vmatpush1.bf16.msra.mxu0 %v7469_v31  ;;  %3333 = vmatpush1.bf16.msra.mxu1 %v7472_v32 }
 0x230   :  { %3293 = vmatprep.subr.bf16.mxu0 %v7477_v33  ;;  %3334 = vmatprep.subr.bf16.mxu1 %v7480_v35 }
 0x233   :  { %3294 = vmatpush1.bf16.msra.mxu0 %v7475_v36  ;;  %3335 = vmatpush1.bf16.msra.mxu1 %v7478_v37  ;;  %v7535_v36 = vld [vmem:[%s9974_s2 + $0x9c0] ss:$16 sps:$4 sm:$0xff]   ;;  %v7538_v37 = vld [vmem:[%s9974_s2 + $0x9c8] ss:$16 sps:$4 sm:$0xff]  }
 0x234   :  { %3295 = vmatprep.subr.bf16.mxu0 %v7483_v38  ;;  %3336 = vmatprep.subr.bf16.mxu1 %v7486_v39 }
 0x235   :  { %v1358_v44 = vpop.f32.mrb[20].mxu0  ;;  %v1399_v45 = vpop.f32.mrb[20].mxu1 }
 0x236   :  { %v9061_v46 = vadd.f32 %v1358_v44, %v8953_v1  ;;  %v9064_v47 = vadd.f32 %v1399_v45, %v8955_v3  ;;  %v1360_v48 = vpop.f32.mrb[21].mxu0  ;;  %v1401_v49 = vpop.f32.mrb[21].mxu1  ;;  %v7502_v1 = vld [vmem:[%s9974_s2 + $0x908] ss:$16 sps:$4 sm:$0xff]   ;;  %v7507_v3 = vld [vmem:[%s9974_s2 + $0x924] ss:$16 sps:$4 sm:$0xff]  }
 0x237   :  { %v9067_v50 = vadd.f32 %v1360_v48, %v8957_v4  ;;  %v9070_v51 = vadd.f32 %v1401_v49, %v8959_v5  ;;  %v1362_v52 = vpop.f32.mrb[22].mxu0  ;;  %v1403_v53 = vpop.f32.mrb[22].mxu1  ;;  %3296 = vmatpush1.bf16.msra.mxu0 %v7481_v40  ;;  %3337 = vmatpush1.bf16.msra.mxu1 %v7484_v41  ;;  %v7510_v4 = vld [vmem:[%s9974_s2 + $0x92c] ss:$16 sps:$4 sm:$0xff]   ;;  %v7505_v5 = vld [vmem:[%s9974_s2 + $0x920] ss:$16 sps:$4 sm:$0xff]  }
 0x238   :  { %v1363_v56 = vpop.f32.mrb[23].mxu0  ;;  %v1404_v57 = vpop.f32.mrb[23].mxu1  ;;  %3297 = vmatprep.subr.bf16.mxu0 %v7489_v42  ;;  %3338 = vmatprep.subr.bf16.mxu1 %v7492_v43  ;;  %v7543_v40 = vld [vmem:[%s9974_s2 + $0x9e4] ss:$16 sps:$4 sm:$0xff]   ;;  %v7546_v41 = vld [vmem:[%s9974_s2 + $0x9ec] ss:$16 sps:$4 sm:$0xff]  }
 0x239   :  { %v7541_v42 = vld [vmem:[%s9974_s2 + $0x9e0] ss:$16 sps:$4 sm:$0xff]   ;;  %v7544_v43 = vld [vmem:[%s9974_s2 + $0x9e8] ss:$16 sps:$4 sm:$0xff]   ;;  %v7549_v44 = vld [vmem:[%s9974_s2 + $0xa04] ss:$16 sps:$4 sm:$0xff]  }
 0x23a   :  { %v7552_v45 = vld [vmem:[%s9974_s2 + $0xa0c] ss:$16 sps:$4 sm:$0xff]   ;;  %v3405_v48 = vrot.slane %v8308_v34, 1  ;;  %v7555_v49 = vld [vmem:[%s9974_s2 + $0xa24] ss:$16 sps:$4 sm:$0xff]  }
 0x23b   :  { %3298 = vmatpush1.bf16.msra.mxu0 %v7487_v54  ;;  %3339 = vmatpush1.bf16.msra.mxu1 %v7490_v55  ;;  %v7556_v52 = vld [vmem:[%s9974_s2 + $0xa28] ss:$16 sps:$4 sm:$0xff]   ;;  %v7561_v53 = vld [vmem:[%s9974_s2 + $0xa44] ss:$16 sps:$4 sm:$0xff]   ;;  %v7564_v54 = vld [vmem:[%s9974_s2 + $0xa4c] ss:$16 sps:$4 sm:$0xff]  }
 0x23c   :  { %3299 = vmatprep.subr.bf16.mxu0 %v7495_v58  ;;  %3340 = vmatprep.subr.bf16.mxu1 %v7498_v59  ;;  %v7559_v55 = vld [vmem:[%s9974_s2 + $0xa40] ss:$16 sps:$4 sm:$0xff]   ;;  %v7562_v56 = vld [vmem:[%s9974_s2 + $0xa48] ss:$16 sps:$4 sm:$0xff]   ;;  %v7567_v57 = vld [vmem:[%s9974_s2 + $0xa64] ss:$16 sps:$4 sm:$0xff]  }
 0x23d   :  { %v7570_v58 = vld [vmem:[%s9974_s2 + $0xa6c] ss:$16 sps:$4 sm:$0xff]   ;;  %v7565_v59 = vld [vmem:[%s9974_s2 + $0xa60] ss:$16 sps:$4 sm:$0xff]  }
 0x23f   :  { %3300 = vmatpush1.bf16.msra.mxu0 %v7493_v60  ;;  %3341 = vmatpush1.bf16.msra.mxu1 %v7496_v61  ;;  %v7568_v60 = vld [vmem:[%s9974_s2 + $0xa68] ss:$16 sps:$4 sm:$0xff]   ;;  %v7573_v61 = vld [vmem:[%s9974_s2 + $0xa84] ss:$16 sps:$4 sm:$0xff]  }
 0x240   :  { %3567 = vmatprep.subr.bf16.mxu0 %v7501_v62  ;;  %3608 = vmatprep.subr.bf16.mxu1 %v7504_v63  ;;  %v7576_v62 = vld [vmem:[%s9974_s2 + $0xa8c] ss:$16 sps:$4 sm:$0xff]   ;;  %v7571_v63 = vld [vmem:[%s9974_s2 + $0xa80] ss:$16 sps:$4 sm:$0xff]  }
 0x242   :  { %3318 = vmatmul.mubr.bf16.vlgmr.msra.gmra.mrb[48].mxu0 %v8308_v34  ;;  %3359 = vmatmul.mubr.bf16.vlgmr.msra.gmra.mrb[48].mxu1 %v8308_v34 }
 0x243   :  { %3568 = vmatpush1.bf16.msra.mxu0 %v7499_v0  ;;  %3609 = vmatpush1.bf16.msra.mxu1 %v7502_v1  ;;  %v7574_v0 = vld [vmem:[%s9974_s2 + $0xa88] ss:$16 sps:$4 sm:$0xff]   ;;  %v7579_v1 = vld [vmem:[%s9974_s2 + $0xaa4] ss:$16 sps:$4 sm:$0xff]  }
 0x244   :  { %3569 = vmatprep.subr.bf16.mxu0 %v7507_v3  ;;  %3610 = vmatprep.subr.bf16.mxu1 %v7510_v4  ;;  %v7582_v3 = vld [vmem:[%s9974_s2 + $0xaac] ss:$16 sps:$4 sm:$0xff]   ;;  %v7577_v4 = vld [vmem:[%s9974_s2 + $0xaa0] ss:$16 sps:$4 sm:$0xff]  }
 0x245   :  { %3599 = vmatprep.mubr.bf16.mxu0 %v7899_v2  ;;  %3640 = vmatprep.mubr.bf16.mxu1 %v7899_v2 }
 0x247   :  { %3570 = vmatpush1.bf16.msra.mxu0 %v7505_v5  ;;  %3611 = vmatpush1.bf16.msra.mxu1 %v7508_v6  ;;  %v7580_v5 = vld [vmem:[%s9974_s2 + $0xaa8] ss:$16 sps:$4 sm:$0xff]   ;;  %v7585_v6 = vld [vmem:[%s9974_s2 + $0xac4] ss:$16 sps:$4 sm:$0xff]  }
 0x248   :  { %3571 = vmatprep.subr.bf16.mxu0 %v7513_v7  ;;  %3612 = vmatprep.subr.bf16.mxu1 %v7516_v8  ;;  %v7588_v7 = vld [vmem:[%s9974_s2 + $0xacc] ss:$16 sps:$4 sm:$0xff]  }
 0x24b   :  { %3572 = vmatpush1.bf16.msra.mxu0 %v7511_v9  ;;  %3613 = vmatpush1.bf16.msra.mxu1 %v7514_v10 }
 0x24c   :  { %3573 = vmatprep.subr.bf16.mxu0 %v7519_v11  ;;  %3614 = vmatprep.subr.bf16.mxu1 %v7522_v12 }
 0x24f   :  { %3574 = vmatpush1.bf16.msra.mxu0 %v7517_v13  ;;  %3615 = vmatpush1.bf16.msra.mxu1 %v7520_v14 }
 0x250   :  { %3575 = vmatprep.subr.bf16.mxu0 %v7525_v15  ;;  %3616 = vmatprep.subr.bf16.mxu1 %v7528_v16 }
 0x253   :  { %3576 = vmatpush1.bf16.msra.mxu0 %v7523_v17  ;;  %3617 = vmatpush1.bf16.msra.mxu1 %v7526_v18  ;;  %v7583_v18 = vld [vmem:[%s9974_s2 + $0xac0] ss:$16 sps:$4 sm:$0xff]  }
 0x254   :  { %3577 = vmatprep.subr.bf16.mxu0 %v7531_v19  ;;  %3618 = vmatprep.subr.bf16.mxu1 %v7534_v20  ;;  %v7586_v19 = vld [vmem:[%s9974_s2 + $0xac8] ss:$16 sps:$4 sm:$0xff]  }
 0x255   :  { %v1635_v25 = vpop.f32.mrb[24].mxu0  ;;  %v1676_v26 = vpop.f32.mrb[24].mxu1 }
 0x256   :  { %v9173_v27 = vadd.f32 %v1635_v25, %v9061_v46  ;;  %v9176_v28 = vadd.f32 %v1676_v26, %v9064_v47  ;;  %v1637_v29 = vpop.f32.mrb[25].mxu0  ;;  %v1678_v30 = vpop.f32.mrb[25].mxu1  ;;  %v7547_v46 = vld [vmem:[%s9974_s2 + $0xa00] ss:$16 sps:$4 sm:$0xff]   ;;  %v7550_v47 = vld [vmem:[%s9974_s2 + $0xa08] ss:$16 sps:$4 sm:$0xff]  }
 0x257   :  { %v9179_v31 = vadd.f32 %v1637_v29, %v9067_v50  ;;  %v9182_v32 = vadd.f32 %v1678_v30, %v9070_v51  ;;  %v1639_v33 = vpop.f32.mrb[26].mxu0  ;;  %v1680_v35 = vpop.f32.mrb[26].mxu1  ;;  %3578 = vmatpush1.bf16.msra.mxu0 %v7529_v21  ;;  %3619 = vmatpush1.bf16.msra.mxu1 %v7532_v23  ;;  %v7558_v50 = vld [vmem:[%s9974_s2 + $0xa2c] ss:$16 sps:$4 sm:$0xff]   ;;  %v7553_v51 = vld [vmem:[%s9974_s2 + $0xa20] ss:$16 sps:$4 sm:$0xff]  }
 0x258   :  { %v1640_v38 = vpop.f32.mrb[27].mxu0  ;;  %v1681_v39 = vpop.f32.mrb[27].mxu1  ;;  %3579 = vmatprep.subr.bf16.mxu0 %v7537_v24  ;;  %3620 = vmatprep.subr.bf16.mxu1 %v7540_v22  ;;  %v7591_v23 = vld [vmem:[%s9974_s2 + $0xae4] ss:$16 sps:$4 sm:$0xff]   ;;  %v7594_v24 = vld [vmem:[%s9974_s2 + $0xaec] ss:$16 sps:$4 sm:$0xff]  }
 0x259   :  { %v7589_v22 = vld [vmem:[%s9974_s2 + $0xae0] ss:$16 sps:$4 sm:$0xff]   ;;  %v7592_v25 = vld [vmem:[%s9974_s2 + $0xae8] ss:$16 sps:$4 sm:$0xff]   ;;  %v7597_v26 = vld [vmem:[%s9974_s2 + $0xb04] ss:$16 sps:$4 sm:$0xff]  }
 0x25a   :  { %v7598_v29 = vld [vmem:[%s9974_s2 + $0xb08] ss:$16 sps:$4 sm:$0xff]   ;;  %v3686_v30 = vrot.slane %v8308_v34, 2  ;;  %v7601_v33 = vld [vmem:[%s9974_s2 + $0xb20] ss:$16 sps:$4 sm:$0xff]  }
 0x25b   :  { %3580 = vmatpush1.bf16.msra.mxu0 %v7535_v36  ;;  %3621 = vmatpush1.bf16.msra.mxu1 %v7538_v37  ;;  %v7604_v35 = vld [vmem:[%s9974_s2 + $0xb28] ss:$16 sps:$4 sm:$0xff]   ;;  %v7609_v36 = vld [vmem:[%s9974_s2 + $0xb44] ss:$16 sps:$4 sm:$0xff]   ;;  %v7612_v37 = vld [vmem:[%s9974_s2 + $0xb4c] ss:$16 sps:$4 sm:$0xff]  }
 0x25c   :  { %3581 = vmatprep.subr.bf16.mxu0 %v7543_v40  ;;  %3622 = vmatprep.subr.bf16.mxu1 %v7546_v41  ;;  %v7607_v38 = vld [vmem:[%s9974_s2 + $0xb40] ss:$16 sps:$4 sm:$0xff]   ;;  %v7610_v39 = vld [vmem:[%s9974_s2 + $0xb48] ss:$16 sps:$4 sm:$0xff]   ;;  %v7615_v40 = vld [vmem:[%s9974_s2 + $0xb64] ss:$16 sps:$4 sm:$0xff]  }
 0x25d   :  { %v7618_v41 = vld [vmem:[%s9974_s2 + $0xb6c] ss:$16 sps:$4 sm:$0xff]  }
 0x25f   :  { %3582 = vmatpush1.bf16.msra.mxu0 %v7541_v42  ;;  %3623 = vmatpush1.bf16.msra.mxu1 %v7544_v43  ;;  %v7613_v42 = vld [vmem:[%s9974_s2 + $0xb60] ss:$16 sps:$4 sm:$0xff]   ;;  %v7616_v43 = vld [vmem:[%s9974_s2 + $0xb68] ss:$16 sps:$4 sm:$0xff]  }
 0x260   :  { %3848 = vmatprep.subr.bf16.mxu0 %v7549_v44  ;;  %3889 = vmatprep.subr.bf16.mxu1 %v7552_v45  ;;  %v7621_v44 = vld [vmem:[%s9974_s2 + $0xb84] ss:$16 sps:$4 sm:$0xff]   ;;  %v7624_v45 = vld [vmem:[%s9974_s2 + $0xb8c] ss:$16 sps:$4 sm:$0xff]  }
 0x262   :  { %3600 = vmatmul.mubr.bf16.vlgmr.msra.gmra.mrb[52].mxu0 %v3405_v48  ;;  %3641 = vmatmul.mubr.bf16.vlgmr.msra.gmra.mrb[52].mxu1 %v3405_v48  ;;  %v7627_v48 = vld [vmem:[%s9974_s2 + $0xba4] ss:$16 sps:$4 sm:$0xff]  }
 0x263   :  { %3849 = vmatpush1.bf16.msra.mxu0 %v7547_v46  ;;  %3890 = vmatpush1.bf16.msra.mxu1 %v7550_v47  ;;  %v7619_v46 = vld [vmem:[%s9974_s2 + $0xb80] ss:$16 sps:$4 sm:$0xff]   ;;  %v7622_v47 = vld [vmem:[%s9974_s2 + $0xb88] ss:$16 sps:$4 sm:$0xff]  }
 0x264   :  { %3850 = vmatprep.subr.bf16.mxu0 %v7555_v49  ;;  %3891 = vmatprep.subr.bf16.mxu1 %v7558_v50  ;;  %v7630_v49 = vld [vmem:[%s9974_s2 + $0xbac] ss:$16 sps:$4 sm:$0xff]   ;;  %v7625_v50 = vld [vmem:[%s9974_s2 + $0xba0] ss:$16 sps:$4 sm:$0xff]  }
 0x265   :  { %3880 = vmatprep.mubr.bf16.mxu0 %v7899_v2  ;;  %3921 = vmatprep.mubr.bf16.mxu1 %v7899_v2 }
 0x267   :  { %3851 = vmatpush1.bf16.msra.mxu0 %v7553_v51  ;;  %3892 = vmatpush1.bf16.msra.mxu1 %v7556_v52  ;;  %v7628_v51 = vld [vmem:[%s9974_s2 + $0xba8] ss:$16 sps:$4 sm:$0xff]   ;;  %v7633_v52 = vld [vmem:[%s9974_s2 + $0xbc4] ss:$16 sps:$4 sm:$0xff]  }
 0x268   :  { %3852 = vmatprep.subr.bf16.mxu0 %v7561_v53  ;;  %3893 = vmatprep.subr.bf16.mxu1 %v7564_v54  ;;  %v7636_v53 = vld [vmem:[%s9974_s2 + $0xbcc] ss:$16 sps:$4 sm:$0xff]  }
 0x26b   :  { %3853 = vmatpush1.bf16.msra.mxu0 %v7559_v55  ;;  %3894 = vmatpush1.bf16.msra.mxu1 %v7562_v56 }
 0x26c   :  { %3854 = vmatprep.subr.bf16.mxu0 %v7567_v57  ;;  %3895 = vmatprep.subr.bf16.mxu1 %v7570_v58 }
 0x26f   :  { %3855 = vmatpush1.bf16.msra.mxu0 %v7565_v59  ;;  %3896 = vmatpush1.bf16.msra.mxu1 %v7568_v60 }
 0x270   :  { %3856 = vmatprep.subr.bf16.mxu0 %v7573_v61  ;;  %3897 = vmatprep.subr.bf16.mxu1 %v7576_v62 }
 0x273   :  { %3857 = vmatpush1.bf16.msra.mxu0 %v7571_v63  ;;  %3898 = vmatpush1.bf16.msra.mxu1 %v7574_v0  ;;  %v7631_v0 = vld [vmem:[%s9974_s2 + $0xbc0] ss:$16 sps:$4 sm:$0xff]  }
 0x274   :  { %3858 = vmatprep.subr.bf16.mxu0 %v7579_v1  ;;  %3899 = vmatprep.subr.bf16.mxu1 %v7582_v3  ;;  %v7634_v1 = vld [vmem:[%s9974_s2 + $0xbc8] ss:$16 sps:$4 sm:$0xff]  }
 0x275   :  { %v1916_v8 = vpop.f32.mrb[28].mxu0  ;;  %v1957_v9 = vpop.f32.mrb[28].mxu1 }
 0x276   :  { %v9284_v10 = vadd.f32 %v1916_v8, %v9173_v27  ;;  %v9287_v11 = vadd.f32 %v1957_v9, %v9176_v28  ;;  %v1918_v12 = vpop.f32.mrb[29].mxu0  ;;  %v1959_v13 = vpop.f32.mrb[29].mxu1  ;;  %v7600_v27 = vld [vmem:[%s9974_s2 + $0xb0c] ss:$16 sps:$4 sm:$0xff]   ;;  %v7595_v28 = vld [vmem:[%s9974_s2 + $0xb00] ss:$16 sps:$4 sm:$0xff]  }
 0x277   :  { %v9290_v14 = vadd.f32 %v1918_v12, %v9179_v31  ;;  %v9293_v15 = vadd.f32 %v1959_v13, %v9182_v32  ;;  %v1920_v16 = vpop.f32.mrb[30].mxu0  ;;  %v1961_v17 = vpop.f32.mrb[30].mxu1  ;;  %3859 = vmatpush1.bf16.msra.mxu0 %v7577_v4  ;;  %3900 = vmatpush1.bf16.msra.mxu1 %v7580_v5  ;;  %v7603_v31 = vld [vmem:[%s9974_s2 + $0xb24] ss:$16 sps:$4 sm:$0xff]   ;;  %v7606_v32 = vld [vmem:[%s9974_s2 + $0xb2c] ss:$16 sps:$4 sm:$0xff]  }
 0x278   :  { %v1921_v20 = vpop.f32.mrb[31].mxu0  ;;  %v1962_v21 = vpop.f32.mrb[31].mxu1  ;;  %3860 = vmatprep.subr.bf16.mxu0 %v7585_v6  ;;  %3901 = vmatprep.subr.bf16.mxu1 %v7588_v7  ;;  %v7639_v5 = vld [vmem:[%s9974_s2 + $0xbe4] ss:$16 sps:$4 sm:$0xff]   ;;  %v7642_v6 = vld [vmem:[%s9974_s2 + $0xbec] ss:$16 sps:$4 sm:$0xff]  }
 0x279   :  { %v7637_v7 = vld [vmem:[%s9974_s2 + $0xbe0] ss:$16 sps:$4 sm:$0xff]   ;;  %v7640_v8 = vld [vmem:[%s9974_s2 + $0xbe8] ss:$16 sps:$4 sm:$0xff]   ;;  %v7645_v9 = vld [vmem:[%s9974_s2 + $0xc04] ss:$16 sps:$4 sm:$0xff]  }
 0x27a   :  { %v7646_v12 = vld [vmem:[%s9974_s2 + $0xc08] ss:$16 sps:$4 sm:$0xff]   ;;  %v3967_v13 = vrot.slane %v8308_v34, 3  ;;  %v7649_v16 = vld [vmem:[%s9974_s2 + $0xc20] ss:$16 sps:$4 sm:$0xff]  }
 0x27b   :  { %3861 = vmatpush1.bf16.msra.mxu0 %v7583_v18  ;;  %3902 = vmatpush1.bf16.msra.mxu1 %v7586_v19  ;;  %v7652_v17 = vld [vmem:[%s9974_s2 + $0xc28] ss:$16 sps:$4 sm:$0xff]   ;;  %v7657_v18 = vld [vmem:[%s9974_s2 + $0xc44] ss:$16 sps:$4 sm:$0xff]   ;;  %v7660_v19 = vld [vmem:[%s9974_s2 + $0xc4c] ss:$16 sps:$4 sm:$0xff]  }
 0x27c   :  { %3862 = vmatprep.subr.bf16.mxu0 %v7591_v23  ;;  %3903 = vmatprep.subr.bf16.mxu1 %v7594_v24  ;;  %v7655_v20 = vld [vmem:[%s9974_s2 + $0xc40] ss:$16 sps:$4 sm:$0xff]   ;;  %v7658_v21 = vld [vmem:[%s9974_s2 + $0xc48] ss:$16 sps:$4 sm:$0xff]   ;;  %v7663_v23 = vld [vmem:[%s9974_s2 + $0xc64] ss:$16 sps:$4 sm:$0xff]  }
 0x27d   :  { %v7666_v24 = vld [vmem:[%s9974_s2 + $0xc6c] ss:$16 sps:$4 sm:$0xff]  }
 0x27f   :  { %3863 = vmatpush1.bf16.msra.mxu0 %v7589_v22  ;;  %3904 = vmatpush1.bf16.msra.mxu1 %v7592_v25  ;;  %v7661_v22 = vld [vmem:[%s9974_s2 + $0xc60] ss:$16 sps:$4 sm:$0xff]   ;;  %v7664_v25 = vld [vmem:[%s9974_s2 + $0xc68] ss:$16 sps:$4 sm:$0xff]  }
 0x280   :  { %4129 = vmatprep.subr.bf16.mxu0 %v7597_v26  ;;  %4170 = vmatprep.subr.bf16.mxu1 %v7600_v27  ;;  %v7669_v26 = vld [vmem:[%s9974_s2 + $0xc84] ss:$16 sps:$4 sm:$0xff]   ;;  %v7672_v27 = vld [vmem:[%s9974_s2 + $0xc8c] ss:$16 sps:$4 sm:$0xff]  }
 0x282   :  { %3881 = vmatmul.mubr.bf16.vlgmr.msra.gmra.mrb[56].mxu0 %v3686_v30  ;;  %3922 = vmatmul.mubr.bf16.vlgmr.msra.gmra.mrb[56].mxu1 %v3686_v30  ;;  %v7675_v30 = vld [vmem:[%s9974_s2 + $0xca4] ss:$16 sps:$4 sm:$0xff]  }
 0x283   :  { %4130 = vmatpush1.bf16.msra.mxu0 %v7595_v28  ;;  %4171 = vmatpush1.bf16.msra.mxu1 %v7598_v29  ;;  %v7667_v28 = vld [vmem:[%s9974_s2 + $0xc80] ss:$16 sps:$4 sm:$0xff]   ;;  %v7670_v29 = vld [vmem:[%s9974_s2 + $0xc88] ss:$16 sps:$4 sm:$0xff]  }
 0x284   :  { %4131 = vmatprep.subr.bf16.mxu0 %v7603_v31  ;;  %4172 = vmatprep.subr.bf16.mxu1 %v7606_v32  ;;  %v7678_v31 = vld [vmem:[%s9974_s2 + $0xcac] ss:$16 sps:$4 sm:$0xff]   ;;  %v7673_v32 = vld [vmem:[%s9974_s2 + $0xca0] ss:$16 sps:$4 sm:$0xff]  }
 0x285   :  { %4161 = vmatprep.mubr.bf16.mxu0 %v7899_v2  ;;  %4202 = vmatprep.mubr.bf16.mxu1 %v7899_v2 }
 0x287   :  { %4132 = vmatpush1.bf16.msra.mxu0 %v7601_v33  ;;  %4173 = vmatpush1.bf16.msra.mxu1 %v7604_v35  ;;  %v7676_v33 = vld [vmem:[%s9974_s2 + $0xca8] ss:$16 sps:$4 sm:$0xff]   ;;  %v7681_v35 = vld [vmem:[%s9974_s2 + $0xcc4] ss:$16 sps:$4 sm:$0xff]  }
 0x288   :  { %4133 = vmatprep.subr.bf16.mxu0 %v7609_v36  ;;  %4174 = vmatprep.subr.bf16.mxu1 %v7612_v37  ;;  %v7684_v36 = vld [vmem:[%s9974_s2 + $0xccc] ss:$16 sps:$4 sm:$0xff]  }
 0x28b   :  { %4134 = vmatpush1.bf16.msra.mxu0 %v7607_v38  ;;  %4175 = vmatpush1.bf16.msra.mxu1 %v7610_v39 }
 0x28c   :  { %4135 = vmatprep.subr.bf16.mxu0 %v7615_v40  ;;  %4176 = vmatprep.subr.bf16.mxu1 %v7618_v41 }
 0x28f   :  { %4136 = vmatpush1.bf16.msra.mxu0 %v7613_v42  ;;  %4177 = vmatpush1.bf16.msra.mxu1 %v7616_v43 }
 0x290   :  { %4137 = vmatprep.subr.bf16.mxu0 %v7621_v44  ;;  %4178 = vmatprep.subr.bf16.mxu1 %v7624_v45 }
 0x293   :  { %4138 = vmatpush1.bf16.msra.mxu0 %v7619_v46  ;;  %4179 = vmatpush1.bf16.msra.mxu1 %v7622_v47  ;;  %v7679_v47 = vld [vmem:[%s9974_s2 + $0xcc0] ss:$16 sps:$4 sm:$0xff]  }
 0x294   :  { %4139 = vmatprep.subr.bf16.mxu0 %v7627_v48  ;;  %4180 = vmatprep.subr.bf16.mxu1 %v7630_v49  ;;  %v7682_v48 = vld [vmem:[%s9974_s2 + $0xcc8] ss:$16 sps:$4 sm:$0xff]  }
 0x295   :  { %v2197_v54 = vpop.f32.mrb[32].mxu0  ;;  %v2238_v55 = vpop.f32.mrb[32].mxu1 }
 0x296   :  { %v9395_v56 = vadd.f32 %v2197_v54, %v9284_v10  ;;  %v9398_v57 = vadd.f32 %v2238_v55, %v9287_v11  ;;  %v2199_v58 = vpop.f32.mrb[33].mxu0  ;;  %v2240_v59 = vpop.f32.mrb[33].mxu1  ;;  %v7648_v10 = vld [vmem:[%s9974_s2 + $0xc0c] ss:$16 sps:$4 sm:$0xff]   ;;  %v7643_v11 = vld [vmem:[%s9974_s2 + $0xc00] ss:$16 sps:$4 sm:$0xff]  }
 0x297   :  { %v9401_v60 = vadd.f32 %v2199_v58, %v9290_v14  ;;  %v9404_v61 = vadd.f32 %v2240_v59, %v9293_v15  ;;  %v2201_v62 = vpop.f32.mrb[34].mxu0  ;;  %v2242_v63 = vpop.f32.mrb[34].mxu1  ;;  %4140 = vmatpush1.bf16.msra.mxu0 %v7625_v50  ;;  %4181 = vmatpush1.bf16.msra.mxu1 %v7628_v51  ;;  %v7651_v14 = vld [vmem:[%s9974_s2 + $0xc24] ss:$16 sps:$4 sm:$0xff]   ;;  %v7654_v15 = vld [vmem:[%s9974_s2 + $0xc2c] ss:$16 sps:$4 sm:$0xff]  }
 0x298   :  { %v2202_v3 = vpop.f32.mrb[35].mxu0  ;;  %v2243_v4 = vpop.f32.mrb[35].mxu1  ;;  %4141 = vmatprep.subr.bf16.mxu0 %v7633_v52  ;;  %4182 = vmatprep.subr.bf16.mxu1 %v7636_v53  ;;  %v7687_v51 = vld [vmem:[%s9974_s2 + $0xce4] ss:$16 sps:$4 sm:$0xff]   ;;  %v7690_v52 = vld [vmem:[%s9974_s2 + $0xcec] ss:$16 sps:$4 sm:$0xff]  }
 0x299   :  { %v7685_v53 = vld [vmem:[%s9974_s2 + $0xce0] ss:$16 sps:$4 sm:$0xff]   ;;  %v7688_v54 = vld [vmem:[%s9974_s2 + $0xce8] ss:$16 sps:$4 sm:$0xff]   ;;  %v7693_v55 = vld [vmem:[%s9974_s2 + $0xd04] ss:$16 sps:$4 sm:$0xff]  }
 0x29a   :  { %v7694_v58 = vld [vmem:[%s9974_s2 + $0xd08] ss:$16 sps:$4 sm:$0xff]   ;;  %v4248_v59 = vrot.slane %v8308_v34, 4  ;;  %v7697_v62 = vld [vmem:[%s9974_s2 + $0xd20] ss:$16 sps:$4 sm:$0xff]  }
 0x29b   :  { %4142 = vmatpush1.bf16.msra.mxu0 %v7631_v0  ;;  %4183 = vmatpush1.bf16.msra.mxu1 %v7634_v1  ;;  %v7700_v63 = vld [vmem:[%s9974_s2 + $0xd28] ss:$16 sps:$4 sm:$0xff]   ;;  %v7705_v0 = vld [vmem:[%s9974_s2 + $0xd44] ss:$16 sps:$4 sm:$0xff]   ;;  %v7708_v1 = vld [vmem:[%s9974_s2 + $0xd4c] ss:$16 sps:$4 sm:$0xff]  }
 0x29c   :  { %4143 = vmatprep.subr.bf16.mxu0 %v7639_v5  ;;  %4184 = vmatprep.subr.bf16.mxu1 %v7642_v6  ;;  %v7703_v3 = vld [vmem:[%s9974_s2 + $0xd40] ss:$16 sps:$4 sm:$0xff]   ;;  %v7706_v4 = vld [vmem:[%s9974_s2 + $0xd48] ss:$16 sps:$4 sm:$0xff]   ;;  %v7711_v5 = vld [vmem:[%s9974_s2 + $0xd64] ss:$16 sps:$4 sm:$0xff]  }
 0x29d   :  { %v7714_v6 = vld [vmem:[%s9974_s2 + $0xd6c] ss:$16 sps:$4 sm:$0xff]  }
 0x29f   :  { %4144 = vmatpush1.bf16.msra.mxu0 %v7637_v7  ;;  %4185 = vmatpush1.bf16.msra.mxu1 %v7640_v8  ;;  %v7709_v7 = vld [vmem:[%s9974_s2 + $0xd60] ss:$16 sps:$4 sm:$0xff]   ;;  %v7712_v8 = vld [vmem:[%s9974_s2 + $0xd68] ss:$16 sps:$4 sm:$0xff]  }
 0x2a0   :  { %4410 = vmatprep.subr.bf16.mxu0 %v7645_v9  ;;  %4451 = vmatprep.subr.bf16.mxu1 %v7648_v10  ;;  %v7717_v9 = vld [vmem:[%s9974_s2 + $0xd84] ss:$16 sps:$4 sm:$0xff]   ;;  %v7720_v10 = vld [vmem:[%s9974_s2 + $0xd8c] ss:$16 sps:$4 sm:$0xff]  }
 0x2a2   :  { %4162 = vmatmul.mubr.bf16.vlgmr.msra.gmra.mrb[60].mxu0 %v3967_v13  ;;  %4203 = vmatmul.mubr.bf16.vlgmr.msra.gmra.mrb[60].mxu1 %v3967_v13  ;;  %v7723_v13 = vld [vmem:[%s9974_s2 + $0xda4] ss:$16 sps:$4 sm:$0xff]  }
 0x2a3   :  { %4411 = vmatpush1.bf16.msra.mxu0 %v7643_v11  ;;  %4452 = vmatpush1.bf16.msra.mxu1 %v7646_v12  ;;  %v7715_v11 = vld [vmem:[%s9974_s2 + $0xd80] ss:$16 sps:$4 sm:$0xff]   ;;  %v7718_v12 = vld [vmem:[%s9974_s2 + $0xd88] ss:$16 sps:$4 sm:$0xff]  }
 0x2a4   :  { %4412 = vmatprep.subr.bf16.mxu0 %v7651_v14  ;;  %4453 = vmatprep.subr.bf16.mxu1 %v7654_v15  ;;  %v7726_v14 = vld [vmem:[%s9974_s2 + $0xdac] ss:$16 sps:$4 sm:$0xff]   ;;  %v7721_v15 = vld [vmem:[%s9974_s2 + $0xda0] ss:$16 sps:$4 sm:$0xff]  }
 0x2a5   :  { %4442 = vmatprep.mubr.bf16.mxu0 %v7899_v2  ;;  %4483 = vmatprep.mubr.bf16.mxu1 %v7899_v2 }
 0x2a7   :  { %4413 = vmatpush1.bf16.msra.mxu0 %v7649_v16  ;;  %4454 = vmatpush1.bf16.msra.mxu1 %v7652_v17  ;;  %v7724_v16 = vld [vmem:[%s9974_s2 + $0xda8] ss:$16 sps:$4 sm:$0xff]   ;;  %v7729_v17 = vld [vmem:[%s9974_s2 + $0xdc4] ss:$16 sps:$4 sm:$0xff]  }
 0x2a8   :  { %4414 = vmatprep.subr.bf16.mxu0 %v7657_v18  ;;  %4455 = vmatprep.subr.bf16.mxu1 %v7660_v19  ;;  %v7732_v18 = vld [vmem:[%s9974_s2 + $0xdcc] ss:$16 sps:$4 sm:$0xff]  }
 0x2ab   :  { %4415 = vmatpush1.bf16.msra.mxu0 %v7655_v20  ;;  %4456 = vmatpush1.bf16.msra.mxu1 %v7658_v21 }
 0x2ac   :  { %4416 = vmatprep.subr.bf16.mxu0 %v7663_v23  ;;  %4457 = vmatprep.subr.bf16.mxu1 %v7666_v24 }
 0x2af   :  { %4417 = vmatpush1.bf16.msra.mxu0 %v7661_v22  ;;  %4458 = vmatpush1.bf16.msra.mxu1 %v7664_v25 }
 0x2b0   :  { %4418 = vmatprep.subr.bf16.mxu0 %v7669_v26  ;;  %4459 = vmatprep.subr.bf16.mxu1 %v7672_v27 }
 0x2b3   :  { %4419 = vmatpush1.bf16.msra.mxu0 %v7667_v28  ;;  %4460 = vmatpush1.bf16.msra.mxu1 %v7670_v29  ;;  %v7727_v29 = vld [vmem:[%s9974_s2 + $0xdc0] ss:$16 sps:$4 sm:$0xff]  }
 0x2b4   :  { %4420 = vmatprep.subr.bf16.mxu0 %v7675_v30  ;;  %4461 = vmatprep.subr.bf16.mxu1 %v7678_v31  ;;  %v7730_v30 = vld [vmem:[%s9974_s2 + $0xdc8] ss:$16 sps:$4 sm:$0xff]  }
 0x2b5   :  { %v2478_v37 = vpop.f32.mrb[36].mxu0  ;;  %v2519_v38 = vpop.f32.mrb[36].mxu1 }
 0x2b6   :  { %v9506_v39 = vadd.f32 %v2478_v37, %v9395_v56  ;;  %v9509_v40 = vadd.f32 %v2519_v38, %v9398_v57  ;;  %v2480_v41 = vpop.f32.mrb[37].mxu0  ;;  %v2521_v42 = vpop.f32.mrb[37].mxu1  ;;  %v7696_v56 = vld [vmem:[%s9974_s2 + $0xd0c] ss:$16 sps:$4 sm:$0xff]   ;;  %v7691_v57 = vld [vmem:[%s9974_s2 + $0xd00] ss:$16 sps:$4 sm:$0xff]  }
 0x2b7   :  { %v9512_v43 = vadd.f32 %v2480_v41, %v9401_v60  ;;  %v9515_v44 = vadd.f32 %v2521_v42, %v9404_v61  ;;  %v2482_v45 = vpop.f32.mrb[38].mxu0  ;;  %v2523_v46 = vpop.f32.mrb[38].mxu1  ;;  %4421 = vmatpush1.bf16.msra.mxu0 %v7673_v32  ;;  %4462 = vmatpush1.bf16.msra.mxu1 %v7676_v33  ;;  %v7699_v60 = vld [vmem:[%s9974_s2 + $0xd24] ss:$16 sps:$4 sm:$0xff]   ;;  %v7702_v61 = vld [vmem:[%s9974_s2 + $0xd2c] ss:$16 sps:$4 sm:$0xff]  }
 0x2b8   :  { %v2483_v49 = vpop.f32.mrb[39].mxu0  ;;  %v2524_v50 = vpop.f32.mrb[39].mxu1  ;;  %4422 = vmatprep.subr.bf16.mxu0 %v7681_v35  ;;  %4463 = vmatprep.subr.bf16.mxu1 %v7684_v36  ;;  %v7735_v33 = vld [vmem:[%s9974_s2 + $0xde4] ss:$16 sps:$4 sm:$0xff]   ;;  %v7738_v35 = vld [vmem:[%s9974_s2 + $0xdec] ss:$16 sps:$4 sm:$0xff]  }
 0x2b9   :  { %v7733_v36 = vld [vmem:[%s9974_s2 + $0xde0] ss:$16 sps:$4 sm:$0xff]   ;;  %v7736_v37 = vld [vmem:[%s9974_s2 + $0xde8] ss:$16 sps:$4 sm:$0xff]   ;;  %v7741_v38 = vld [vmem:[%s9974_s2 + $0xe04] ss:$16 sps:$4 sm:$0xff]  }
 0x2ba   :  { %v7742_v41 = vld [vmem:[%s9974_s2 + $0xe08] ss:$16 sps:$4 sm:$0xff]   ;;  %v4529_v42 = vrot.slane %v8308_v34, 5  ;;  %v7745_v45 = vld [vmem:[%s9974_s2 + $0xe20] ss:$16 sps:$4 sm:$0xff]  }
 0x2bb   :  { %4423 = vmatpush1.bf16.msra.mxu0 %v7679_v47  ;;  %4464 = vmatpush1.bf16.msra.mxu1 %v7682_v48  ;;  %v7748_v46 = vld [vmem:[%s9974_s2 + $0xe28] ss:$16 sps:$4 sm:$0xff]   ;;  %v7753_v47 = vld [vmem:[%s9974_s2 + $0xe44] ss:$16 sps:$4 sm:$0xff]   ;;  %v7756_v48 = vld [vmem:[%s9974_s2 + $0xe4c] ss:$16 sps:$4 sm:$0xff]  }
 0x2bc   :  { %4424 = vmatprep.subr.bf16.mxu0 %v7687_v51  ;;  %4465 = vmatprep.subr.bf16.mxu1 %v7690_v52  ;;  %v7751_v49 = vld [vmem:[%s9974_s2 + $0xe40] ss:$16 sps:$4 sm:$0xff]   ;;  %v7754_v50 = vld [vmem:[%s9974_s2 + $0xe48] ss:$16 sps:$4 sm:$0xff]   ;;  %v7759_v51 = vld [vmem:[%s9974_s2 + $0xe64] ss:$16 sps:$4 sm:$0xff]  }
 0x2bd   :  { %v7762_v52 = vld [vmem:[%s9974_s2 + $0xe6c] ss:$16 sps:$4 sm:$0xff]  }
 0x2bf   :  { %4425 = vmatpush1.bf16.msra.mxu0 %v7685_v53  ;;  %4466 = vmatpush1.bf16.msra.mxu1 %v7688_v54  ;;  %v7757_v53 = vld [vmem:[%s9974_s2 + $0xe60] ss:$16 sps:$4 sm:$0xff]   ;;  %v7760_v54 = vld [vmem:[%s9974_s2 + $0xe68] ss:$16 sps:$4 sm:$0xff]  }
 0x2c0   :  { %4691 = vmatprep.subr.bf16.mxu0 %v7693_v55  ;;  %4732 = vmatprep.subr.bf16.mxu1 %v7696_v56  ;;  %v7765_v55 = vld [vmem:[%s9974_s2 + $0xe84] ss:$16 sps:$4 sm:$0xff]   ;;  %v7768_v56 = vld [vmem:[%s9974_s2 + $0xe8c] ss:$16 sps:$4 sm:$0xff]  }
 0x2c2   :  { %4443 = vmatmul.mubr.bf16.vlgmr.msra.gmra.mrb[64].mxu0 %v4248_v59  ;;  %4484 = vmatmul.mubr.bf16.vlgmr.msra.gmra.mrb[64].mxu1 %v4248_v59  ;;  %v7771_v59 = vld [vmem:[%s9974_s2 + $0xea4] ss:$16 sps:$4 sm:$0xff]  }
 0x2c3   :  { %4692 = vmatpush1.bf16.msra.mxu0 %v7691_v57  ;;  %4733 = vmatpush1.bf16.msra.mxu1 %v7694_v58  ;;  %v7763_v57 = vld [vmem:[%s9974_s2 + $0xe80] ss:$16 sps:$4 sm:$0xff]   ;;  %v7766_v58 = vld [vmem:[%s9974_s2 + $0xe88] ss:$16 sps:$4 sm:$0xff]  }
 0x2c4   :  { %4693 = vmatprep.subr.bf16.mxu0 %v7699_v60  ;;  %4734 = vmatprep.subr.bf16.mxu1 %v7702_v61  ;;  %v7774_v60 = vld [vmem:[%s9974_s2 + $0xeac] ss:$16 sps:$4 sm:$0xff]   ;;  %v7769_v61 = vld [vmem:[%s9974_s2 + $0xea0] ss:$16 sps:$4 sm:$0xff]  }
 0x2c5   :  { %4723 = vmatprep.mubr.bf16.mxu0 %v7899_v2  ;;  %4764 = vmatprep.mubr.bf16.mxu1 %v7899_v2 }
 0x2c7   :  { %4694 = vmatpush1.bf16.msra.mxu0 %v7697_v62  ;;  %4735 = vmatpush1.bf16.msra.mxu1 %v7700_v63  ;;  %v7772_v62 = vld [vmem:[%s9974_s2 + $0xea8] ss:$16 sps:$4 sm:$0xff]   ;;  %v7777_v63 = vld [vmem:[%s9974_s2 + $0xec4] ss:$16 sps:$4 sm:$0xff]  }
 0x2c8   :  { %4695 = vmatprep.subr.bf16.mxu0 %v7705_v0  ;;  %4736 = vmatprep.subr.bf16.mxu1 %v7708_v1  ;;  %v7780_v0 = vld [vmem:[%s9974_s2 + $0xecc] ss:$16 sps:$4 sm:$0xff]  }
 0x2cb   :  { %4696 = vmatpush1.bf16.msra.mxu0 %v7703_v3  ;;  %4737 = vmatpush1.bf16.msra.mxu1 %v7706_v4 }
 0x2cc   :  { %4697 = vmatprep.subr.bf16.mxu0 %v7711_v5  ;;  %4738 = vmatprep.subr.bf16.mxu1 %v7714_v6 }
 0x2cf   :  { %4698 = vmatpush1.bf16.msra.mxu0 %v7709_v7  ;;  %4739 = vmatpush1.bf16.msra.mxu1 %v7712_v8 }
 0x2d0   :  { %4699 = vmatprep.subr.bf16.mxu0 %v7717_v9  ;;  %4740 = vmatprep.subr.bf16.mxu1 %v7720_v10 }
 0x2d3   :  { %4700 = vmatpush1.bf16.msra.mxu0 %v7715_v11  ;;  %4741 = vmatpush1.bf16.msra.mxu1 %v7718_v12  ;;  %v7775_v12 = vld [vmem:[%s9974_s2 + $0xec0] ss:$16 sps:$4 sm:$0xff]  }
 0x2d4   :  { %4701 = vmatprep.subr.bf16.mxu0 %v7723_v13  ;;  %4742 = vmatprep.subr.bf16.mxu1 %v7726_v14  ;;  %v7778_v13 = vld [vmem:[%s9974_s2 + $0xec8] ss:$16 sps:$4 sm:$0xff]  }
 0x2d5   :  { %v2759_v19 = vpop.f32.mrb[40].mxu0  ;;  %v2800_v20 = vpop.f32.mrb[40].mxu1 }
 0x2d6   :  { %v9617_v21 = vadd.f32 %v2759_v19, %v9506_v39  ;;  %v9620_v23 = vadd.f32 %v2800_v20, %v9509_v40  ;;  %v2761_v24 = vpop.f32.mrb[41].mxu0  ;;  %v2802_v22 = vpop.f32.mrb[41].mxu1  ;;  %v7744_v39 = vld [vmem:[%s9974_s2 + $0xe0c] ss:$16 sps:$4 sm:$0xff]   ;;  %v7739_v40 = vld [vmem:[%s9974_s2 + $0xe00] ss:$16 sps:$4 sm:$0xff]  }
 0x2d7   :  { %v9623_v25 = vadd.f32 %v2761_v24, %v9512_v43  ;;  %v9626_v26 = vadd.f32 %v2802_v22, %v9515_v44  ;;  %v2763_v27 = vpop.f32.mrb[42].mxu0  ;;  %v2804_v28 = vpop.f32.mrb[42].mxu1  ;;  %4702 = vmatpush1.bf16.msra.mxu0 %v7721_v15  ;;  %4743 = vmatpush1.bf16.msra.mxu1 %v7724_v16  ;;  %v7747_v43 = vld [vmem:[%s9974_s2 + $0xe24] ss:$16 sps:$4 sm:$0xff]   ;;  %v7750_v44 = vld [vmem:[%s9974_s2 + $0xe2c] ss:$16 sps:$4 sm:$0xff]  }
 0x2d8   :  { %v2764_v31 = vpop.f32.mrb[43].mxu0  ;;  %v2805_v32 = vpop.f32.mrb[43].mxu1  ;;  %4703 = vmatprep.subr.bf16.mxu0 %v7729_v17  ;;  %4744 = vmatprep.subr.bf16.mxu1 %v7732_v18  ;;  %v7783_v16 = vld [vmem:[%s9974_s2 + $0xee4] ss:$16 sps:$4 sm:$0xff]   ;;  %v7786_v17 = vld [vmem:[%s9974_s2 + $0xeec] ss:$16 sps:$4 sm:$0xff]  }
 0x2d9   :  { %v7781_v18 = vld [vmem:[%s9974_s2 + $0xee0] ss:$16 sps:$4 sm:$0xff]   ;;  %v7784_v19 = vld [vmem:[%s9974_s2 + $0xee8] ss:$16 sps:$4 sm:$0xff]   ;;  %v7789_v20 = vld [vmem:[%s9974_s2 + $0xf04] ss:$16 sps:$4 sm:$0xff]  }
 0x2da   :  { %v7790_v24 = vld [vmem:[%s9974_s2 + $0xf08] ss:$16 sps:$4 sm:$0xff]   ;;  %v4810_v22 = vrot.slane %v8308_v34, 6  ;;  %v7793_v27 = vld [vmem:[%s9974_s2 + $0xf20] ss:$16 sps:$4 sm:$0xff]  }
 0x2db   :  { %4704 = vmatpush1.bf16.msra.mxu0 %v7727_v29  ;;  %4745 = vmatpush1.bf16.msra.mxu1 %v7730_v30  ;;  %v7796_v28 = vld [vmem:[%s9974_s2 + $0xf28] ss:$16 sps:$4 sm:$0xff]   ;;  %v7801_v29 = vld [vmem:[%s9974_s2 + $0xf44] ss:$16 sps:$4 sm:$0xff]   ;;  %v7804_v30 = vld [vmem:[%s9974_s2 + $0xf4c] ss:$16 sps:$4 sm:$0xff]  }
 0x2dc   :  { %4705 = vmatprep.subr.bf16.mxu0 %v7735_v33  ;;  %4746 = vmatprep.subr.bf16.mxu1 %v7738_v35  ;;  %v7799_v31 = vld [vmem:[%s9974_s2 + $0xf40] ss:$16 sps:$4 sm:$0xff]   ;;  %v7802_v32 = vld [vmem:[%s9974_s2 + $0xf48] ss:$16 sps:$4 sm:$0xff]   ;;  %v7807_v33 = vld [vmem:[%s9974_s2 + $0xf64] ss:$16 sps:$4 sm:$0xff]  }
 0x2dd   :  { %v7805_v35 = vld [vmem:[%s9974_s2 + $0xf60] ss:$16 sps:$4 sm:$0xff]  }
 0x2df   :  { %4706 = vmatpush1.bf16.msra.mxu0 %v7733_v36  ;;  %4747 = vmatpush1.bf16.msra.mxu1 %v7736_v37  ;;  %v7808_v36 = vld [vmem:[%s9974_s2 + $0xf68] ss:$16 sps:$4 sm:$0xff]   ;;  %v7813_v37 = vld [vmem:[%s9974_s2 + $0xf84] ss:$16 sps:$4 sm:$0xff]  }
 0x2e0   :  { %4972 = vmatprep.subr.bf16.mxu0 %v7741_v38  ;;  %5013 = vmatprep.subr.bf16.mxu1 %v7744_v39  ;;  %v7816_v38 = vld [vmem:[%s9974_s2 + $0xf8c] ss:$16 sps:$4 sm:$0xff]   ;;  %v7811_v39 = vld [vmem:[%s9974_s2 + $0xf80] ss:$16 sps:$4 sm:$0xff]  }
 0x2e2   :  { %4724 = vmatmul.mubr.bf16.vlgmr.msra.gmra.mrb[68].mxu0 %v4529_v42  ;;  %4765 = vmatmul.mubr.bf16.vlgmr.msra.gmra.mrb[68].mxu1 %v4529_v42  ;;  %v7822_v42 = vld [vmem:[%s9974_s2 + $0xfac] ss:$16 sps:$4 sm:$0xff]  }
 0x2e3   :  { %4973 = vmatpush1.bf16.msra.mxu0 %v7739_v40  ;;  %5014 = vmatpush1.bf16.msra.mxu1 %v7742_v41  ;;  %v7814_v40 = vld [vmem:[%s9974_s2 + $0xf88] ss:$16 sps:$4 sm:$0xff]   ;;  %v7819_v41 = vld [vmem:[%s9974_s2 + $0xfa4] ss:$16 sps:$4 sm:$0xff]  }
 0x2e4   :  { %4974 = vmatprep.subr.bf16.mxu0 %v7747_v43  ;;  %5015 = vmatprep.subr.bf16.mxu1 %v7750_v44  ;;  %v7817_v43 = vld [vmem:[%s9974_s2 + $0xfa0] ss:$16 sps:$4 sm:$0xff]   ;;  %v7820_v44 = vld [vmem:[%s9974_s2 + $0xfa8] ss:$16 sps:$4 sm:$0xff]  }
 0x2e5   :  { %5004 = vmatprep.mubr.bf16.mxu0 %v7899_v2  ;;  %5045 = vmatprep.mubr.bf16.mxu1 %v7899_v2 }
 0x2e7   :  { %4975 = vmatpush1.bf16.msra.mxu0 %v7745_v45  ;;  %5016 = vmatpush1.bf16.msra.mxu1 %v7748_v46  ;;  %v7825_v45 = vld [vmem:[%s9974_s2 + $0xfc4] ss:$16 sps:$4 sm:$0xff]   ;;  %v7828_v46 = vld [vmem:[%s9974_s2 + $0xfcc] ss:$16 sps:$4 sm:$0xff]  }
 0x2e8   :  { %4976 = vmatprep.subr.bf16.mxu0 %v7753_v47  ;;  %5017 = vmatprep.subr.bf16.mxu1 %v7756_v48 }
 0x2eb   :  { %4977 = vmatpush1.bf16.msra.mxu0 %v7751_v49  ;;  %5018 = vmatpush1.bf16.msra.mxu1 %v7754_v50 }
 0x2ec   :  { %4978 = vmatprep.subr.bf16.mxu0 %v7759_v51  ;;  %5019 = vmatprep.subr.bf16.mxu1 %v7762_v52 }
 0x2ef   :  { %4979 = vmatpush1.bf16.msra.mxu0 %v7757_v53  ;;  %5020 = vmatpush1.bf16.msra.mxu1 %v7760_v54 }
 0x2f0   :  { %4980 = vmatprep.subr.bf16.mxu0 %v7765_v55  ;;  %5021 = vmatprep.subr.bf16.mxu1 %v7768_v56 }
 0x2f3   :  { %4981 = vmatpush1.bf16.msra.mxu0 %v7763_v57  ;;  %5022 = vmatpush1.bf16.msra.mxu1 %v7766_v58  ;;  %v7823_v57 = vld [vmem:[%s9974_s2 + $0xfc0] ss:$16 sps:$4 sm:$0xff]   ;;  %v7826_v58 = vld [vmem:[%s9974_s2 + $0xfc8] ss:$16 sps:$4 sm:$0xff]  }
 0x2f4   :  { %4982 = vmatprep.subr.bf16.mxu0 %v7771_v59  ;;  %5023 = vmatprep.subr.bf16.mxu1 %v7774_v60 }
 0x2f5   :  { %v3040_v1 = vpop.f32.mrb[44].mxu0  ;;  %v3081_v3 = vpop.f32.mrb[44].mxu1 }
 0x2f6   :  { %v9728_v4 = vadd.f32 %v3040_v1, %v9617_v21  ;;  %v9731_v5 = vadd.f32 %v3081_v3, %v9620_v23  ;;  %v3042_v6 = vpop.f32.mrb[45].mxu0  ;;  %v3083_v7 = vpop.f32.mrb[45].mxu1  ;;  %v7792_v21 = vld [vmem:[%s9974_s2 + $0xf0c] ss:$16 sps:$4 sm:$0xff]   ;;  %v7787_v23 = vld [vmem:[%s9974_s2 + $0xf00] ss:$16 sps:$4 sm:$0xff]  }
 0x2f7   :  { %v9734_v8 = vadd.f32 %v3042_v6, %v9623_v25  ;;  %v9737_v9 = vadd.f32 %v3083_v7, %v9626_v26  ;;  %v3044_v10 = vpop.f32.mrb[46].mxu0  ;;  %v3085_v11 = vpop.f32.mrb[46].mxu1  ;;  %4983 = vmatpush1.bf16.msra.mxu0 %v7769_v61  ;;  %5024 = vmatpush1.bf16.msra.mxu1 %v7772_v62  ;;  %v7795_v25 = vld [vmem:[%s9974_s2 + $0xf24] ss:$16 sps:$4 sm:$0xff]   ;;  %v7798_v26 = vld [vmem:[%s9974_s2 + $0xf2c] ss:$16 sps:$4 sm:$0xff]  }
 0x2f8   :  { %v3045_v14 = vpop.f32.mrb[47].mxu0  ;;  %v3086_v15 = vpop.f32.mrb[47].mxu1  ;;  %4984 = vmatprep.subr.bf16.mxu0 %v7777_v63  ;;  %5025 = vmatprep.subr.bf16.mxu1 %v7780_v0  ;;  %v7831_v61 = vld [vmem:[%s9974_s2 + $0xfe4] ss:$16 sps:$4 sm:$0xff]   ;;  %v7834_v62 = vld [vmem:[%s9974_s2 + $0xfec] ss:$16 sps:$4 sm:$0xff]  }
 0x2f9   :  { %v7829_v63 = vld [vmem:[%s9974_s2 + $0xfe0] ss:$16 sps:$4 sm:$0xff]   ;;  %v7832_v0 = vld [vmem:[%s9974_s2 + $0xfe8] ss:$16 sps:$4 sm:$0xff]   ;;  %v5091_v1 = vrot.slane %v8308_v34, 7 }
 0x2fb   :  { %4985 = vmatpush1.bf16.msra.mxu0 %v7775_v12  ;;  %5026 = vmatpush1.bf16.msra.mxu1 %v7778_v13 }
 0x2fc   :  { %4986 = vmatprep.subr.bf16.mxu0 %v7783_v16  ;;  %5027 = vmatprep.subr.bf16.mxu1 %v7786_v17 }
 0x2ff   :  { %4987 = vmatpush1.bf16.msra.mxu0 %v7781_v18  ;;  %5028 = vmatpush1.bf16.msra.mxu1 %v7784_v19 }
 0x300   :  { %5253 = vmatprep.subr.bf16.mxu0 %v7789_v20  ;;  %5294 = vmatprep.subr.bf16.mxu1 %v7792_v21 }
 0x302   :  { %5005 = vmatmul.mubr.bf16.vlgmr.msra.gmra.mrb[72].mxu0 %v4810_v22  ;;  %5046 = vmatmul.mubr.bf16.vlgmr.msra.gmra.mrb[72].mxu1 %v4810_v22 }
 0x303   :  { %5254 = vmatpush1.bf16.msra.mxu0 %v7787_v23  ;;  %5295 = vmatpush1.bf16.msra.mxu1 %v7790_v24 }
 0x304   :  { %5255 = vmatprep.subr.bf16.mxu0 %v7795_v25  ;;  %5296 = vmatprep.subr.bf16.mxu1 %v7798_v26 }
 0x305   :  { %5285 = vmatprep.mubr.bf16.mxu0 %v7899_v2  ;;  %5326 = vmatprep.mubr.bf16.mxu1 %v7899_v2  ;;  %v7810_v2 = vld [vmem:[%s9974_s2 + $0xf6c] ss:$16 sps:$4 sm:$0xff]  }
 0x307   :  { %5256 = vmatpush1.bf16.msra.mxu0 %v7793_v27  ;;  %5297 = vmatpush1.bf16.msra.mxu1 %v7796_v28 }
 0x308   :  { %5257 = vmatprep.subr.bf16.mxu0 %v7801_v29  ;;  %5298 = vmatprep.subr.bf16.mxu1 %v7804_v30 }
 0x30b   :  { %5258 = vmatpush1.bf16.msra.mxu0 %v7799_v31  ;;  %5299 = vmatpush1.bf16.msra.mxu1 %v7802_v32 }
 0x30c   :  { %5259 = vmatprep.subr.bf16.mxu0 %v7807_v33  ;;  %5300 = vmatprep.subr.bf16.mxu1 %v7810_v2 }
 0x30f   :  { %5260 = vmatpush1.bf16.msra.mxu0 %v7805_v35  ;;  %5301 = vmatpush1.bf16.msra.mxu1 %v7808_v36 }
 0x310   :  { %5261 = vmatprep.subr.bf16.mxu0 %v7813_v37  ;;  %5302 = vmatprep.subr.bf16.mxu1 %v7816_v38  ;;  %v7835_v38 = vld [vmem:[%s9975_s4 + $0x40] sm:$0xff]  }
 0x313   :  { %5262 = vmatpush1.bf16.msra.mxu0 %v7811_v39  ;;  %5303 = vmatpush1.bf16.msra.mxu1 %v7814_v40  ;;  %v7836_v39 = vld [vmem:[%s9975_s4 + $0xc0] sm:$0xff]  }
 0x314   :  { %5263 = vmatprep.subr.bf16.mxu0 %v7819_v41  ;;  %5304 = vmatprep.subr.bf16.mxu1 %v7822_v42  ;;  %v7837_v40 = vld [vmem:[%s9975_s4] sm:$0xff]   ;;  %v7839_v42 = vld [vmem:[%s9975_s4 + $0x48] sm:$0xff]  }
 0x315   :  { %v3319_v47 = vpop.f32.mrb[48].mxu0  ;;  %v3360_v48 = vpop.f32.mrb[48].mxu1  ;;  %v7838_v41 = vld [vmem:[%s9975_s4 + $0x80] sm:$0xff]  }
 0x316   :  { %v3367_v49 = vadd.f32 %v3319_v47, %v9728_v4  ;;  %v3369_v50 = vadd.f32 %v3360_v48, %v9731_v5  ;;  %v3321_v51 = vpop.f32.mrb[49].mxu0  ;;  %v3362_v52 = vpop.f32.mrb[49].mxu1  ;;  %v7844_v47 = vld [vmem:[%s9975_s4 + $0xd0] sm:$0xff]  }
 0x317   :  { %v3368_v53 = vadd.f32 %v3321_v51, %v9734_v8  ;;  %v3370_v54 = vadd.f32 %v3362_v52, %v9737_v9  ;;  %v3323_v55 = vpop.f32.mrb[50].mxu0  ;;  %v3364_v56 = vpop.f32.mrb[50].mxu1  ;;  %5264 = vmatpush1.bf16.msra.mxu0 %v7817_v43  ;;  %5305 = vmatpush1.bf16.msra.mxu1 %v7820_v44  ;;  %v7840_v43 = vld [vmem:[%s9975_s4 + $0xc8] sm:$0xff]   ;;  %v7845_v48 = vld [vmem:[%s9975_s4 + $0x10] sm:$0xff]   ;;  %v7848_v51 = vld [vmem:[%s9975_s4 + $0xd8] sm:$0xff]  }
 0x318   :  { %v3324_v59 = vpop.f32.mrb[51].mxu0  ;;  %v3365_v60 = vpop.f32.mrb[51].mxu1  ;;  %5265 = vmatprep.subr.bf16.mxu0 %v7825_v45  ;;  %5306 = vmatprep.subr.bf16.mxu1 %v7828_v46  ;;  %v7841_v44 = vld [vmem:[%s9975_s4 + $0x8] sm:$0xff]   ;;  %v7843_v46 = vld [vmem:[%s9975_s4 + $0x50] sm:$0xff]   ;;  %v7849_v52 = vld [vmem:[%s9975_s4 + $0x18] sm:$0xff]  }
 0x319   :  { %v7842_v45 = vld [vmem:[%s9975_s4 + $0x88] sm:$0xff]   ;;  %v7852_v55 = vld [vmem:[%s9975_s4 + $0xe0] sm:$0xff]  }
 0x31a   :  { %v7853_v56 = vld [vmem:[%s9975_s4 + $0x20] sm:$0xff]   ;;  %v7856_v59 = vld [vmem:[%s9975_s4 + $0xe8] sm:$0xff]  }
 0x31b   :  { %5266 = vmatpush1.bf16.msra.mxu0 %v7823_v57  ;;  %5307 = vmatpush1.bf16.msra.mxu1 %v7826_v58  ;;  %v7854_v57 = vld [vmem:[%s9975_s4 + $0xa0] sm:$0xff]   ;;  %v7855_v58 = vld [vmem:[%s9975_s4 + $0x68] sm:$0xff]  }
 0x31c   :  { %5267 = vmatprep.subr.bf16.mxu0 %v7831_v61  ;;  %5308 = vmatprep.subr.bf16.mxu1 %v7834_v62  ;;  %v7857_v60 = vld [vmem:[%s9975_s4 + $0x28] sm:$0xff]   ;;  %v7859_v62 = vld [vmem:[%s9975_s4 + $0x70] sm:$0xff]  }
 0x31d   :  { %v7858_v61 = vld [vmem:[%s9975_s4 + $0xa8] sm:$0xff]  }
 0x31f   :  { %5268 = vmatpush1.bf16.msra.mxu0 %v7829_v63  ;;  %5309 = vmatpush1.bf16.msra.mxu1 %v7832_v0 }
 0x320   :  { %6958 = vmatprep.subr.bf16.mxu0 %v7835_v38  ;;  %6980 = vmatprep.subr.bf16.mxu1 %v7836_v39 }
 0x322   :  { %5286 = vmatmul.mubr.bf16.vlgmr.msra.gmra.mrb[76].mxu0 %v5091_v1  ;;  %5327 = vmatmul.mubr.bf16.vlgmr.msra.gmra.mrb[76].mxu1 %v5091_v1 }
 0x323   :  { %6959 = vmatpush3.bf16.msra.mxu0 %v7837_v40  ;;  %6981 = vmatpush3.bf16.msra.mxu1 %v7838_v41 }
 0x324   :  { %6960 = vmatprep.subr.bf16.mxu0 %v7839_v42  ;;  %6982 = vmatprep.subr.bf16.mxu1 %v7840_v43  ;;  %v5341_v42 = vlaneseq }
 0x326   :  { %v5342_v43 = vshrl.u32 %v5341_v42, 7 }
 0x327   :  { %6961 = vmatpush3.bf16.msra.mxu0 %v7841_v44  ;;  %6983 = vmatpush3.bf16.msra.mxu1 %v7842_v45 }
 0x328   :  { %6962 = vmatprep.subr.bf16.mxu0 %v7843_v46  ;;  %6984 = vmatprep.subr.bf16.mxu1 %v7844_v47  ;;  %v5343_v44 = vsub.s32 0, %v5342_v43  ;;  %v5351_v45 = vsub.s32 2, %v5342_v43  ;;  %v5339_v46 = vld [vmem:[%s9976_s3] sm:$0xf]  ;;  %v5347_v47 = vsub.s32 1, %v5342_v43 }
 0x32b   :  { %6963 = vmatpush3.bf16.msra.mxu0 %v7845_v48  ;;  %v5355_v48 = vsub.s32 3, %v5342_v43 }
 0x335   :  { %v3601_v3 = vpop.f32.mrb[52].mxu0  ;;  %v3642_v4 = vpop.f32.mrb[52].mxu1 }
 0x336   :  { %v3649_v5 = vadd.f32 %v3601_v3, %v3367_v49  ;;  %v3651_v6 = vadd.f32 %v3642_v4, %v3369_v50  ;;  %v3603_v7 = vpop.f32.mrb[53].mxu0  ;;  %v3644_v8 = vpop.f32.mrb[53].mxu1  ;;  %v7846_v49 = vld [vmem:[%s9975_s4 + $0x90] sm:$0xff]   ;;  %v7847_v50 = vld [vmem:[%s9975_s4 + $0x58] sm:$0xff]  }
 0x337   :  { %v3650_v9 = vadd.f32 %v3603_v7, %v3368_v53  ;;  %v3652_v10 = vadd.f32 %v3644_v8, %v3370_v54  ;;  %v3605_v11 = vpop.f32.mrb[54].mxu0  ;;  %v3646_v12 = vpop.f32.mrb[54].mxu1  ;;  %6985 = vmatpush3.bf16.msra.mxu1 %v7846_v49  ;;  %6964 = vmatprep.subr.bf16.mxu0 %v7847_v50  ;;  %v7850_v53 = vld [vmem:[%s9975_s4 + $0x98] sm:$0xff]   ;;  %v7851_v54 = vld [vmem:[%s9975_s4 + $0x60] sm:$0xff]   ;;  %v7861_v7 = vld [vmem:[%s9975_s4 + $0x30] sm:$0xff]   ;;  %v5344_v49 = vrot.slane %v5339_v46, %v5343_v44 }
 0x338   :  { %v3606_v13 = vpop.f32.mrb[55].mxu0  ;;  %v3647_v14 = vpop.f32.mrb[55].mxu1  ;;  %6986 = vmatprep.subr.bf16.mxu1 %v7848_v51  ;;  %6965 = vmatpush3.bf16.msra.mxu0 %v7849_v52  ;;  %v5352_v50 = vrot.slane %v5339_v46, %v5351_v45 }
 0x339   :  { %6966 = vmatprep.subr.bf16.mxu0 %v7851_v54  ;;  %v7862_v14 = vld [vmem:[%s9975_s4 + $0xb0] sm:$0xff]   ;;  %v5356_v54 = vrot.slane %v5339_v46, %v5355_v48 }
 0x33b   :  { %6987 = vmatpush3.bf16.msra.mxu1 %v7850_v53  ;;  %v5348_v53 = vrot.slane %v5339_v46, %v5347_v47 }
 0x33c   :  { %6988 = vmatprep.subr.bf16.mxu1 %v7852_v55  ;;  %6967 = vmatpush3.bf16.msra.mxu0 %v7853_v56 }
 0x33d   :  { %6968 = vmatprep.subr.bf16.mxu0 %v7855_v58 }
 0x33f   :  { %6989 = vmatpush3.bf16.msra.mxu1 %v7854_v57 }
 0x340   :  { %6990 = vmatprep.subr.bf16.mxu1 %v7856_v59  ;;  %6969 = vmatpush3.bf16.msra.mxu0 %v7857_v60 }
 0x341   :  { %6970 = vmatprep.subr.bf16.mxu0 %v7859_v62 }
 0x343   :  { %6991 = vmatpush3.bf16.msra.mxu1 %v7858_v61 }
 0x344   :  { %6971 = vmatpush3.bf16.msra.mxu0 %v7861_v7 }
 0x355   :  { %v3882_v15 = vpop.f32.mrb[56].mxu0  ;;  %v3923_v16 = vpop.f32.mrb[56].mxu1 }
 0x356   :  { %v3930_v17 = vadd.f32 %v3882_v15, %v3649_v5  ;;  %v3932_v18 = vadd.f32 %v3923_v16, %v3651_v6  ;;  %v3884_v19 = vpop.f32.mrb[57].mxu0  ;;  %v3925_v34 = vpop.f32.mrb[57].mxu1  ;;  %v7860_v6 = vld [vmem:[%s9975_s4 + $0xf0] sm:$0xff]   ;;  %v7863_v15 = vld [vmem:[%s9975_s4 + $0x78] sm:$0xff]  }
 0x357   :  { %v3931_v20 = vadd.f32 %v3884_v19, %v3650_v9  ;;  %v3933_v21 = vadd.f32 %v3925_v34, %v3652_v10  ;;  %v3886_v23 = vpop.f32.mrb[58].mxu0  ;;  %v3927_v24 = vpop.f32.mrb[58].mxu1  ;;  %6992 = vmatprep.subr.bf16.mxu1 %v7860_v6  ;;  %6972 = vmatprep.subr.bf16.mxu0 %v7863_v15  ;;  %v7864_v16 = vld [vmem:[%s9975_s4 + $0xf8] sm:$0xff]  }
 0x358   :  { %v3887_v22 = vpop.f32.mrb[59].mxu0  ;;  %v3928_v25 = vpop.f32.mrb[59].mxu1  ;;  %6993 = vmatpush3.bf16.msra.mxu1 %v7862_v14 }
 0x359   :  { %6994 = vmatprep.subr.bf16.mxu1 %v7864_v16 }
 0x375   :  { %v4163_v26 = vpop.f32.mrb[60].mxu0  ;;  %v4204_v27 = vpop.f32.mrb[60].mxu1 }
 0x376   :  { %v4211_v28 = vadd.f32 %v4163_v26, %v3930_v17  ;;  %v4213_v29 = vadd.f32 %v4204_v27, %v3932_v18  ;;  %v4165_v30 = vpop.f32.mrb[61].mxu0  ;;  %v4206_v31 = vpop.f32.mrb[61].mxu1  ;;  %v7865_v17 = vld [vmem:[%s9975_s4 + $0x38] sm:$0xff]  }
 0x377   :  { %v9861_v32 = vadd.f32 %v4165_v30, %v3931_v20  ;;  %v9863_v33 = vadd.f32 %v4206_v31, %v3933_v21  ;;  %v4167_v2 = vpop.f32.mrb[62].mxu0  ;;  %v4208_v35 = vpop.f32.mrb[62].mxu1  ;;  %v7866_v18 = vld [vmem:[%s9975_s4 + $0xb8] sm:$0xff]   ;;  %6973 = vmatpush3.bf16.msra.mxu0 %v7865_v17 }
 0x378   :  { %v4168_v36 = vpop.f32.mrb[63].mxu0  ;;  %v4209_v37 = vpop.f32.mrb[63].mxu1  ;;  %6995 = vmatpush3.bf16.msra.mxu1 %v7866_v18 }
 0x395   :  { %v4444_v63 = vpop.f32.mrb[64].mxu0  ;;  %v4485_v0 = vpop.f32.mrb[64].mxu1 }
 0x396   :  { %v4492_v1 = vadd.f32 %v4444_v63, %v4211_v28  ;;  %v4494_v3 = vadd.f32 %v4485_v0, %v4213_v29  ;;  %v4446_v4 = vpop.f32.mrb[65].mxu0  ;;  %v4487_v5 = vpop.f32.mrb[65].mxu1 }
 0x397   :  { %v4493_v8 = vadd.f32 %v4446_v4, %v9861_v32  ;;  %v4495_v9 = vadd.f32 %v4487_v5, %v9863_v33  ;;  %v4448_v10 = vpop.f32.mrb[66].mxu0  ;;  %v4489_v11 = vpop.f32.mrb[66].mxu1 }
 0x398   :  { %v4449_v12 = vpop.f32.mrb[67].mxu0  ;;  %v4490_v13 = vpop.f32.mrb[67].mxu1 }
 0x3b5   :  { %v4725_v19 = vpop.f32.mrb[68].mxu0  ;;  %v4766_v34 = vpop.f32.mrb[68].mxu1 }
 0x3b6   :  { %v4773_v20 = vadd.f32 %v4725_v19, %v4492_v1  ;;  %v4775_v21 = vadd.f32 %v4766_v34, %v4494_v3  ;;  %v4727_v23 = vpop.f32.mrb[69].mxu0  ;;  %v4768_v24 = vpop.f32.mrb[69].mxu1 }
 0x3b7   :  { %v4774_v22 = vadd.f32 %v4727_v23, %v4493_v8  ;;  %v4776_v25 = vadd.f32 %v4768_v24, %v4495_v9  ;;  %v4729_v26 = vpop.f32.mrb[70].mxu0  ;;  %v4770_v27 = vpop.f32.mrb[70].mxu1 }
 0x3b8   :  { %v4730_v28 = vpop.f32.mrb[71].mxu0  ;;  %v4771_v29 = vpop.f32.mrb[71].mxu1 }
 0x3d5   :  { %v5006_v30 = vpop.f32.mrb[72].mxu0  ;;  %v5047_v31 = vpop.f32.mrb[72].mxu1 }
 0x3d6   :  { %v5054_v32 = vadd.f32 %v5006_v30, %v4773_v20  ;;  %v5056_v33 = vadd.f32 %v5047_v31, %v4775_v21  ;;  %v5008_v2 = vpop.f32.mrb[73].mxu0  ;;  %v5049_v35 = vpop.f32.mrb[73].mxu1 }
 0x3d7   :  { %v5055_v36 = vadd.f32 %v5008_v2, %v4774_v22  ;;  %v5057_v37 = vadd.f32 %v5049_v35, %v4776_v25  ;;  %v5010_v38 = vpop.f32.mrb[74].mxu0  ;;  %v5051_v39 = vpop.f32.mrb[74].mxu1  ;;  %v6813_v35 = vld [vmem:[%s9977_s5] ss:$0 sm:$0xff] }
 0x3d8   :  { %v5011_v40 = vpop.f32.mrb[75].mxu0  ;;  %v5052_v41 = vpop.f32.mrb[75].mxu1 }
 0x3f5   :  { %v5287_v51 = vpop.f32.mrb[76].mxu0  ;;  %v5328_v52 = vpop.f32.mrb[76].mxu1 }
 0x3f6   :  { %v5335_v55 = vadd.f32 %v5287_v51, %v5054_v32  ;;  %v5337_v56 = vadd.f32 %v5328_v52, %v5056_v33  ;;  %v5289_v57 = vpop.f32.mrb[77].mxu0  ;;  %v5330_v58 = vpop.f32.mrb[77].mxu1 }
 0x3f7   :  { %v5336_v59 = vadd.f32 %v5289_v57, %v5055_v36  ;;  %v5338_v60 = vadd.f32 %v5330_v58, %v5057_v37  ;;  %v5291_v61 = vpop.f32.mrb[78].mxu0  ;;  %v5332_v62 = vpop.f32.mrb[78].mxu1 }
 0x3f8   :  { %v5361_v63 = vadd.f32 %v5344_v49, %v5335_v55  ;;  %v5363_v0 = vadd.f32 %v5352_v50, %v5337_v56  ;;  %v5292_v1 = vpop.f32.mrb[79].mxu0  ;;  %v5333_v3 = vpop.f32.mrb[79].mxu1 }
 0x3f9   :  { %v5362_v4 = vadd.f32 %v5348_v53, %v5336_v59  ;;  %v5364_v5 = vadd.f32 %v5356_v54, %v5338_v60 }
 0x3fa   :  { %v5365_v6 = vsub.f32 0.0, %v5361_v63  ;;  %v5367_v7 = vsub.f32 0.0, %v5363_v0 }
 0x3fb   :  { %v5366_v8 = vsub.f32 0.0, %v5362_v4  ;;  %v5368_v9 = vsub.f32 0.0, %v5364_v5 }
 0x3fc   :  { %v5369_v10 = vmul.f32 1.442695, %v5365_v6  ;;  %v5373_v11 = vmul.f32 1.442695, %v5367_v7 }
 0x3fd   :  { %v5371_v12 = vmul.f32 1.442695, %v5366_v8  ;;  %v5375_v13 = vmul.f32 1.442695, %v5368_v9 }
 0x3fe   :  { %7883 = vpow2.f32 %v5369_v10 }
 0x3ff   :  { %7885 = vpow2.f32 %v5373_v11 }
 0x400   :  { %7887 = vpow2.f32 %v5371_v12 }
 0x401   :  { %7889 = vpow2.f32 %v5375_v13 }
 0x408   :  { %v7884_v14 = vpop.eup %7883 }
 0x409   :  { %v7886_v15 = vpop.eup %7885  ;;  %v5377_v16 = vadd.f32 1.0, %v7884_v14 }
 0x40a   :  { %v7888_v17 = vpop.eup %7887  ;;  %v5379_v18 = vadd.f32 1.0, %v7886_v15 }
 0x40b   :  { %v7890_v19 = vpop.eup %7889  ;;  %7891 = vrcp.f32 %v5377_v16  ;;  %v5378_v34 = vadd.f32 1.0, %v7888_v17 }
 0x40c   :  { %7893 = vrcp.f32 %v5379_v18  ;;  %v5380_v20 = vadd.f32 1.0, %v7890_v19 }
 0x40d   :  { %7895 = vrcp.f32 %v5378_v34 }
 0x40e   :  { %7897 = vrcp.f32 %v5380_v20 }
 0x415   :  { %v7892_v21 = vpop.eup %7891 }
 0x416   :  { %v7894_v23 = vpop.eup %7893  ;;  %v5385_v22 = vmul.f32 %v7892_v21, %v5361_v63 }
 0x417   :  { %v7896_v24 = vpop.eup %7895  ;;  %v5387_v26 = vmul.f32 %v7894_v23, %v5363_v0 }
 0x418   :  { %v7898_v25 = vpop.eup %7897  ;;  %v5386_v27 = vmul.f32 %v7896_v24, %v5362_v4  ;;  %v5389_v30 = vpack.c.bf16 %v5385_v22, %v5385_v22 }
 0x419   :  { %v5388_v28 = vmul.f32 %v7898_v25, %v5364_v5  ;;  %v5391_v32 = vpack.c.bf16 %v5387_v26, %v5387_v26 }
 0x41a   :  { %v5390_v29 = vpack.c.bf16 %v5386_v27, %v5386_v27 }
 0x41b   :  { %v5392_v31 = vpack.c.bf16 %v5388_v28, %v5388_v28 }
 0x41c   :  { %5688 = vmatprep.mubr.bf16.mxu0 %v5390_v29 }
 0x41d   :  { %5728 = vmatprep.mubr.bf16.mxu1 %v5392_v31  ;;  %5689 = vmatmul.mubr.bf16.vlgmr.msra.gmra.mrb[80].mxu0 %v5389_v30 }
 0x41e   :  { %5729 = vmatmul.mubr.bf16.vlgmr.msra.gmra.mrb[80].mxu1 %v5391_v32 }
 0x4f0   :  { %v6974_v33 = vpop.f32.mrb[80].mxu0 }
 0x4f1   :  { %v6996_v2 = vpop.f32.mrb[80].mxu1  ;;  %v6975_v36 = vpop.f32.mrb[81].mxu0 }
 0x4f2   :  { %v6976_v37 = vadd.f32 %v6975_v36, %v6974_v33  ;;  %v6997_v38 = vpop.f32.mrb[81].mxu1  ;;  %v6977_v39 = vpop.f32.mrb[82].mxu0 }
 0x4f3   :  { %v6998_v40 = vadd.f32 %v6997_v38, %v6996_v2  ;;  %v6999_v41 = vpop.f32.mrb[82].mxu1  ;;  %v6978_v42 = vpop.f32.mrb[83].mxu0 }
 0x4f4   :  { %v5691_v43 = vadd.f32 %v6976_v37, %v6813_v35  ;;  %v7000_v44 = vpop.f32.mrb[83].mxu1 }
 0x4f6   :  { %v5731_v45 = vadd.f32 %v6998_v40, %v5691_v43 }
 0x4f8   :  { %5736 = vst [vmem:[%s9978_s6] sm:$0x3] %v5731_v45 }

</bundles_post_ra>
